<compile_context>
chip_gen: v6e
topology: v6e:2x2x1
jax: 0.10.0
libtpu: 0.0.40
codegen_flags: <defaults>
</compile_context>

<pallas_src>
import functools

import jax
import jax.numpy as jnp
from jax.experimental import pallas as pl
from jax.experimental.pallas import tpu as pltpu


_VMEM_LIMIT = 32 * 1024 * 1024   # conservative; fits v7x's 64 MiB/TC with headroom
_TM_MAX = 2048                   # lane tile (multiple of 128); sweep 2048-4096


# ----------------------------------------------------------------------------
# In-kernel building blocks (transposed / lane-dense layout).
#
# With zero conductance noise, the 8 bitplane matmuls of `quantization` collapse
# algebraically to a single MXU matmul on the reconstructed uint8 code q:
#     z = sum_i W @ (bit_i(q) * 2^i) = W @ q
# and `re_quantization` is   z / 255 * (max - min) + min * rowsum(W).
# ----------------------------------------------------------------------------
def _quantize(x, mn, rng):
    safe_rng = jnp.where(rng > 0.0, rng, 1.0)   # guard max == min (torch would NaN)
    scale = 255.0 / safe_rng                    # hoisted scalar
    return jnp.clip(jnp.floor((x - mn) * scale), 0.0, 255.0)


def _requant_t(z_t, mn, rng, wrow):
    # z_t: (N, tm) rows-on-lanes; wrow: (N, 1) = sum(W, axis=1).  Lane-dense.
    return z_t * (rng * (1.0 / 255.0)) + mn * wrow


def _fc1_t(x_tile, mn, rng, w1, w1row):
    """x_tile: (tm, K) natural HBM layout (rows on sublanes); w1: (N1, K).
    Returns h^T = re_quant(W1 @ q^T) of shape (N1, tm) -> rows on lanes."""
    q = _quantize(x_tile, mn, rng)              # few VPU ops in the narrow layout
    # Contract K of W1 (N1,K) with K of q (tm,K)  ==  W1 @ q^T  ->  (N1, tm).
    # f32 operands: MXU has huge slack here; keeps bit-closeness to the torch ref.
    z_t = jax.lax.dot_general(w1, q, (((1,), (1,)), ((), ())),
                              preferred_element_type=jnp.float32)
    return _requant_t(z_t, mn, rng, w1row)


def _fc2_t(h_t, mn, rng, w2, w2row):
    """h_t: (N1, tm); w2: (N2, N1).  Returns c^T of shape (N2, tm)."""
    q = _quantize(h_t, mn, rng)                 # lane-dense
    z_t = jnp.dot(w2, q, preferred_element_type=jnp.float32)
    return _requant_t(z_t, mn, rng, w2row)


# ----------------------------------------------------------------------------
# Pallas kernels
# ----------------------------------------------------------------------------
def _hstats_kernel(M, tm, nb, nbh, s_ref, x_ref, w1_ref, w1row_ref,
                   hmin_ref, hmax_ref):
    """Per-core running global min/max of h = relu(re_quant(fc1(quant(x))))."""
    c = pl.program_id(0)        # core-parallel axis (v7x megacore)
    j = pl.program_id(1)        # sequential row-block axis

    @pl.when(j == 0)
    def _():
        hmin_ref[...] = jnp.full(hmin_ref.shape, jnp.inf, jnp.float32)
        hmax_ref[...] = jnp.full(hmax_ref.shape, -jnp.inf, jnp.float32)

    mn1 = s_ref[0]
    rng1 = s_ref[1] - mn1
    h_t = _fc1_t(x_ref[...], mn1, rng1, w1_ref[...], w1row_ref[...])
    h_t = jnp.maximum(h_t, 0.0)                 # ReLU before the 2nd quantization

    if M % tm != 0:
        # Mask lanes of the ragged last block (their VMEM content is undefined).
        bi = jnp.minimum(c * nbh + j, nb - 1)
        lane = jax.lax.broadcasted_iota(jnp.int32, h_t.shape, 1) + bi * tm
        valid = lane < M
        h_lo = jnp.where(valid, h_t, jnp.inf)
        h_hi = jnp.where(valid, h_t, -jnp.inf)
    else:
        h_lo = h_hi = h_t

    hmin_ref[...] = jnp.minimum(hmin_ref[...], jnp.min(h_lo))
    hmax_ref[...] = jnp.maximum(hmax_ref[...], jnp.max(h_hi))


def _fused2_gated_kernel(F, has_mask, s_ref, x_ref, *refs):
    """quant->fc1->re_quant->relu->quant->fc2->re_quant->sigmoid*tanh(*mask),
    computed in the transposed (features-on-sublanes, rows-on-lanes) layout."""
    if has_mask:
        m_ref, w1_ref, w1row_ref, w2_ref, w2row_ref, o_ref = refs
    else:
        w1_ref, w1row_ref, w2_ref, w2row_ref, o_ref = refs
        m_ref = None

    mn1 = s_ref[0]
    rng1 = s_ref[1] - mn1
    mn2 = s_ref[2]
    rng2 = s_ref[3] - mn2

    h_t = _fc1_t(x_ref[...], mn1, rng1, w1_ref[...], w1row_ref[...])
    h_t = jnp.maximum(h_t, 0.0)
    c_t = _fc2_t(h_t, mn2, rng2, w2_ref[...], w2row_ref[...])

    gate = c_t[:F, :]            # sublane split (F rows each, F % 8 == 0 typical)
    extract = c_t[F:, :]
    # exp/tanh go to the EUP; the tiny (F, tm) divide is negligible on the VPU.
    out = (1.0 / (1.0 + jnp.exp(-gate))) * jnp.tanh(extract)
    if has_mask:
        out = out * m_ref[...]   # (1, tm) broadcast over F sublanes, lane-dense
    o_ref[...] = out             # full-width lane-dense store


# ----------------------------------------------------------------------------
# Wrapper: fused two-layer quantized MLP + gate (transposed output).
# ----------------------------------------------------------------------------
def fused_quant_mlp_gated_t(x, W1, W2, mask=None, *, tm_max=_TM_MAX):
    """x: (..., K) f32; W1: (N1, K); W2: (N2, N1) (PyTorch nn.Linear layout,
    N2 = 2*F); mask: optional flat (M,) 0/1 array multiplied into the result.
    Returns the gated output TRANSPOSED: (F, M), M = prod(x.shape[:-1])."""
    K = x.shape[-1]
    N2 = W2.shape[0]
    F = N2 // 2

    x2 = x.reshape(-1, K).astype(jnp.float32)
    M = x2.shape[0]

    W1 = jnp.asarray(W1, jnp.float32)
    W2 = jnp.asarray(W2, jnp.float32)
    w1row = jnp.sum(W1, axis=1)[:, None]        # (N1, 1) re_quant bias factor
    w2row = jnp.sum(W2, axis=1)[:, None]        # (N2, 1)

    # Layer-1 global min/max: one fused XLA reduction pass over x.
    minmax1 = jnp.stack([jnp.min(x2), jnp.max(x2)])               # (2,) f32

    assert tm_max % 128 == 0
    tm = M if M <= tm_max else tm_max           # lane tile (128-aligned when tiled)
    nb = pl.cdiv(M, tm)
    nbh = pl.cdiv(nb, 2)                        # row-blocks per core (2-way split)

    # ---- Pass 1: global min/max of the hidden activation.  x is streamed once,
    # h is never written to HBM.  Leading grid axis is core-parallel (megacore);
    # each core keeps its own (8,128) partial min/max accumulator, combined below.
    hmin, hmax = pl.pallas_call(
        functools.partial(_hstats_kernel, M, tm, nb, nbh),
        out_shape=(jax.ShapeDtypeStruct((16, 128), jnp.float32),
                   jax.ShapeDtypeStruct((16, 128), jnp.float32)),
        grid=(2, nbh),
        in_specs=[
            pl.BlockSpec(memory_space=pltpu.MemorySpace.SMEM),      # [min1, max1]
            pl.BlockSpec((tm, K),
                         lambda c, j: (jnp.minimum(c * nbh + j, nb - 1), 0)),
            pl.BlockSpec(memory_space=pltpu.MemorySpace.VMEM),      # W1 (1 copy)
            pl.BlockSpec(memory_space=pltpu.MemorySpace.VMEM),      # rowsum(W1)
        ],
        out_specs=(pl.BlockSpec((8, 128), lambda c, j: (c, 0)),
                   pl.BlockSpec((8, 128), lambda c, j: (c, 0))),
        compiler_params=pltpu.CompilerParams(
            dimension_semantics=("parallel", "arbitrary"),
            vmem_limit_bytes=_VMEM_LIMIT),
    )(minmax1, x2, W1, w1row)

    scalars = jnp.stack([minmax1[0], minmax1[1], jnp.min(hmin), jnp.max(hmax)])

    # ---- Pass 2: fully fused fc1 -> relu -> fc2 -> gate (-> mask); only the
    # (F, M) transposed gated result is written to HBM.  Row axis is 'parallel'.
    has_mask = mask is not None
    in_specs = [
        pl.BlockSpec(memory_space=pltpu.MemorySpace.SMEM),          # [mn1,mx1,mn2,mx2]
        pl.BlockSpec((tm, K), lambda i: (i, 0)),                    # x tile
    ]
    args = [scalars, x2]
    if has_mask:
        in_specs.append(pl.BlockSpec((1, tm), lambda i: (0, i)))    # mask tile
        args.append(mask.reshape(1, M).astype(jnp.float32))
    in_specs += [pl.BlockSpec(memory_space=pltpu.MemorySpace.VMEM)] * 4
    args += [W1, w1row, W2, w2row]

    out_t = pl.pallas_call(
        functools.partial(_fused2_gated_kernel, F, has_mask),
        out_shape=jax.ShapeDtypeStruct((F, M), jnp.float32),
        grid=(nb,),
        in_specs=in_specs,
        out_specs=pl.BlockSpec((F, tm), lambda i: (0, i)),
        compiler_params=pltpu.CompilerParams(
            dimension_semantics=("parallel",),
            vmem_limit_bytes=_VMEM_LIMIT),
    )(*args)
    return out_t


# ----------------------------------------------------------------------------
# JAX glue (gathers / reductions / batchnorm), operating on the transposed
# kernel outputs so no big transposes are materialized.
# ----------------------------------------------------------------------------
def batchnorm_1d_t(x_t, eps=1e-5):
    # nn.BatchNorm1d with training-mode batch statistics and default affine
    # (gamma=1, beta=0), applied in the transposed (F, N) layout.
    mean = jnp.mean(x_t, axis=1, keepdims=True)
    var = jnp.mean((x_t - mean) ** 2, axis=1, keepdims=True)
    return (x_t - mean) / jnp.sqrt(var + eps)


def get_node_k(node_embedding, nbr_idx):
    # node_k[b,i,j,k] = node_embedding[b, nbr_idx[b, nbr_idx[b,i,j], k]]
    B, At, Nbr = nbr_idx.shape
    Fn = node_embedding.shape[-1]
    idx_j = nbr_idx.reshape(B, At * Nbr)
    nbr_of_j = jnp.take_along_axis(nbr_idx, idx_j[:, :, None], axis=1)  # (B, At*Nbr, Nbr)
    flat = nbr_of_j.reshape(B, At * Nbr * Nbr)
    node_k = jnp.take_along_axis(node_embedding, flat[:, :, None], axis=1)
    return node_k.reshape(B, At, Nbr, Nbr, Fn)


def get_edge_jk(edge_embedding, nbr_idx):
    # edge_jk[b,i,j,k] = edge_embedding[b, nbr_idx[b,i,j], k]
    B, At, Nbr, Fe = edge_embedding.shape
    idx = nbr_idx.reshape(B, At * Nbr)
    g = jnp.take_along_axis(edge_embedding, idx[:, :, None, None], axis=1)
    return g.reshape(B, At, Nbr, Nbr, Fe)


def node_update(node_emb, edge_emb, nbr_mask, W_fc, W_fc2):
    B, At, Nbr, Fe = edge_emb.shape
    Fn = node_emb.shape[-1]
    node_i = jnp.broadcast_to(node_emb[:, :, None, :], (B, At, Nbr, Fn))
    c1 = jnp.concatenate([node_i, edge_emb], axis=3)               # (B,At,Nbr,Fn+Fe)
    # gated output comes back transposed (Fn, B*At*Nbr) and already masked.
    gated_t = fused_quant_mlp_gated_t(c1, W_fc, W_fc2, mask=nbr_mask.reshape(-1))
    nbr_sumed_t = jnp.sum(gated_t.reshape(Fn, B * At, Nbr), axis=2)  # (Fn, B*At)
    nbr_sumed_t = batchnorm_1d_t(nbr_sumed_t)
    nbr_sumed = nbr_sumed_t.T.reshape(B, At, Fn)
    return jnp.maximum(node_emb + nbr_sumed, 0.0)


def edge_update(node_emb, edge_emb, nbr_idx, nbr_mask, W2b, W2b2, W3b, W3b2):
    B, At, Nbr, Fe = edge_emb.shape
    Fn = node_emb.shape[-1]

    nbh = nbr_idx.reshape(B, At * Nbr)
    node_i = jnp.broadcast_to(node_emb[:, :, None, :], (B, At, Nbr, Fn))
    node_j = jnp.take_along_axis(node_emb, nbh[:, :, None], axis=1).reshape(B, At, Nbr, Fn)
    node_j = node_j * nbr_mask[..., None]

    # --- two-body --- (no mask multiply on the gated output in the reference)
    c2 = jnp.concatenate([node_i, node_j], axis=3)                 # (B,At,Nbr,2Fn)
    two_t = fused_quant_mlp_gated_t(c2, W2b, W2b2)                 # (Fe, B*At*Nbr)
    two_t = batchnorm_1d_t(two_t)
    two_body = two_t.T.reshape(B, At, Nbr, Fe)

    # --- three-body ---
    edge_ij = jnp.broadcast_to(edge_emb[:, :, :, None, :], (B, At, Nbr, Nbr, Fe))
    node_i5 = jnp.broadcast_to(node_i[:, :, :, None, :], (B, At, Nbr, Nbr, Fn))
    node_j5 = jnp.broadcast_to(node_j[:, :, :, None, :], (B, At, Nbr, Nbr, Fn))
    node_k = get_node_k(node_emb, nbr_idx)
    edge_jk = get_edge_jk(edge_emb, nbr_idx)
    c3 = jnp.concatenate([node_i5, node_j5, node_k, edge_ij, edge_jk], axis=4)

    nbr_idx_expand = jnp.broadcast_to(nbr_idx[:, :, :, None], (B, At, Nbr, Nbr))
    nbr_idx_expand = nbr_idx_expand.reshape(B, At * Nbr, Nbr)
    nbr_mask_expand = jnp.take_along_axis(nbr_mask, nbr_idx_expand, axis=1)
    nbr_mask_expand = nbr_mask_expand.reshape(B, At, Nbr, Nbr)

    three_t = fused_quant_mlp_gated_t(
        c3, W3b, W3b2, mask=nbr_mask_expand.reshape(-1))           # (Fe, B*At*Nbr*Nbr)
    three_t = jnp.sum(three_t.reshape(Fe, B * At * Nbr, Nbr), axis=2)  # sum over k
    three_t = batchnorm_1d_t(three_t)
    three_body = three_t.T.reshape(B, At, Nbr, Fe)

    return jnp.maximum(edge_emb + two_body + three_body, 0.0)


@jax.jit
def reservoir_forward(node_emb, edge_emb, nbr_idx, nbr_mask, conductance):
    # conductance[i] plays the role of conductance[i][0] (== fc.weight) in the
    # PyTorch module (and of conductance[1][-1] for NodeUpdate's second re_quant).
    W_node_fc, W_node_fc2, W_2b, W_2b2, W_3b, W_3b2 = conductance
    node_new = node_update(node_emb, edge_emb, nbr_mask, W_node_fc, W_node_fc2)
    edge_new = edge_update(node_new, edge_emb, nbr_idx, nbr_mask,
                           W_2b, W_2b2, W_3b, W_3b2)
    return node_new, edge_new


# ----------------------------------------------------------------------------
# Driver
# ----------------------------------------------------------------------------
if __name__ == "__main__":
    B, At, Nbr = 2, 8, 4
    Fn, Fe = 8, 8

    key = jax.random.PRNGKey(0)
    keys = jax.random.split(key, 10)

    node_embedding = jax.random.normal(keys[0], (B, At, Fn), dtype=jnp.float32)
    edge_embedding = jax.random.normal(keys[1], (B, At, Nbr, Fe), dtype=jnp.float32)
    nbr_idx = jax.random.randint(keys[2], (B, At, Nbr), 0, At, dtype=jnp.int32)
    nbr_mask = (jax.random.uniform(keys[3], (B, At, Nbr)) < 0.8).astype(jnp.float32)

    # Deterministic "conductance" weight matrices (PyTorch nn.Linear layout: (out, in)).
    def w(k, out_f, in_f):
        return jax.random.normal(k, (out_f, in_f), dtype=jnp.float32) * 0.1

    conductance = (
        w(keys[4], 4 * Fn + 4 * Fe, Fn + Fe),            # NodeUpdate.fc
        w(keys[5], 2 * Fn, 4 * Fn + 4 * Fe),             # NodeUpdate.fc_2
        w(keys[6], 8 * Fn, 2 * Fn),                      # EdgeUpdate.fc_two_body
        w(keys[7], 2 * Fe, 8 * Fn),                      # EdgeUpdate.fc_two_body_2
        w(keys[8], 6 * Fn + 4 * Fe, 3 * Fn + 2 * Fe),    # EdgeUpdate.fc_three_body
        w(keys[9], 2 * Fe, 6 * Fn + 4 * Fe),             # EdgeUpdate.fc_three_body_2
    )

    node_out, edge_out = reservoir_forward(
        node_embedding, edge_embedding, nbr_idx, nbr_mask, conductance)
    jax.block_until_ready((node_out, edge_out))

    assert node_out.shape == (B, At, Fn)
    assert edge_out.shape == (B, At, Nbr, Fe)
    assert bool(jnp.all(jnp.isfinite(node_out))) and bool(jnp.all(jnp.isfinite(edge_out)))
    print("KERNEL_OK")
</pallas_src>

<mosaic_0001>
module attributes {stable_mosaic.version = 11 : i64} {
  func.func @_hstats_kernel(%arg0: i32, %arg1: i32, %arg2: memref<2xf32, #tpu.memory_space<smem>>, %arg3: memref<64x16xf32, #tpu.memory_space<vmem>>, %arg4: memref<64x16xf32, #tpu.memory_space<vmem>>, %arg5: memref<64x1xf32, #tpu.memory_space<vmem>>, %arg6: memref<8x128xf32, #tpu.memory_space<vmem>>, %arg7: memref<8x128xf32, #tpu.memory_space<vmem>>) attributes {dimension_semantics = [#tpu.dimension_semantics<parallel>, #tpu.dimension_semantics<arbitrary>], iteration_bounds = array<i64: 2, 1>, scalar_prefetch = 0 : i64, scratch_operands = 0 : i64, tpu.core_type = #tpu.core_type<tc>, window_params = [{transform_indices = @transform_0, window_bounds = array<i64: 2>}, {transform_indices = @transform_1, window_bounds = array<i64: 64, 16>}, {pipeline_mode = #tpu.pipeline_mode<synchronous>, transform_indices = @transform_2, window_bounds = array<i64: 64, 16>}, {pipeline_mode = #tpu.pipeline_mode<synchronous>, transform_indices = @transform_3, window_bounds = array<i64: 64, 1>}, {transform_indices = @transform_4, window_bounds = array<i64: 8, 128>}, {transform_indices = @transform_5, window_bounds = array<i64: 8, 128>}]} {
    %c0_i32 = arith.constant 0 : i32
    %0 = arith.cmpi eq, %arg1, %c0_i32 : i32
    %1 = arith.extui %0 : i1 to i32
    %c0_i32_0 = arith.constant 0 : i32
    %2 = arith.cmpi ne, %1, %c0_i32_0 : i32
    scf.if %2 {
      %cst_24 = arith.constant 0x7F800000 : f32
      %47 = vector.broadcast %cst_24 : f32 to vector<8x128xf32>
      %c0_25 = arith.constant 0 : index
      %c0_26 = arith.constant 0 : index
      %48 = vector.load %arg6[%c0_25, %c0_26] : memref<8x128xf32, #tpu.memory_space<vmem>>, vector<8x128xf32>
      tpu.vector_store %arg6[%c0_25, %c0_26], %47 {strides = array<i32>} : memref<8x128xf32, #tpu.memory_space<vmem>>, vector<8x128xf32>,
      %cst_27 = arith.constant 0xFF800000 : f32
      %49 = vector.broadcast %cst_27 : f32 to vector<8x128xf32>
      %c0_28 = arith.constant 0 : index
      %c0_29 = arith.constant 0 : index
      %50 = vector.load %arg7[%c0_28, %c0_29] : memref<8x128xf32, #tpu.memory_space<vmem>>, vector<8x128xf32>
      tpu.vector_store %arg7[%c0_28, %c0_29], %49 {strides = array<i32>} : memref<8x128xf32, #tpu.memory_space<vmem>>, vector<8x128xf32>,
    } else {
    }
    %c0 = arith.constant 0 : index
    %3 = memref.load %arg2[%c0] : memref<2xf32, #tpu.memory_space<smem>>
    %c1 = arith.constant 1 : index
    %4 = memref.load %arg2[%c1] : memref<2xf32, #tpu.memory_space<smem>>
    %5 = arith.subf %4, %3 : f32
    %c0_1 = arith.constant 0 : index
    %c0_2 = arith.constant 0 : index
    %6 = vector.load %arg3[%c0_1, %c0_2] : memref<64x16xf32, #tpu.memory_space<vmem>>, vector<64x16xf32>
    %c0_3 = arith.constant 0 : index
    %c0_4 = arith.constant 0 : index
    %7 = vector.load %arg4[%c0_3, %c0_4] : memref<64x16xf32, #tpu.memory_space<vmem>>, vector<64x16xf32>
    %c0_5 = arith.constant 0 : index
    %c0_6 = arith.constant 0 : index
    %8 = vector.load %arg5[%c0_5, %c0_6] : memref<64x1xf32, #tpu.memory_space<vmem>>, vector<64x1xf32>
    %cst = arith.constant 0.000000e+00 : f32
    %9 = arith.cmpf ogt, %5, %cst : f32
    %cst_7 = arith.constant 1.000000e+00 : f32
    %10 = arith.select %9, %5, %cst_7 : f32
    %cst_8 = arith.constant 2.550000e+02 : f32
    %11 = arith.divf %cst_8, %10 : f32
    %12 = vector.broadcast %3 : f32 to vector<64x16xf32>
    %13 = arith.subf %6, %12 : vector<64x16xf32>
    %14 = vector.broadcast %11 : f32 to vector<64x16xf32>
    %15 = arith.mulf %13, %14 : vector<64x16xf32>
    %16 = math.floor %15 : vector<64x16xf32>
    %cst_9 = arith.constant 0.000000e+00 : f32
    %cst_10 = arith.constant 2.550000e+02 : f32
    %17 = vector.broadcast %cst_9 : f32 to vector<64x16xf32>
    %18 = arith.maximumf %17, %16 : vector<64x16xf32>
    %19 = vector.broadcast %cst_10 : f32 to vector<64x16xf32>
    %20 = arith.minimumf %19, %18 : vector<64x16xf32>
    %cst_11 = arith.constant dense<0.000000e+00> : vector<64x64xf32>
    %21 = tpu.matmul %7, %20, %cst_11 {dimension_numbers = #tpu.dot_dimension_numbers<[1], [1], [0], [0], [0, 0, 1, 0], [], []>} : vector<64x16xf32>, vector<64x16xf32>, vector<64x64xf32> -> vector<64x64xf32>
    %cst_12 = arith.constant 0.00392156886 : f32
    %22 = arith.mulf %5, %cst_12 : f32
    %23 = vector.broadcast %22 : f32 to vector<64x64xf32>
    %24 = arith.mulf %21, %23 : vector<64x64xf32>
    %25 = vector.broadcast %3 : f32 to vector<64x1xf32>
    %26 = arith.mulf %25, %8 : vector<64x1xf32>
    %27 = vector.broadcast %26 : vector<64x1xf32> to vector<64x64xf32>
    %28 = arith.addf %24, %27 : vector<64x64xf32>
    %cst_13 = arith.constant 0.000000e+00 : f32
    %29 = vector.broadcast %cst_13 : f32 to vector<64x64xf32>
    %30 = arith.maximumf %28, %29 : vector<64x64xf32>
    %c0_14 = arith.constant 0 : index
    %c0_15 = arith.constant 0 : index
    %31 = vector.load %arg6[%c0_14, %c0_15] : memref<8x128xf32, #tpu.memory_space<vmem>>, vector<8x128xf32>
    %32 = vector.shape_cast %30 : vector<64x64xf32> to vector<1x64x64xf32>
    %cst_16 = arith.constant dense<0x7F800000> : vector<1xf32>
    %33 = vector.multi_reduction <minimumf>, %32, %cst_16 [1, 2] : vector<1x64x64xf32> to vector<1xf32>
    %34 = vector.shape_cast %33 : vector<1xf32> to vector<1x1x1xf32>
    %35 = vector.extract %34[0, 0, 0] : f32 from vector<1x1x1xf32>
    %36 = vector.broadcast %35 : f32 to vector<8x128xf32>
    %37 = arith.minimumf %31, %36 : vector<8x128xf32>
    %c0_17 = arith.constant 0 : index
    %c0_18 = arith.constant 0 : index
    %38 = vector.load %arg6[%c0_17, %c0_18] : memref<8x128xf32, #tpu.memory_space<vmem>>, vector<8x128xf32>
    tpu.vector_store %arg6[%c0_17, %c0_18], %37 {strides = array<i32>} : memref<8x128xf32, #tpu.memory_space<vmem>>, vector<8x128xf32>,
    %c0_19 = arith.constant 0 : index
    %c0_20 = arith.constant 0 : index
    %39 = vector.load %arg7[%c0_19, %c0_20] : memref<8x128xf32, #tpu.memory_space<vmem>>, vector<8x128xf32>
    %40 = vector.shape_cast %30 : vector<64x64xf32> to vector<1x64x64xf32>
    %cst_21 = arith.constant dense<0xFF800000> : vector<1xf32>
    %41 = vector.multi_reduction <maximumf>, %40, %cst_21 [1, 2] : vector<1x64x64xf32> to vector<1xf32>
    %42 = vector.shape_cast %41 : vector<1xf32> to vector<1x1x1xf32>
    %43 = vector.extract %42[0, 0, 0] : f32 from vector<1x1x1xf32>
    %44 = vector.broadcast %43 : f32 to vector<8x128xf32>
    %45 = arith.maximumf %39, %44 : vector<8x128xf32>
    %c0_22 = arith.constant 0 : index
    %c0_23 = arith.constant 0 : index
    %46 = vector.load %arg7[%c0_22, %c0_23] : memref<8x128xf32, #tpu.memory_space<vmem>>, vector<8x128xf32>
    tpu.vector_store %arg7[%c0_22, %c0_23], %45 {strides = array<i32>} : memref<8x128xf32, #tpu.memory_space<vmem>>, vector<8x128xf32>,
    return
  }
  func.func @transform_0(%arg0: i32, %arg1: i32) -> i32 {
    %c0_i32 = arith.constant 0 : i32
    %c0_i32_0 = arith.constant 0 : i32
    return %c0_i32 : i32
  }
  func.func @transform_1(%arg0: i32, %arg1: i32) -> (i32, i32) {
    %c1_i32 = arith.constant 1 : i32
    %0 = arith.muli %arg0, %c1_i32 : i32
    %1 = arith.addi %0, %arg1 : i32
    %c0_i32 = arith.constant 0 : i32
    %2 = arith.minsi %1, %c0_i32 : i32
    %c0_i32_0 = arith.constant 0 : i32
    %c0_i32_1 = arith.constant 0 : i32
    return %2, %c0_i32_0 : i32, i32
  }
  func.func @transform_2(%arg0: i32, %arg1: i32) -> (i32, i32) {
    %c0_i32 = arith.constant 0 : i32
    %c0_i32_0 = arith.constant 0 : i32
    %c0_i32_1 = arith.constant 0 : i32
    return %c0_i32, %c0_i32_0 : i32, i32
  }
  func.func @transform_3(%arg0: i32, %arg1: i32) -> (i32, i32) {
    %c0_i32 = arith.constant 0 : i32
    %c0_i32_0 = arith.constant 0 : i32
    %c0_i32_1 = arith.constant 0 : i32
    return %c0_i32, %c0_i32_0 : i32, i32
  }
  func.func @transform_4(%arg0: i32, %arg1: i32) -> (i32, i32) {
    %c0_i32 = arith.constant 0 : i32
    %c0_i32_0 = arith.constant 0 : i32
    return %arg0, %c0_i32 : i32, i32
  }
  func.func @transform_5(%arg0: i32, %arg1: i32) -> (i32, i32) {
    %c0_i32 = arith.constant 0 : i32
    %c0_i32_0 = arith.constant 0 : i32
    return %arg0, %c0_i32 : i32, i32
  }
}

module attributes {stable_mosaic.version = 11 : i64} {
  func.func @_fused2_gated_kernel(%arg0: i32, %arg1: memref<4xf32, #tpu.memory_space<smem>>, %arg2: memref<64x16xf32, #tpu.memory_space<vmem>>, %arg3: memref<1x64xf32, #tpu.memory_space<vmem>>, %arg4: memref<64x16xf32, #tpu.memory_space<vmem>>, %arg5: memref<64x1xf32, #tpu.memory_space<vmem>>, %arg6: memref<16x64xf32, #tpu.memory_space<vmem>>, %arg7: memref<16x1xf32, #tpu.memory_space<vmem>>, %arg8: memref<8x64xf32, #tpu.memory_space<vmem>>) attributes {dimension_semantics = [#tpu.dimension_semantics<parallel>], iteration_bounds = array<i64: 1>, scalar_prefetch = 0 : i64, scratch_operands = 0 : i64, tpu.core_type = #tpu.core_type<tc>, window_params = [{transform_indices = @transform_0, window_bounds = array<i64: 4>}, {transform_indices = @transform_1, window_bounds = array<i64: 64, 16>}, {transform_indices = @transform_2, window_bounds = array<i64: 1, 64>}, {pipeline_mode = #tpu.pipeline_mode<synchronous>, transform_indices = @transform_3, window_bounds = array<i64: 64, 16>}, {pipeline_mode = #tpu.pipeline_mode<synchronous>, transform_indices = @transform_4, window_bounds = array<i64: 64, 1>}, {pipeline_mode = #tpu.pipeline_mode<synchronous>, transform_indices = @transform_5, window_bounds = array<i64: 16, 64>}, {pipeline_mode = #tpu.pipeline_mode<synchronous>, transform_indices = @transform_6, window_bounds = array<i64: 16, 1>}, {transform_indices = @transform_7, window_bounds = array<i64: 8, 64>}]} {
    %c0 = arith.constant 0 : index
    %0 = memref.load %arg1[%c0] : memref<4xf32, #tpu.memory_space<smem>>
    %c1 = arith.constant 1 : index
    %1 = memref.load %arg1[%c1] : memref<4xf32, #tpu.memory_space<smem>>
    %2 = arith.subf %1, %0 : f32
    %c2 = arith.constant 2 : index
    %3 = memref.load %arg1[%c2] : memref<4xf32, #tpu.memory_space<smem>>
    %c3 = arith.constant 3 : index
    %4 = memref.load %arg1[%c3] : memref<4xf32, #tpu.memory_space<smem>>
    %5 = arith.subf %4, %3 : f32
    %c0_0 = arith.constant 0 : index
    %c0_1 = arith.constant 0 : index
    %6 = vector.load %arg2[%c0_0, %c0_1] : memref<64x16xf32, #tpu.memory_space<vmem>>, vector<64x16xf32>
    %c0_2 = arith.constant 0 : index
    %c0_3 = arith.constant 0 : index
    %7 = vector.load %arg4[%c0_2, %c0_3] : memref<64x16xf32, #tpu.memory_space<vmem>>, vector<64x16xf32>
    %c0_4 = arith.constant 0 : index
    %c0_5 = arith.constant 0 : index
    %8 = vector.load %arg5[%c0_4, %c0_5] : memref<64x1xf32, #tpu.memory_space<vmem>>, vector<64x1xf32>
    %cst = arith.constant 0.000000e+00 : f32
    %9 = arith.cmpf ogt, %2, %cst : f32
    %cst_6 = arith.constant 1.000000e+00 : f32
    %10 = arith.select %9, %2, %cst_6 : f32
    %cst_7 = arith.constant 2.550000e+02 : f32
    %11 = arith.divf %cst_7, %10 : f32
    %12 = vector.broadcast %0 : f32 to vector<64x16xf32>
    %13 = arith.subf %6, %12 : vector<64x16xf32>
    %14 = vector.broadcast %11 : f32 to vector<64x16xf32>
    %15 = arith.mulf %13, %14 : vector<64x16xf32>
    %16 = math.floor %15 : vector<64x16xf32>
    %cst_8 = arith.constant 0.000000e+00 : f32
    %cst_9 = arith.constant 2.550000e+02 : f32
    %17 = vector.broadcast %cst_8 : f32 to vector<64x16xf32>
    %18 = arith.maximumf %17, %16 : vector<64x16xf32>
    %19 = vector.broadcast %cst_9 : f32 to vector<64x16xf32>
    %20 = arith.minimumf %19, %18 : vector<64x16xf32>
    %cst_10 = arith.constant dense<0.000000e+00> : vector<64x64xf32>
    %21 = tpu.matmul %7, %20, %cst_10 {dimension_numbers = #tpu.dot_dimension_numbers<[1], [1], [0], [0], [0, 0, 1, 0], [], []>} : vector<64x16xf32>, vector<64x16xf32>, vector<64x64xf32> -> vector<64x64xf32>
    %cst_11 = arith.constant 0.00392156886 : f32
    %22 = arith.mulf %2, %cst_11 : f32
    %23 = vector.broadcast %22 : f32 to vector<64x64xf32>
    %24 = arith.mulf %21, %23 : vector<64x64xf32>
    %25 = vector.broadcast %0 : f32 to vector<64x1xf32>
    %26 = arith.mulf %25, %8 : vector<64x1xf32>
    %27 = vector.broadcast %26 : vector<64x1xf32> to vector<64x64xf32>
    %28 = arith.addf %24, %27 : vector<64x64xf32>
    %cst_12 = arith.constant 0.000000e+00 : f32
    %29 = vector.broadcast %cst_12 : f32 to vector<64x64xf32>
    %30 = arith.maximumf %28, %29 : vector<64x64xf32>
    %c0_13 = arith.constant 0 : index
    %c0_14 = arith.constant 0 : index
    %31 = vector.load %arg6[%c0_13, %c0_14] : memref<16x64xf32, #tpu.memory_space<vmem>>, vector<16x64xf32>
    %c0_15 = arith.constant 0 : index
    %c0_16 = arith.constant 0 : index
    %32 = vector.load %arg7[%c0_15, %c0_16] : memref<16x1xf32, #tpu.memory_space<vmem>>, vector<16x1xf32>
    %cst_17 = arith.constant 0.000000e+00 : f32
    %33 = arith.cmpf ogt, %5, %cst_17 : f32
    %cst_18 = arith.constant 1.000000e+00 : f32
    %34 = arith.select %33, %5, %cst_18 : f32
    %cst_19 = arith.constant 2.550000e+02 : f32
    %35 = arith.divf %cst_19, %34 : f32
    %36 = vector.broadcast %3 : f32 to vector<64x64xf32>
    %37 = arith.subf %30, %36 : vector<64x64xf32>
    %38 = vector.broadcast %35 : f32 to vector<64x64xf32>
    %39 = arith.mulf %37, %38 : vector<64x64xf32>
    %40 = math.floor %39 : vector<64x64xf32>
    %cst_20 = arith.constant 0.000000e+00 : f32
    %cst_21 = arith.constant 2.550000e+02 : f32
    %41 = vector.broadcast %cst_20 : f32 to vector<64x64xf32>
    %42 = arith.maximumf %41, %40 : vector<64x64xf32>
    %43 = vector.broadcast %cst_21 : f32 to vector<64x64xf32>
    %44 = arith.minimumf %43, %42 : vector<64x64xf32>
    %cst_22 = arith.constant dense<0.000000e+00> : vector<16x64xf32>
    %45 = tpu.matmul %31, %44, %cst_22 {dimension_numbers = #tpu.dot_dimension_numbers<[1], [0], [0], [1], [0, 0, 1, 1], [], []>} : vector<16x64xf32>, vector<64x64xf32>, vector<16x64xf32> -> vector<16x64xf32>
    %cst_23 = arith.constant 0.00392156886 : f32
    %46 = arith.mulf %5, %cst_23 : f32
    %47 = vector.broadcast %46 : f32 to vector<16x64xf32>
    %48 = arith.mulf %45, %47 : vector<16x64xf32>
    %49 = vector.broadcast %3 : f32 to vector<16x1xf32>
    %50 = arith.mulf %49, %32 : vector<16x1xf32>
    %51 = vector.broadcast %50 : vector<16x1xf32> to vector<16x64xf32>
    %52 = arith.addf %48, %51 : vector<16x64xf32>
    %53 = vector.extract_strided_slice %52 {offsets = [0, 0], sizes = [8, 64], strides = [1, 1]} : vector<16x64xf32> to vector<8x64xf32>
    %54 = vector.extract_strided_slice %52 {offsets = [8, 0], sizes = [8, 64], strides = [1, 1]} : vector<16x64xf32> to vector<8x64xf32>
    %cst_24 = arith.constant 0.000000e+00 : f32
    %55 = vector.broadcast %cst_24 : f32 to vector<8x64xf32>
    %56 = arith.subf %55, %53 : vector<8x64xf32>
    %57 = math.exp %56 : vector<8x64xf32>
    %cst_25 = arith.constant 1.000000e+00 : f32
    %58 = vector.broadcast %cst_25 : f32 to vector<8x64xf32>
    %59 = arith.addf %58, %57 : vector<8x64xf32>
    %cst_26 = arith.constant 1.000000e+00 : f32
    %60 = vector.broadcast %cst_26 : f32 to vector<8x64xf32>
    %61 = arith.divf %60, %59 : vector<8x64xf32>
    %62 = math.tanh %54 : vector<8x64xf32>
    %63 = arith.mulf %61, %62 : vector<8x64xf32>
    %c0_27 = arith.constant 0 : index
    %c0_28 = arith.constant 0 : index
    %64 = vector.load %arg3[%c0_27, %c0_28] : memref<1x64xf32, #tpu.memory_space<vmem>>, vector<1x64xf32>
    %65 = vector.broadcast %64 : vector<1x64xf32> to vector<8x64xf32>
    %66 = arith.mulf %63, %65 : vector<8x64xf32>
    %c0_29 = arith.constant 0 : index
    %c0_30 = arith.constant 0 : index
    %67 = vector.load %arg8[%c0_29, %c0_30] : memref<8x64xf32, #tpu.memory_space<vmem>>, vector<8x64xf32>
    tpu.vector_store %arg8[%c0_29, %c0_30], %66 {strides = array<i32>} : memref<8x64xf32, #tpu.memory_space<vmem>>, vector<8x64xf32>,
    return
  }
  func.func @transform_0(%arg0: i32) -> i32 {
    %c0_i32 = arith.constant 0 : i32
    %c0_i32_0 = arith.constant 0 : i32
    return %c0_i32 : i32
  }
  func.func @transform_1(%arg0: i32) -> (i32, i32) {
    %c0_i32 = arith.constant 0 : i32
    %c0_i32_0 = arith.constant 0 : i32
    return %arg0, %c0_i32 : i32, i32
  }
  func.func @transform_2(%arg0: i32) -> (i32, i32) {
    %c0_i32 = arith.constant 0 : i32
    %c0_i32_0 = arith.constant 0 : i32
    return %c0_i32, %arg0 : i32, i32
  }
  func.func @transform_3(%arg0: i32) -> (i32, i32) {
    %c0_i32 = arith.constant 0 : i32
    %c0_i32_0 = arith.constant 0 : i32
    %c0_i32_1 = arith.constant 0 : i32
    return %c0_i32, %c0_i32_0 : i32, i32
  }
  func.func @transform_4(%arg0: i32) -> (i32, i32) {
    %c0_i32 = arith.constant 0 : i32
    %c0_i32_0 = arith.constant 0 : i32
    %c0_i32_1 = arith.constant 0 : i32
    return %c0_i32, %c0_i32_0 : i32, i32
  }
  func.func @transform_5(%arg0: i32) -> (i32, i32) {
    %c0_i32 = arith.constant 0 : i32
    %c0_i32_0 = arith.constant 0 : i32
    %c0_i32_1 = arith.constant 0 : i32
    return %c0_i32, %c0_i32_0 : i32, i32
  }
  func.func @transform_6(%arg0: i32) -> (i32, i32) {
    %c0_i32 = arith.constant 0 : i32
    %c0_i32_0 = arith.constant 0 : i32
    %c0_i32_1 = arith.constant 0 : i32
    return %c0_i32, %c0_i32_0 : i32, i32
  }
  func.func @transform_7(%arg0: i32) -> (i32, i32) {
    %c0_i32 = arith.constant 0 : i32
    %c0_i32_0 = arith.constant 0 : i32
    return %c0_i32, %arg0 : i32, i32
  }
}

module attributes {stable_mosaic.version = 11 : i64} {
  func.func @_hstats_kernel(%arg0: i32, %arg1: i32, %arg2: memref<2xf32, #tpu.memory_space<smem>>, %arg3: memref<256x40xf32, #tpu.memory_space<vmem>>, %arg4: memref<80x40xf32, #tpu.memory_space<vmem>>, %arg5: memref<80x1xf32, #tpu.memory_space<vmem>>, %arg6: memref<8x128xf32, #tpu.memory_space<vmem>>, %arg7: memref<8x128xf32, #tpu.memory_space<vmem>>) attributes {dimension_semantics = [#tpu.dimension_semantics<parallel>, #tpu.dimension_semantics<arbitrary>], iteration_bounds = array<i64: 2, 1>, scalar_prefetch = 0 : i64, scratch_operands = 0 : i64, tpu.core_type = #tpu.core_type<tc>, window_params = [{transform_indices = @transform_0, window_bounds = array<i64: 2>}, {transform_indices = @transform_1, window_bounds = array<i64: 256, 40>}, {pipeline_mode = #tpu.pipeline_mode<synchronous>, transform_indices = @transform_2, window_bounds = array<i64: 80, 40>}, {pipeline_mode = #tpu.pipeline_mode<synchronous>, transform_indices = @transform_3, window_bounds = array<i64: 80, 1>}, {transform_indices = @transform_4, window_bounds = array<i64: 8, 128>}, {transform_indices = @transform_5, window_bounds = array<i64: 8, 128>}]} {
    %c0_i32 = arith.constant 0 : i32
    %0 = arith.cmpi eq, %arg1, %c0_i32 : i32
    %1 = arith.extui %0 : i1 to i32
    %c0_i32_0 = arith.constant 0 : i32
    %2 = arith.cmpi ne, %1, %c0_i32_0 : i32
    scf.if %2 {
      %cst_24 = arith.constant 0x7F800000 : f32
      %47 = vector.broadcast %cst_24 : f32 to vector<8x128xf32>
      %c0_25 = arith.constant 0 : index
      %c0_26 = arith.constant 0 : index
      %48 = vector.load %arg6[%c0_25, %c0_26] : memref<8x128xf32, #tpu.memory_space<vmem>>, vector<8x128xf32>
      tpu.vector_store %arg6[%c0_25, %c0_26], %47 {strides = array<i32>} : memref<8x128xf32, #tpu.memory_space<vmem>>, vector<8x128xf32>,
      %cst_27 = arith.constant 0xFF800000 : f32
      %49 = vector.broadcast %cst_27 : f32 to vector<8x128xf32>
      %c0_28 = arith.constant 0 : index
      %c0_29 = arith.constant 0 : index
      %50 = vector.load %arg7[%c0_28, %c0_29] : memref<8x128xf32, #tpu.memory_space<vmem>>, vector<8x128xf32>
      tpu.vector_store %arg7[%c0_28, %c0_29], %49 {strides = array<i32>} : memref<8x128xf32, #tpu.memory_space<vmem>>, vector<8x128xf32>,
    } else {
    }
    %c0 = arith.constant 0 : index
    %3 = memref.load %arg2[%c0] : memref<2xf32, #tpu.memory_space<smem>>
    %c1 = arith.constant 1 : index
    %4 = memref.load %arg2[%c1] : memref<2xf32, #tpu.memory_space<smem>>
    %5 = arith.subf %4, %3 : f32
    %c0_1 = arith.constant 0 : index
    %c0_2 = arith.constant 0 : index
    %6 = vector.load %arg3[%c0_1, %c0_2] : memref<256x40xf32, #tpu.memory_space<vmem>>, vector<256x40xf32>
    %c0_3 = arith.constant 0 : index
    %c0_4 = arith.constant 0 : index
    %7 = vector.load %arg4[%c0_3, %c0_4] : memref<80x40xf32, #tpu.memory_space<vmem>>, vector<80x40xf32>
    %c0_5 = arith.constant 0 : index
    %c0_6 = arith.constant 0 : index
    %8 = vector.load %arg5[%c0_5, %c0_6] : memref<80x1xf32, #tpu.memory_space<vmem>>, vector<80x1xf32>
    %cst = arith.constant 0.000000e+00 : f32
    %9 = arith.cmpf ogt, %5, %cst : f32
    %cst_7 = arith.constant 1.000000e+00 : f32
    %10 = arith.select %9, %5, %cst_7 : f32
    %cst_8 = arith.constant 2.550000e+02 : f32
    %11 = arith.divf %cst_8, %10 : f32
    %12 = vector.broadcast %3 : f32 to vector<256x40xf32>
    %13 = arith.subf %6, %12 : vector<256x40xf32>
    %14 = vector.broadcast %11 : f32 to vector<256x40xf32>
    %15 = arith.mulf %13, %14 : vector<256x40xf32>
    %16 = math.floor %15 : vector<256x40xf32>
    %cst_9 = arith.constant 0.000000e+00 : f32
    %cst_10 = arith.constant 2.550000e+02 : f32
    %17 = vector.broadcast %cst_9 : f32 to vector<256x40xf32>
    %18 = arith.maximumf %17, %16 : vector<256x40xf32>
    %19 = vector.broadcast %cst_10 : f32 to vector<256x40xf32>
    %20 = arith.minimumf %19, %18 : vector<256x40xf32>
    %cst_11 = arith.constant dense<0.000000e+00> : vector<80x256xf32>
    %21 = tpu.matmul %7, %20, %cst_11 {dimension_numbers = #tpu.dot_dimension_numbers<[1], [1], [0], [0], [0, 0, 1, 0], [], []>} : vector<80x40xf32>, vector<256x40xf32>, vector<80x256xf32> -> vector<80x256xf32>
    %cst_12 = arith.constant 0.00392156886 : f32
    %22 = arith.mulf %5, %cst_12 : f32
    %23 = vector.broadcast %22 : f32 to vector<80x256xf32>
    %24 = arith.mulf %21, %23 : vector<80x256xf32>
    %25 = vector.broadcast %3 : f32 to vector<80x1xf32>
    %26 = arith.mulf %25, %8 : vector<80x1xf32>
    %27 = vector.broadcast %26 : vector<80x1xf32> to vector<80x256xf32>
    %28 = arith.addf %24, %27 : vector<80x256xf32>
    %cst_13 = arith.constant 0.000000e+00 : f32
    %29 = vector.broadcast %cst_13 : f32 to vector<80x256xf32>
    %30 = arith.maximumf %28, %29 : vector<80x256xf32>
    %c0_14 = arith.constant 0 : index
    %c0_15 = arith.constant 0 : index
    %31 = vector.load %arg6[%c0_14, %c0_15] : memref<8x128xf32, #tpu.memory_space<vmem>>, vector<8x128xf32>
    %32 = vector.shape_cast %30 : vector<80x256xf32> to vector<1x80x256xf32>
    %cst_16 = arith.constant dense<0x7F800000> : vector<1xf32>
    %33 = vector.multi_reduction <minimumf>, %32, %cst_16 [1, 2] : vector<1x80x256xf32> to vector<1xf32>
    %34 = vector.shape_cast %33 : vector<1xf32> to vector<1x1x1xf32>
    %35 = vector.extract %34[0, 0, 0] : f32 from vector<1x1x1xf32>
    %36 = vector.broadcast %35 : f32 to vector<8x128xf32>
    %37 = arith.minimumf %31, %36 : vector<8x128xf32>
    %c0_17 = arith.constant 0 : index
    %c0_18 = arith.constant 0 : index
    %38 = vector.load %arg6[%c0_17, %c0_18] : memref<8x128xf32, #tpu.memory_space<vmem>>, vector<8x128xf32>
    tpu.vector_store %arg6[%c0_17, %c0_18], %37 {strides = array<i32>} : memref<8x128xf32, #tpu.memory_space<vmem>>, vector<8x128xf32>,
    %c0_19 = arith.constant 0 : index
    %c0_20 = arith.constant 0 : index
    %39 = vector.load %arg7[%c0_19, %c0_20] : memref<8x128xf32, #tpu.memory_space<vmem>>, vector<8x128xf32>
    %40 = vector.shape_cast %30 : vector<80x256xf32> to vector<1x80x256xf32>
    %cst_21 = arith.constant dense<0xFF800000> : vector<1xf32>
    %41 = vector.multi_reduction <maximumf>, %40, %cst_21 [1, 2] : vector<1x80x256xf32> to vector<1xf32>
    %42 = vector.shape_cast %41 : vector<1xf32> to vector<1x1x1xf32>
    %43 = vector.extract %42[0, 0, 0] : f32 from vector<1x1x1xf32>
    %44 = vector.broadcast %43 : f32 to vector<8x128xf32>
    %45 = arith.maximumf %39, %44 : vector<8x128xf32>
    %c0_22 = arith.constant 0 : index
    %c0_23 = arith.constant 0 : index
    %46 = vector.load %arg7[%c0_22, %c0_23] : memref<8x128xf32, #tpu.memory_space<vmem>>, vector<8x128xf32>
    tpu.vector_store %arg7[%c0_22, %c0_23], %45 {strides = array<i32>} : memref<8x128xf32, #tpu.memory_space<vmem>>, vector<8x128xf32>,
    return
  }
  func.func @transform_0(%arg0: i32, %arg1: i32) -> i32 {
    %c0_i32 = arith.constant 0 : i32
    %c0_i32_0 = arith.constant 0 : i32
    return %c0_i32 : i32
  }
  func.func @transform_1(%arg0: i32, %arg1: i32) -> (i32, i32) {
    %c1_i32 = arith.constant 1 : i32
    %0 = arith.muli %arg0, %c1_i32 : i32
    %1 = arith.addi %0, %arg1 : i32
    %c0_i32 = arith.constant 0 : i32
    %2 = arith.minsi %1, %c0_i32 : i32
    %c0_i32_0 = arith.constant 0 : i32
    %c0_i32_1 = arith.constant 0 : i32
    return %2, %c0_i32_0 : i32, i32
  }
  func.func @transform_2(%arg0: i32, %arg1: i32) -> (i32, i32) {
    %c0_i32 = arith.constant 0 : i32
    %c0_i32_0 = arith.constant 0 : i32
    %c0_i32_1 = arith.constant 0 : i32
    return %c0_i32, %c0_i32_0 : i32, i32
  }
  func.func @transform_3(%arg0: i32, %arg1: i32) -> (i32, i32) {
    %c0_i32 = arith.constant 0 : i32
    %c0_i32_0 = arith.constant 0 : i32
    %c0_i32_1 = arith.constant 0 : i32
    return %c0_i32, %c0_i32_0 : i32, i32
  }
  func.func @transform_4(%arg0: i32, %arg1: i32) -> (i32, i32) {
    %c0_i32 = arith.constant 0 : i32
    %c0_i32_0 = arith.constant 0 : i32
    return %arg0, %c0_i32 : i32, i32
  }
  func.func @transform_5(%arg0: i32, %arg1: i32) -> (i32, i32) {
    %c0_i32 = arith.constant 0 : i32
    %c0_i32_0 = arith.constant 0 : i32
    return %arg0, %c0_i32 : i32, i32
  }
}

module attributes {stable_mosaic.version = 11 : i64} {
  func.func @_fused2_gated_kernel(%arg0: i32, %arg1: memref<4xf32, #tpu.memory_space<smem>>, %arg2: memref<256x40xf32, #tpu.memory_space<vmem>>, %arg3: memref<1x256xf32, #tpu.memory_space<vmem>>, %arg4: memref<80x40xf32, #tpu.memory_space<vmem>>, %arg5: memref<80x1xf32, #tpu.memory_space<vmem>>, %arg6: memref<16x80xf32, #tpu.memory_space<vmem>>, %arg7: memref<16x1xf32, #tpu.memory_space<vmem>>, %arg8: memref<8x256xf32, #tpu.memory_space<vmem>>) attributes {dimension_semantics = [#tpu.dimension_semantics<parallel>], iteration_bounds = array<i64: 1>, scalar_prefetch = 0 : i64, scratch_operands = 0 : i64, tpu.core_type = #tpu.core_type<tc>, window_params = [{transform_indices = @transform_0, window_bounds = array<i64: 4>}, {transform_indices = @transform_1, window_bounds = array<i64: 256, 40>}, {transform_indices = @transform_2, window_bounds = array<i64: 1, 256>}, {pipeline_mode = #tpu.pipeline_mode<synchronous>, transform_indices = @transform_3, window_bounds = array<i64: 80, 40>}, {pipeline_mode = #tpu.pipeline_mode<synchronous>, transform_indices = @transform_4, window_bounds = array<i64: 80, 1>}, {pipeline_mode = #tpu.pipeline_mode<synchronous>, transform_indices = @transform_5, window_bounds = array<i64: 16, 80>}, {pipeline_mode = #tpu.pipeline_mode<synchronous>, transform_indices = @transform_6, window_bounds = array<i64: 16, 1>}, {transform_indices = @transform_7, window_bounds = array<i64: 8, 256>}]} {
    %c0 = arith.constant 0 : index
    %0 = memref.load %arg1[%c0] : memref<4xf32, #tpu.memory_space<smem>>
    %c1 = arith.constant 1 : index
    %1 = memref.load %arg1[%c1] : memref<4xf32, #tpu.memory_space<smem>>
    %2 = arith.subf %1, %0 : f32
    %c2 = arith.constant 2 : index
    %3 = memref.load %arg1[%c2] : memref<4xf32, #tpu.memory_space<smem>>
    %c3 = arith.constant 3 : index
    %4 = memref.load %arg1[%c3] : memref<4xf32, #tpu.memory_space<smem>>
    %5 = arith.subf %4, %3 : f32
    %c0_0 = arith.constant 0 : index
    %c0_1 = arith.constant 0 : index
    %6 = vector.load %arg2[%c0_0, %c0_1] : memref<256x40xf32, #tpu.memory_space<vmem>>, vector<256x40xf32>
    %c0_2 = arith.constant 0 : index
    %c0_3 = arith.constant 0 : index
    %7 = vector.load %arg4[%c0_2, %c0_3] : memref<80x40xf32, #tpu.memory_space<vmem>>, vector<80x40xf32>
    %c0_4 = arith.constant 0 : index
    %c0_5 = arith.constant 0 : index
    %8 = vector.load %arg5[%c0_4, %c0_5] : memref<80x1xf32, #tpu.memory_space<vmem>>, vector<80x1xf32>
    %cst = arith.constant 0.000000e+00 : f32
    %9 = arith.cmpf ogt, %2, %cst : f32
    %cst_6 = arith.constant 1.000000e+00 : f32
    %10 = arith.select %9, %2, %cst_6 : f32
    %cst_7 = arith.constant 2.550000e+02 : f32
    %11 = arith.divf %cst_7, %10 : f32
    %12 = vector.broadcast %0 : f32 to vector<256x40xf32>
    %13 = arith.subf %6, %12 : vector<256x40xf32>
    %14 = vector.broadcast %11 : f32 to vector<256x40xf32>
    %15 = arith.mulf %13, %14 : vector<256x40xf32>
    %16 = math.floor %15 : vector<256x40xf32>
    %cst_8 = arith.constant 0.000000e+00 : f32
    %cst_9 = arith.constant 2.550000e+02 : f32
    %17 = vector.broadcast %cst_8 : f32 to vector<256x40xf32>
    %18 = arith.maximumf %17, %16 : vector<256x40xf32>
    %19 = vector.broadcast %cst_9 : f32 to vector<256x40xf32>
    %20 = arith.minimumf %19, %18 : vector<256x40xf32>
    %cst_10 = arith.constant dense<0.000000e+00> : vector<80x256xf32>
    %21 = tpu.matmul %7, %20, %cst_10 {dimension_numbers = #tpu.dot_dimension_numbers<[1], [1], [0], [0], [0, 0, 1, 0], [], []>} : vector<80x40xf32>, vector<256x40xf32>, vector<80x256xf32> -> vector<80x256xf32>
    %cst_11 = arith.constant 0.00392156886 : f32
    %22 = arith.mulf %2, %cst_11 : f32
    %23 = vector.broadcast %22 : f32 to vector<80x256xf32>
    %24 = arith.mulf %21, %23 : vector<80x256xf32>
    %25 = vector.broadcast %0 : f32 to vector<80x1xf32>
    %26 = arith.mulf %25, %8 : vector<80x1xf32>
    %27 = vector.broadcast %26 : vector<80x1xf32> to vector<80x256xf32>
    %28 = arith.addf %24, %27 : vector<80x256xf32>
    %cst_12 = arith.constant 0.000000e+00 : f32
    %29 = vector.broadcast %cst_12 : f32 to vector<80x256xf32>
    %30 = arith.maximumf %28, %29 : vector<80x256xf32>
    %c0_13 = arith.constant 0 : index
    %c0_14 = arith.constant 0 : index
    %31 = vector.load %arg6[%c0_13, %c0_14] : memref<16x80xf32, #tpu.memory_space<vmem>>, vector<16x80xf32>
    %c0_15 = arith.constant 0 : index
    %c0_16 = arith.constant 0 : index
    %32 = vector.load %arg7[%c0_15, %c0_16] : memref<16x1xf32, #tpu.memory_space<vmem>>, vector<16x1xf32>
    %cst_17 = arith.constant 0.000000e+00 : f32
    %33 = arith.cmpf ogt, %5, %cst_17 : f32
    %cst_18 = arith.constant 1.000000e+00 : f32
    %34 = arith.select %33, %5, %cst_18 : f32
    %cst_19 = arith.constant 2.550000e+02 : f32
    %35 = arith.divf %cst_19, %34 : f32
    %36 = vector.broadcast %3 : f32 to vector<80x256xf32>
    %37 = arith.subf %30, %36 : vector<80x256xf32>
    %38 = vector.broadcast %35 : f32 to vector<80x256xf32>
    %39 = arith.mulf %37, %38 : vector<80x256xf32>
    %40 = math.floor %39 : vector<80x256xf32>
    %cst_20 = arith.constant 0.000000e+00 : f32
    %cst_21 = arith.constant 2.550000e+02 : f32
    %41 = vector.broadcast %cst_20 : f32 to vector<80x256xf32>
    %42 = arith.maximumf %41, %40 : vector<80x256xf32>
    %43 = vector.broadcast %cst_21 : f32 to vector<80x256xf32>
    %44 = arith.minimumf %43, %42 : vector<80x256xf32>
    %cst_22 = arith.constant dense<0.000000e+00> : vector<16x256xf32>
    %45 = tpu.matmul %31, %44, %cst_22 {dimension_numbers = #tpu.dot_dimension_numbers<[1], [0], [0], [1], [0, 0, 1, 1], [], []>} : vector<16x80xf32>, vector<80x256xf32>, vector<16x256xf32> -> vector<16x256xf32>
    %cst_23 = arith.constant 0.00392156886 : f32
    %46 = arith.mulf %5, %cst_23 : f32
    %47 = vector.broadcast %46 : f32 to vector<16x256xf32>
    %48 = arith.mulf %45, %47 : vector<16x256xf32>
    %49 = vector.broadcast %3 : f32 to vector<16x1xf32>
    %50 = arith.mulf %49, %32 : vector<16x1xf32>
    %51 = vector.broadcast %50 : vector<16x1xf32> to vector<16x256xf32>
    %52 = arith.addf %48, %51 : vector<16x256xf32>
    %53 = vector.extract_strided_slice %52 {offsets = [0, 0], sizes = [8, 256], strides = [1, 1]} : vector<16x256xf32> to vector<8x256xf32>
    %54 = vector.extract_strided_slice %52 {offsets = [8, 0], sizes = [8, 256], strides = [1, 1]} : vector<16x256xf32> to vector<8x256xf32>
    %cst_24 = arith.constant 0.000000e+00 : f32
    %55 = vector.broadcast %cst_24 : f32 to vector<8x256xf32>
    %56 = arith.subf %55, %53 : vector<8x256xf32>
    %57 = math.exp %56 : vector<8x256xf32>
    %cst_25 = arith.constant 1.000000e+00 : f32
    %58 = vector.broadcast %cst_25 : f32 to vector<8x256xf32>
    %59 = arith.addf %58, %57 : vector<8x256xf32>
    %cst_26 = arith.constant 1.000000e+00 : f32
    %60 = vector.broadcast %cst_26 : f32 to vector<8x256xf32>
    %61 = arith.divf %60, %59 : vector<8x256xf32>
    %62 = math.tanh %54 : vector<8x256xf32>
    %63 = arith.mulf %61, %62 : vector<8x256xf32>
    %c0_27 = arith.constant 0 : index
    %c0_28 = arith.constant 0 : index
    %64 = vector.load %arg3[%c0_27, %c0_28] : memref<1x256xf32, #tpu.memory_space<vmem>>, vector<1x256xf32>
    %65 = vector.broadcast %64 : vector<1x256xf32> to vector<8x256xf32>
    %66 = arith.mulf %63, %65 : vector<8x256xf32>
    %c0_29 = arith.constant 0 : index
    %c0_30 = arith.constant 0 : index
    %67 = vector.load %arg8[%c0_29, %c0_30] : memref<8x256xf32, #tpu.memory_space<vmem>>, vector<8x256xf32>
    tpu.vector_store %arg8[%c0_29, %c0_30], %66 {strides = array<i32>} : memref<8x256xf32, #tpu.memory_space<vmem>>, vector<8x256xf32>,
    return
  }
  func.func @transform_0(%arg0: i32) -> i32 {
    %c0_i32 = arith.constant 0 : i32
    %c0_i32_0 = arith.constant 0 : i32
    return %c0_i32 : i32
  }
  func.func @transform_1(%arg0: i32) -> (i32, i32) {
    %c0_i32 = arith.constant 0 : i32
    %c0_i32_0 = arith.constant 0 : i32
    return %arg0, %c0_i32 : i32, i32
  }
  func.func @transform_2(%arg0: i32) -> (i32, i32) {
    %c0_i32 = arith.constant 0 : i32
    %c0_i32_0 = arith.constant 0 : i32
    return %c0_i32, %arg0 : i32, i32
  }
  func.func @transform_3(%arg0: i32) -> (i32, i32) {
    %c0_i32 = arith.constant 0 : i32
    %c0_i32_0 = arith.constant 0 : i32
    %c0_i32_1 = arith.constant 0 : i32
    return %c0_i32, %c0_i32_0 : i32, i32
  }
  func.func @transform_4(%arg0: i32) -> (i32, i32) {
    %c0_i32 = arith.constant 0 : i32
    %c0_i32_0 = arith.constant 0 : i32
    %c0_i32_1 = arith.constant 0 : i32
    return %c0_i32, %c0_i32_0 : i32, i32
  }
  func.func @transform_5(%arg0: i32) -> (i32, i32) {
    %c0_i32 = arith.constant 0 : i32
    %c0_i32_0 = arith.constant 0 : i32
    %c0_i32_1 = arith.constant 0 : i32
    return %c0_i32, %c0_i32_0 : i32, i32
  }
  func.func @transform_6(%arg0: i32) -> (i32, i32) {
    %c0_i32 = arith.constant 0 : i32
    %c0_i32_0 = arith.constant 0 : i32
    %c0_i32_1 = arith.constant 0 : i32
    return %c0_i32, %c0_i32_0 : i32, i32
  }
  func.func @transform_7(%arg0: i32) -> (i32, i32) {
    %c0_i32 = arith.constant 0 : i32
    %c0_i32_0 = arith.constant 0 : i32
    return %c0_i32, %arg0 : i32, i32
  }
}

module attributes {stable_mosaic.version = 11 : i64} {
  func.func @_fused2_gated_kernel(%arg0: i32, %arg1: memref<4xf32, #tpu.memory_space<smem>>, %arg2: memref<64x16xf32, #tpu.memory_space<vmem>>, %arg3: memref<64x16xf32, #tpu.memory_space<vmem>>, %arg4: memref<64x1xf32, #tpu.memory_space<vmem>>, %arg5: memref<16x64xf32, #tpu.memory_space<vmem>>, %arg6: memref<16x1xf32, #tpu.memory_space<vmem>>, %arg7: memref<8x64xf32, #tpu.memory_space<vmem>>) attributes {dimension_semantics = [#tpu.dimension_semantics<parallel>], iteration_bounds = array<i64: 1>, scalar_prefetch = 0 : i64, scratch_operands = 0 : i64, tpu.core_type = #tpu.core_type<tc>, window_params = [{transform_indices = @transform_0, window_bounds = array<i64: 4>}, {transform_indices = @transform_1, window_bounds = array<i64: 64, 16>}, {pipeline_mode = #tpu.pipeline_mode<synchronous>, transform_indices = @transform_2, window_bounds = array<i64: 64, 16>}, {pipeline_mode = #tpu.pipeline_mode<synchronous>, transform_indices = @transform_3, window_bounds = array<i64: 64, 1>}, {pipeline_mode = #tpu.pipeline_mode<synchronous>, transform_indices = @transform_4, window_bounds = array<i64: 16, 64>}, {pipeline_mode = #tpu.pipeline_mode<synchronous>, transform_indices = @transform_5, window_bounds = array<i64: 16, 1>}, {transform_indices = @transform_6, window_bounds = array<i64: 8, 64>}]} {
    %c0 = arith.constant 0 : index
    %0 = memref.load %arg1[%c0] : memref<4xf32, #tpu.memory_space<smem>>
    %c1 = arith.constant 1 : index
    %1 = memref.load %arg1[%c1] : memref<4xf32, #tpu.memory_space<smem>>
    %2 = arith.subf %1, %0 : f32
    %c2 = arith.constant 2 : index
    %3 = memref.load %arg1[%c2] : memref<4xf32, #tpu.memory_space<smem>>
    %c3 = arith.constant 3 : index
    %4 = memref.load %arg1[%c3] : memref<4xf32, #tpu.memory_space<smem>>
    %5 = arith.subf %4, %3 : f32
    %c0_0 = arith.constant 0 : index
    %c0_1 = arith.constant 0 : index
    %6 = vector.load %arg2[%c0_0, %c0_1] : memref<64x16xf32, #tpu.memory_space<vmem>>, vector<64x16xf32>
    %c0_2 = arith.constant 0 : index
    %c0_3 = arith.constant 0 : index
    %7 = vector.load %arg3[%c0_2, %c0_3] : memref<64x16xf32, #tpu.memory_space<vmem>>, vector<64x16xf32>
    %c0_4 = arith.constant 0 : index
    %c0_5 = arith.constant 0 : index
    %8 = vector.load %arg4[%c0_4, %c0_5] : memref<64x1xf32, #tpu.memory_space<vmem>>, vector<64x1xf32>
    %cst = arith.constant 0.000000e+00 : f32
    %9 = arith.cmpf ogt, %2, %cst : f32
    %cst_6 = arith.constant 1.000000e+00 : f32
    %10 = arith.select %9, %2, %cst_6 : f32
    %cst_7 = arith.constant 2.550000e+02 : f32
    %11 = arith.divf %cst_7, %10 : f32
    %12 = vector.broadcast %0 : f32 to vector<64x16xf32>
    %13 = arith.subf %6, %12 : vector<64x16xf32>
    %14 = vector.broadcast %11 : f32 to vector<64x16xf32>
    %15 = arith.mulf %13, %14 : vector<64x16xf32>
    %16 = math.floor %15 : vector<64x16xf32>
    %cst_8 = arith.constant 0.000000e+00 : f32
    %cst_9 = arith.constant 2.550000e+02 : f32
    %17 = vector.broadcast %cst_8 : f32 to vector<64x16xf32>
    %18 = arith.maximumf %17, %16 : vector<64x16xf32>
    %19 = vector.broadcast %cst_9 : f32 to vector<64x16xf32>
    %20 = arith.minimumf %19, %18 : vector<64x16xf32>
    %cst_10 = arith.constant dense<0.000000e+00> : vector<64x64xf32>
    %21 = tpu.matmul %7, %20, %cst_10 {dimension_numbers = #tpu.dot_dimension_numbers<[1], [1], [0], [0], [0, 0, 1, 0], [], []>} : vector<64x16xf32>, vector<64x16xf32>, vector<64x64xf32> -> vector<64x64xf32>
    %cst_11 = arith.constant 0.00392156886 : f32
    %22 = arith.mulf %2, %cst_11 : f32
    %23 = vector.broadcast %22 : f32 to vector<64x64xf32>
    %24 = arith.mulf %21, %23 : vector<64x64xf32>
    %25 = vector.broadcast %0 : f32 to vector<64x1xf32>
    %26 = arith.mulf %25, %8 : vector<64x1xf32>
    %27 = vector.broadcast %26 : vector<64x1xf32> to vector<64x64xf32>
    %28 = arith.addf %24, %27 : vector<64x64xf32>
    %cst_12 = arith.constant 0.000000e+00 : f32
    %29 = vector.broadcast %cst_12 : f32 to vector<64x64xf32>
    %30 = arith.maximumf %28, %29 : vector<64x64xf32>
    %c0_13 = arith.constant 0 : index
    %c0_14 = arith.constant 0 : index
    %31 = vector.load %arg5[%c0_13, %c0_14] : memref<16x64xf32, #tpu.memory_space<vmem>>, vector<16x64xf32>
    %c0_15 = arith.constant 0 : index
    %c0_16 = arith.constant 0 : index
    %32 = vector.load %arg6[%c0_15, %c0_16] : memref<16x1xf32, #tpu.memory_space<vmem>>, vector<16x1xf32>
    %cst_17 = arith.constant 0.000000e+00 : f32
    %33 = arith.cmpf ogt, %5, %cst_17 : f32
    %cst_18 = arith.constant 1.000000e+00 : f32
    %34 = arith.select %33, %5, %cst_18 : f32
    %cst_19 = arith.constant 2.550000e+02 : f32
    %35 = arith.divf %cst_19, %34 : f32
    %36 = vector.broadcast %3 : f32 to vector<64x64xf32>
    %37 = arith.subf %30, %36 : vector<64x64xf32>
    %38 = vector.broadcast %35 : f32 to vector<64x64xf32>
    %39 = arith.mulf %37, %38 : vector<64x64xf32>
    %40 = math.floor %39 : vector<64x64xf32>
    %cst_20 = arith.constant 0.000000e+00 : f32
    %cst_21 = arith.constant 2.550000e+02 : f32
    %41 = vector.broadcast %cst_20 : f32 to vector<64x64xf32>
    %42 = arith.maximumf %41, %40 : vector<64x64xf32>
    %43 = vector.broadcast %cst_21 : f32 to vector<64x64xf32>
    %44 = arith.minimumf %43, %42 : vector<64x64xf32>
    %cst_22 = arith.constant dense<0.000000e+00> : vector<16x64xf32>
    %45 = tpu.matmul %31, %44, %cst_22 {dimension_numbers = #tpu.dot_dimension_numbers<[1], [0], [0], [1], [0, 0, 1, 1], [], []>} : vector<16x64xf32>, vector<64x64xf32>, vector<16x64xf32> -> vector<16x64xf32>
    %cst_23 = arith.constant 0.00392156886 : f32
    %46 = arith.mulf %5, %cst_23 : f32
    %47 = vector.broadcast %46 : f32 to vector<16x64xf32>
    %48 = arith.mulf %45, %47 : vector<16x64xf32>
    %49 = vector.broadcast %3 : f32 to vector<16x1xf32>
    %50 = arith.mulf %49, %32 : vector<16x1xf32>
    %51 = vector.broadcast %50 : vector<16x1xf32> to vector<16x64xf32>
    %52 = arith.addf %48, %51 : vector<16x64xf32>
    %53 = vector.extract_strided_slice %52 {offsets = [0, 0], sizes = [8, 64], strides = [1, 1]} : vector<16x64xf32> to vector<8x64xf32>
    %54 = vector.extract_strided_slice %52 {offsets = [8, 0], sizes = [8, 64], strides = [1, 1]} : vector<16x64xf32> to vector<8x64xf32>
    %cst_24 = arith.constant 0.000000e+00 : f32
    %55 = vector.broadcast %cst_24 : f32 to vector<8x64xf32>
    %56 = arith.subf %55, %53 : vector<8x64xf32>
    %57 = math.exp %56 : vector<8x64xf32>
    %cst_25 = arith.constant 1.000000e+00 : f32
    %58 = vector.broadcast %cst_25 : f32 to vector<8x64xf32>
    %59 = arith.addf %58, %57 : vector<8x64xf32>
    %cst_26 = arith.constant 1.000000e+00 : f32
    %60 = vector.broadcast %cst_26 : f32 to vector<8x64xf32>
    %61 = arith.divf %60, %59 : vector<8x64xf32>
    %62 = math.tanh %54 : vector<8x64xf32>
    %63 = arith.mulf %61, %62 : vector<8x64xf32>
    %c0_27 = arith.constant 0 : index
    %c0_28 = arith.constant 0 : index
    %64 = vector.load %arg7[%c0_27, %c0_28] : memref<8x64xf32, #tpu.memory_space<vmem>>, vector<8x64xf32>
    tpu.vector_store %arg7[%c0_27, %c0_28], %63 {strides = array<i32>} : memref<8x64xf32, #tpu.memory_space<vmem>>, vector<8x64xf32>,
    return
  }
  func.func @transform_0(%arg0: i32) -> i32 {
    %c0_i32 = arith.constant 0 : i32
    %c0_i32_0 = arith.constant 0 : i32
    return %c0_i32 : i32
  }
  func.func @transform_1(%arg0: i32) -> (i32, i32) {
    %c0_i32 = arith.constant 0 : i32
    %c0_i32_0 = arith.constant 0 : i32
    return %arg0, %c0_i32 : i32, i32
  }
  func.func @transform_2(%arg0: i32) -> (i32, i32) {
    %c0_i32 = arith.constant 0 : i32
    %c0_i32_0 = arith.constant 0 : i32
    %c0_i32_1 = arith.constant 0 : i32
    return %c0_i32, %c0_i32_0 : i32, i32
  }
  func.func @transform_3(%arg0: i32) -> (i32, i32) {
    %c0_i32 = arith.constant 0 : i32
    %c0_i32_0 = arith.constant 0 : i32
    %c0_i32_1 = arith.constant 0 : i32
    return %c0_i32, %c0_i32_0 : i32, i32
  }
  func.func @transform_4(%arg0: i32) -> (i32, i32) {
    %c0_i32 = arith.constant 0 : i32
    %c0_i32_0 = arith.constant 0 : i32
    %c0_i32_1 = arith.constant 0 : i32
    return %c0_i32, %c0_i32_0 : i32, i32
  }
  func.func @transform_5(%arg0: i32) -> (i32, i32) {
    %c0_i32 = arith.constant 0 : i32
    %c0_i32_0 = arith.constant 0 : i32
    %c0_i32_1 = arith.constant 0 : i32
    return %c0_i32, %c0_i32_0 : i32, i32
  }
  func.func @transform_6(%arg0: i32) -> (i32, i32) {
    %c0_i32 = arith.constant 0 : i32
    %c0_i32_0 = arith.constant 0 : i32
    return %c0_i32, %arg0 : i32, i32
  }
}

</mosaic_0001>

<bundles_post_ra>
// kernel: reservoir_forward.7
= control target key start
LH: loop header
LB: loop body
LE: loop exit
PB: predicated region body
PF: predicated region fallthrough
CT: control target
= control target key end

     0   :  { %12 = vsyncpa [#allocation3], 0  ;;  %s852_s0 = inlined_call_operand.vmem [shape: f32[4], index: 0, kind: input, shape index: {}]   ;;  %s853_s1 = inlined_call_operand.vmem [shape: f32[64,16], index: 1, kind: input, shape index: {}]   ;;  %s854_s2 = inlined_call_operand.vmem [shape: f32[1,64], index: 2, kind: input, shape index: {}]   ;;  %s855_s3 = inlined_call_operand.vmem [shape: f32[64,16], index: 3, kind: input, shape index: {}]   ;;  %s856_s4 = inlined_call_operand.vmem [shape: f32[64,1], index: 4, kind: input, shape index: {}]   ;;  %s857_s5 = inlined_call_operand.vmem [shape: f32[16,64], index: 5, kind: input, shape index: {}]   ;;  %s858_s6 = inlined_call_operand.vmem [shape: f32[16,1], index: 6, kind: input, shape index: {}]   ;;  %s859_s7 = inlined_call_operand.vmem [shape: f32[8,64], index: 7, kind: output, shape index: {}]  }
   0x1   :  { %s19_s26 = sshll.u32 %s852_s0, 4  ;;  %s20_s26 = int_to_ptr.vmem [resolvable:$true] %s19_s26 }
   0x2   :  { %s632_s27 = scalar_lea.vmem %s20_s26, 16  ;;  %p637_p1 = scmp.lt.s32.totalorder %s20_s26, %s20_s26 }
   0x3   :  { %p633_p0 = scmp.ne.s32.totalorder %s20_s26, %s632_s27  ;;  %p638_p2 = scmp.lt.s32.totalorder %s632_s27, %s632_s27 }
   0x5   :  { %p639_p3 = por %p638_p2, %p637_p1 }
   0x7   :  { %p640_p4 = pnand %p639_p3, %p633_p0 }
   0x9   :  { %643 = shalt.err (!%p640_p4)
}
   0xa   :  { %s646_s28 = smov [#allocation2]  }
   0xb   :  { %22 = dma.vmem_to_smem %s20_s26, 16, %s646_s28, [#allocation3]  }
   0xc   :  { %644 = dma.done.wait [#allocation3], 16  }
   0xd   :  { %645 = vsyncadd [#allocation3], 4294967280 }
   0xe   :  { %38 = sfence }
   0xf   :  { %s39_s29 = sld [smem:[#allocation2]]  ;;  %vm117_vm0 = vcmask 130048   ;;  %v53_v0 = vld [vmem:[%s855_s3] sm:$0xff]  ;;  %v647_v1 = vmov 0   ;;  %v68_v2 = vld [vmem:[%s856_s4 + $0x38] sm:$0xff]  ;;  %v66_v3 = vld [vmem:[%s856_s4 + $0x28] sm:$0xff] }
  0x10   :  { %s519_s30 = sld [smem:[#allocation2 + $0x1]]  ;;  %583 = vmatprep.mubr.msk.f32.mxu0 %vm117_vm0, %v53_v0  ;;  %620 = vset.pattern.permute.xlu0 %v647_v1  ;;  %v67_v5 = vld [vmem:[%s856_s4 + $0x30] sm:$0xff]  ;;  %v65_v6 = vld [vmem:[%s856_s4 + $0x20] sm:$0xff]  ;;  %v64_v11 = vld [vmem:[%s856_s4 + $0x18] sm:$0xff]  ;;  %vm397_vm1 = vcmask 523264  }
  0x11   :  { %s695_s0 = sld [smem:[#allocation2 + $0x2]]  ;;  %621 = vset.pattern.permute.xlu1 %v647_v1  ;;  %v63_v12 = vld [vmem:[%s856_s4 + $0x10] sm:$0xff]  ;;  %v62_v16 = vld [vmem:[%s856_s4 + $0x8] sm:$0xff]  ;;  %v61_v17 = vld [vmem:[%s856_s4] sm:$0xff] }
  0x12   :  { %s521_s14 = sld [smem:[#allocation2 + $0x3]]  ;;  %v347_v21 = vld [vmem:[%s858_s6] sm:$0xff]  ;;  %v348_v23 = vld [vmem:[%s858_s6 + $0x8] sm:$0xff]  ;;  %v52_v28 = vld [vmem:[%s853_s1 + $0x38] sm:$0xff] }
  0x13   :  { %v51_v29 = vld [vmem:[%s853_s1 + $0x30] sm:$0xff]  ;;  %v50_v30 = vld [vmem:[%s853_s1 + $0x28] sm:$0xff]  ;;  %v49_v34 = vld [vmem:[%s853_s1 + $0x20] sm:$0xff] }
  0x14   :  { %v48_v40 = vld [vmem:[%s853_s1 + $0x18] sm:$0xff]  ;;  %v47_v48 = vld [vmem:[%s853_s1 + $0x10] sm:$0xff]  ;;  %v46_v55 = vld [vmem:[%s853_s1 + $0x8] sm:$0xff] }
  0x15   :  { %v705_v4 = vstv %s39_s29  ;;  %v45_v61 = vld [vmem:[%s853_s1] sm:$0xff] }
  0x16   :  { %s703_s15 = ssub.f32 %s519_s30, %s39_s29  ;;  %v288_v7 = vmul.f32 %v705_v4, %v68_v2  ;;  %v286_v8 = vmul.f32 %v705_v4, %v66_v3  ;;  %v287_v9 = vmul.f32 %v705_v4, %v67_v5  ;;  %v285_v10 = vmul.f32 %v705_v4, %v65_v6 }
  0x17   :  { %v284_v14 = vmul.f32 %v705_v4, %v64_v11  ;;  %v283_v15 = vmul.f32 %v705_v4, %v63_v12  ;;  %v282_v19 = vmul.f32 %v705_v4, %v62_v16  ;;  %v281_v20 = vmul.f32 %v705_v4, %v61_v17  ;;  %v57_v16 = vld [vmem:[%s855_s3 + $0x20] sm:$0xff]  ;;  %v58_v17 = vld [vmem:[%s855_s3 + $0x28] sm:$0xff] }
  0x18   :  { %p69_p5 = scmp.gt.f32.partialorder %s703_s15, 0.0  ;;  %326 = vperm.xlu0 %620, %v288_v7   ;;  %316 = vperm.xlu1 %621, %v286_v8   ;;  %s726_s25 = ssub.f32 %s521_s14, %s695_s0  ;;  %v744_v22 = vstv %s695_s0  ;;  %v83_v31 = vsub.f32 %v52_v28, %v705_v4  ;;  %v82_v32 = vsub.f32 %v51_v29, %v705_v4  ;;  %v81_v33 = vsub.f32 %v50_v30, %v705_v4 }
  0x19   :  { %v483_v24 = vmul.f32 %v744_v22, %v347_v21  ;;  %v484_v25 = vmul.f32 %v744_v22, %v348_v23  ;;  %v80_v39 = vsub.f32 %v49_v34, %v705_v4  ;;  %v79_v43 = vsub.f32 %v48_v40, %v705_v4  ;;  %s271_s19 = smul.f32 0.003921569, %s703_s15 }
  0x1a   :  { %s70_s20 = scalar_select %p69_p5, %s703_s15, 1.0  ;;  %v78_v50 = vsub.f32 %v47_v48, %v705_v4  ;;  %v77_v56 = vsub.f32 %v46_v55, %v705_v4  ;;  %v76_v62 = vsub.f32 %v45_v61, %v705_v4 }
  0x1b   :  { %p349_p6 = scmp.gt.f32.partialorder %s726_s25, 0.0  ;;  %v272_v29 = vstv %s271_s19  ;;  %s479_s22 = smul.f32 0.003921569, %s726_s25 }
  0x1c   :  { %v71_v13 = vstv %s70_s20  ;;  %321 = vperm.xlu0 %620, %v287_v9   ;;  %311 = vperm.xlu1 %621, %v285_v10  }
  0x1d   :  { %622 = vrcp.f32 %v71_v13  ;;  %s350_s30 = scalar_select %p349_p6, %s726_s25, 1.0  ;;  %v54_v13 = vld [vmem:[%s855_s3 + $0x8] sm:$0xff] }
  0x1f   :  { %v351_v18 = vstv %s350_s30 }
  0x20   :  { %306 = vperm.xlu0 %620, %v284_v14   ;;  %301 = vperm.xlu1 %621, %v283_v15   ;;  %624 = vrcp.f32 %v351_v18  ;;  %v55_v14 = vld [vmem:[%s855_s3 + $0x10] sm:$0xff]  ;;  %v56_v15 = vld [vmem:[%s855_s3 + $0x18] sm:$0xff] }
  0x21   :  { %v59_v18 = vld [vmem:[%s855_s3 + $0x30] sm:$0xff] }
  0x24   :  { %296 = vperm.xlu0 %620, %v282_v19   ;;  %291 = vperm.xlu1 %621, %v281_v20   ;;  %v60_v19 = vld [vmem:[%s855_s3 + $0x38] sm:$0xff]  ;;  %v345_v20 = vld [vmem:[%s857_s5] sm:$0xff] }
  0x25   :  { %611 = vmatprep.mubr.msk.f32.mxu1 %vm397_vm1, %v345_v20 }
  0x28   :  { %487 = vperm.xlu0 %620, %v483_v24   ;;  %492 = vperm.xlu1 %621, %v484_v25  }
  0x2a   :  { %v623_v26 = vpop.eup %622 }
  0x2b   :  { %614 = vpush %v623_v26 }
  0x2d   :  { %v625_v27 = vpop.eup %624 }
  0x2e   :  { %616 = vpush %v625_v27 }
  0x5c   :  { %s615_s16 = spop %614 }
  0x5d   :  { %s74_s17 = smul.f32 255.0, %s615_s16 }
  0x5f   :  { %v84_v35 = vstv %s74_s17  ;;  %s617_s3 = spop %616 }
  0x60   :  { %v92_v36 = vmul.f32 %v84_v35, %v83_v31  ;;  %v91_v37 = vmul.f32 %v84_v35, %v82_v32  ;;  %v90_v38 = vmul.f32 %v84_v35, %v81_v33  ;;  %v89_v47 = vmul.f32 %v84_v35, %v80_v39  ;;  %s354_s15 = smul.f32 255.0, %s617_s3 }
  0x61   :  { %v88_v54 = vmul.f32 %v84_v35, %v79_v43  ;;  %v87_v60 = vmul.f32 %v84_v35, %v78_v50  ;;  %v86_v2 = vmul.f32 %v84_v35, %v77_v56  ;;  %v85_v7 = vmul.f32 %v84_v35, %v76_v62 }
  0x62   :  { %v100_v41 = vfloor.f32 %v92_v36  ;;  %v99_v42 = vfloor.f32 %v91_v37  ;;  %v98_v46 = vfloor.f32 %v90_v38  ;;  %v97_v53 = vfloor.f32 %v89_v47 }
  0x63   :  { %v96_v59 = vfloor.f32 %v88_v54  ;;  %v95_v1 = vfloor.f32 %v87_v60  ;;  %v94_v6 = vfloor.f32 %v86_v2  ;;  %v93_v10 = vfloor.f32 %v85_v7 }
  0x64   :  { %v108_v44 = vmax.f32 %v100_v41, 0.0  ;;  %v107_v45 = vmax.f32 %v99_v42, 0.0  ;;  %v106_v52 = vmax.f32 %v98_v46, 0.0  ;;  %v105_v58 = vmax.f32 %v97_v53, 0.0 }
  0x65   :  { %v104_v0 = vmax.f32 %v96_v59, 0.0  ;;  %v103_v5 = vmax.f32 %v95_v1, 0.0  ;;  %v102_v9 = vmax.f32 %v94_v6, 0.0  ;;  %v101_v11 = vmax.f32 %v93_v10, 0.0 }
  0x66   :  { %v116_v49 = vmin.f32 %v108_v44, 255.0  ;;  %v115_v51 = vmin.f32 %v107_v45, 255.0  ;;  %v114_v57 = vmin.f32 %v106_v52, 255.0  ;;  %v113_v63 = vmin.f32 %v105_v58, 255.0 }
  0x67   :  { %v112_v3 = vmin.f32 %v104_v0, 255.0  ;;  %v111_v8 = vmin.f32 %v103_v5, 255.0  ;;  %v110_v4 = vmin.f32 %v102_v9, 255.0  ;;  %v109_v12 = vmin.f32 %v101_v11, 255.0 }
  0x68   :  { %567 = vmatprep.subr.msk.mxu0 %vm117_vm0, %v116_v49 }
  0x69   :  { %568 = vmatpush3.xpose.msk.msra.mxu0 %vm117_vm0, %v116_v49 }
  0x6a   :  { %569 = vmatprep.subr.msk.mxu0 %vm117_vm0, %v115_v51 }
  0x6d   :  { %570 = vmatpush3.xpose.msk.msra.mxu0 %vm117_vm0, %v115_v51 }
  0x6e   :  { %571 = vmatprep.subr.msk.mxu0 %vm117_vm0, %v114_v57 }
  0x71   :  { %572 = vmatpush3.xpose.msk.msra.mxu0 %vm117_vm0, %v114_v57 }
  0x72   :  { %573 = vmatprep.subr.msk.mxu0 %vm117_vm0, %v113_v63 }
  0x75   :  { %574 = vmatpush3.xpose.msk.msra.mxu0 %vm117_vm0, %v113_v63  ;;  %v364_v63 = vstv %s354_s15 }
  0x76   :  { %575 = vmatprep.subr.msk.mxu0 %vm117_vm0, %v112_v3 }
  0x79   :  { %576 = vmatpush3.xpose.msk.msra.mxu0 %vm117_vm0, %v112_v3 }
  0x7a   :  { %577 = vmatprep.subr.msk.mxu0 %vm117_vm0, %v111_v8 }
  0x7d   :  { %578 = vmatpush3.xpose.msk.msra.mxu0 %vm117_vm0, %v111_v8 }
  0x7e   :  { %579 = vmatprep.subr.msk.mxu0 %vm117_vm0, %v110_v4 }
  0x81   :  { %580 = vmatpush3.xpose.msk.msra.mxu0 %vm117_vm0, %v110_v4 }
  0x82   :  { %581 = vmatprep.subr.msk.mxu0 %vm117_vm0, %v109_v12 }
  0x85   :  { %582 = vmatpush3.xpose.msk.msra.mxu0 %vm117_vm0, %v109_v12 }
  0x88   :  { %584 = vmatmul.mubr.msk.f32.vlgmr.msra.gmra.mxu0 %vm117_vm0, %v54_v13 }
  0x89   :  { %586 = vmatprep.mubr.msk.f32.mxu0 %vm117_vm0, %v55_v14 }
  0x8c   :  { %587 = vmatmul.mubr.msk.f32.gmra.mxu0 %vm117_vm0, %v56_v15 }
  0x8d   :  { %589 = vmatprep.mubr.msk.f32.mxu0 %vm117_vm0, %v57_v16 }
  0x90   :  { %590 = vmatmul.mubr.msk.f32.gmra.mxu0 %vm117_vm0, %v58_v17 }
  0x91   :  { %592 = vmatprep.mubr.msk.f32.mxu0 %vm117_vm0, %v59_v18 }
  0x93   :  { %v327_v21 = vpop.permute.xlu0 %326  ;;  %v317_v23 = vpop.permute.xlu1 %316 }
  0x94   :  { %593 = vmatmul.mubr.msk.f32.gmra.mxu0 %vm117_vm0, %v60_v19 }
  0x97   :  { %v322_v24 = vpop.permute.xlu0 %321  ;;  %v312_v26 = vpop.permute.xlu1 %311 }
  0x9b   :  { %v307_v30 = vpop.permute.xlu0 %306  ;;  %v302_v33 = vpop.permute.xlu1 %301 }
  0x9f   :  { %v297_v40 = vpop.permute.xlu0 %296  ;;  %v292_v45 = vpop.permute.xlu1 %291 }
 0x148   :  { %v585_v25 = vpop.f32.mrf.mxu0 }
 0x149   :  { %v274_v37 = vmul.f32 %v585_v25, %v272_v29 }
 0x14a   :  { %v232_v27 = vpop.f32.mrf.mxu0 }
 0x14b   :  { %v273_v43 = vmul.f32 %v272_v29, %v232_v27  ;;  %v330_v50 = vadd.f32 %v297_v40, %v274_v37  ;;  %v346_v40 = vld [vmem:[%s857_s5 + $0x8] sm:$0xff] }
 0x14c   :  { %v588_v28 = vpop.f32.mrf.mxu0 }
 0x14d   :  { %v276_v31 = vmul.f32 %v588_v28, %v272_v29  ;;  %v329_v57 = vadd.f32 %v292_v45, %v273_v43  ;;  %v338_v62 = vmax.f32 %v330_v50, 0.0  ;;  %v488_v45 = vpop.permute.xlu0 %487  ;;  %v493_v50 = vpop.permute.xlu1 %492 }
 0x14e   :  { %v242_v32 = vpop.f32.mrf.mxu0 }
 0x14f   :  { %v275_v35 = vmul.f32 %v272_v29, %v242_v32  ;;  %v332_v38 = vadd.f32 %v307_v30, %v276_v31  ;;  %v337_v5 = vmax.f32 %v329_v57, 0.0  ;;  %v357_v10 = vsub.f32 %v338_v62, %v744_v22 }
 0x150   :  { %v591_v34 = vpop.f32.mrf.mxu0 }
 0x151   :  { %v278_v36 = vmul.f32 %v591_v34, %v272_v29  ;;  %v331_v46 = vadd.f32 %v302_v33, %v275_v35  ;;  %v340_v51 = vmax.f32 %v332_v38, 0.0  ;;  %v356_v14 = vsub.f32 %v337_v5, %v744_v22 }
 0x152   :  { %v252_v39 = vpop.f32.mrf.mxu0  ;;  %v366_v19 = vmul.f32 %v364_v63, %v357_v10 }
 0x153   :  { %v334_v41 = vadd.f32 %v317_v23, %v278_v36  ;;  %v277_v42 = vmul.f32 %v272_v29, %v252_v39  ;;  %v339_v58 = vmax.f32 %v331_v46, 0.0  ;;  %v359_v0 = vsub.f32 %v340_v51, %v744_v22 }
 0x154   :  { %v594_v44 = vpop.f32.mrf.mxu0  ;;  %v365_v28 = vmul.f32 %v364_v63, %v356_v14  ;;  %v374_v31 = vfloor.f32 %v366_v19 }
 0x155   :  { %v342_v47 = vmax.f32 %v334_v41, 0.0  ;;  %v333_v48 = vadd.f32 %v312_v26, %v277_v42  ;;  %v280_v49 = vmul.f32 %v594_v44, %v272_v29  ;;  %v358_v6 = vsub.f32 %v339_v58, %v744_v22 }
 0x156   :  { %v262_v52 = vpop.f32.mrf.mxu0  ;;  %v368_v13 = vmul.f32 %v364_v63, %v359_v0  ;;  %v373_v33 = vfloor.f32 %v365_v28  ;;  %v382_v35 = vmax.f32 %v374_v31, 0.0  ;;  %v480_v42 = vstv %s479_s22 }
 0x157   :  { %v361_v53 = vsub.f32 %v342_v47, %v744_v22  ;;  %v341_v54 = vmax.f32 %v333_v48, 0.0  ;;  %v336_v55 = vadd.f32 %v327_v21, %v280_v49  ;;  %v279_v56 = vmul.f32 %v272_v29, %v262_v52 }
 0x158   :  { %v367_v18 = vmul.f32 %v364_v63, %v358_v6  ;;  %v381_v37 = vmax.f32 %v373_v33, 0.0  ;;  %v390_v38 = vmin.f32 %v382_v35, 255.0 }
 0x159   :  { %v360_v59 = vsub.f32 %v341_v54, %v744_v22  ;;  %v344_v60 = vmax.f32 %v336_v55, 0.0  ;;  %v335_v61 = vadd.f32 %v322_v24, %v279_v56  ;;  %v370_v3 = vmul.f32 %v364_v63, %v361_v53  ;;  %v540_v56 = vld [vmem:[%s854_s2] ss:$0 sm:$0xff] }
 0x15a   :  { %v376_v24 = vfloor.f32 %v368_v13  ;;  %v375_v27 = vfloor.f32 %v367_v18  ;;  %v389_v39 = vmin.f32 %v381_v37, 255.0 }
 0x15b   :  { %v343_v1 = vmax.f32 %v335_v61, 0.0  ;;  %v363_v2 = vsub.f32 %v344_v60, %v744_v22  ;;  %v369_v9 = vmul.f32 %v364_v63, %v360_v59  ;;  %v378_v12 = vfloor.f32 %v370_v3 }
 0x15c   :  { %v384_v30 = vmax.f32 %v376_v24, 0.0  ;;  %v383_v32 = vmax.f32 %v375_v27, 0.0 }
 0x15d   :  { %v362_v7 = vsub.f32 %v343_v1, %v744_v22  ;;  %v372_v8 = vmul.f32 %v364_v63, %v363_v2  ;;  %v377_v17 = vfloor.f32 %v369_v9  ;;  %v386_v23 = vmax.f32 %v378_v12, 0.0 }
 0x15e   :  { %v392_v34 = vmin.f32 %v384_v30, 255.0  ;;  %v391_v36 = vmin.f32 %v383_v32, 255.0 }
 0x15f   :  { %v380_v4 = vfloor.f32 %v372_v8  ;;  %v371_v11 = vmul.f32 %v364_v63, %v362_v7  ;;  %v385_v26 = vmax.f32 %v377_v17, 0.0  ;;  %v394_v29 = vmin.f32 %v386_v23, 255.0 }
 0x161   :  { %v388_v15 = vmax.f32 %v380_v4, 0.0  ;;  %v379_v16 = vfloor.f32 %v371_v11  ;;  %v393_v22 = vmin.f32 %v385_v26, 255.0 }
 0x163   :  { %v396_v20 = vmin.f32 %v388_v15, 255.0  ;;  %v387_v21 = vmax.f32 %v379_v16, 0.0 }
 0x165   :  { %595 = vmatprep.subr.mxu1 %v396_v20  ;;  %v395_v25 = vmin.f32 %v387_v21, 255.0 }
 0x166   :  { %596 = vmatpush3.msra.mxu1 %v396_v20 }
 0x167   :  { %597 = vmatprep.subr.mxu1 %v395_v25 }
 0x168   :  { %598 = vmatpush3.msra.mxu1 %v395_v25 }
 0x169   :  { %599 = vmatprep.subr.mxu1 %v394_v29 }
 0x16a   :  { %600 = vmatpush3.msra.mxu1 %v394_v29 }
 0x16b   :  { %601 = vmatprep.subr.mxu1 %v393_v22 }
 0x16c   :  { %602 = vmatpush3.msra.mxu1 %v393_v22 }
 0x16d   :  { %603 = vmatprep.subr.mxu1 %v392_v34 }
 0x16e   :  { %604 = vmatpush3.msra.mxu1 %v392_v34 }
 0x16f   :  { %605 = vmatprep.subr.mxu1 %v391_v36 }
 0x170   :  { %606 = vmatpush3.msra.mxu1 %v391_v36 }
 0x171   :  { %607 = vmatprep.subr.mxu1 %v390_v38 }
 0x172   :  { %608 = vmatpush3.msra.mxu1 %v390_v38 }
 0x173   :  { %609 = vmatprep.subr.mxu1 %v389_v39 }
 0x174   :  { %610 = vmatpush3.msra.mxu1 %v389_v39 }
 0x175   :  { %612 = vmatmul.mubr.msk.f32.vlgmr.msra.gmra.mxu1 %vm397_vm1, %v346_v40 }
 0x235   :  { %v613_v41 = vpop.f32.mrf.mxu1 }
 0x236   :  { %v482_v49 = vmul.f32 %v613_v41, %v480_v42 }
 0x237   :  { %v470_v43 = vpop.f32.mrf.mxu1 }
 0x238   :  { %v481_v44 = vmul.f32 %v480_v42, %v470_v43  ;;  %v496_v51 = vadd.f32 %v493_v50, %v482_v49 }
 0x23a   :  { %v495_v46 = vadd.f32 %v488_v45, %v481_v44 }
 0x23c   :  { %v497_v47 = vsub.f32 0.0, %v495_v46 }
 0x23e   :  { %v498_v48 = vmul.f32 1.442695, %v497_v47 }
 0x240   :  { %626 = vpow2.f32 %v498_v48 }
 0x241   :  { %628 = vtanh.f32 %v496_v51 }
 0x24d   :  { %v627_v52 = vpop.eup %626 }
 0x24e   :  { %v500_v53 = vadd.f32 1.0, %v627_v52  ;;  %v629_v54 = vpop.eup %628 }
 0x250   :  { %630 = vrcp.f32 %v500_v53 }
 0x25d   :  { %v631_v55 = vpop.eup %630 }
 0x25e   :  { %v504_v57 = vmul.f32 %v631_v55, %v629_v54 }
 0x260   :  { %v512_v58 = vmul.f32 %v540_v56, %v504_v57 }
 0x262   :  { %513 = vst.msk [vmem:[%s859_s7] sm:$0xff] %vm397_vm1, %v512_v58 }
 0x263   :  { %518 = vsyncpa [#allocation3], 1 }

// kernel: reservoir_forward.6
= control target key start
LH: loop header
LB: loop body
LE: loop exit
PB: predicated region body
PF: predicated region fallthrough
CT: control target
= control target key end

     0   :  { %11 = vsyncpa [#allocation3], 0  ;;  %s967_s18 = smov 0   ;;  %s969_s19 = smov 0   ;;  %s1168_s0 = inlined_call_operand.vmem [shape: f32[2], index: 0, kind: input, shape index: {}]   ;;  %s1169_s1 = inlined_call_operand.vmem [shape: f32[64,16], index: 1, kind: input, shape index: {}]   ;;  %s1170_s2 = inlined_call_operand.vmem [shape: f32[64,16], index: 2, kind: input, shape index: {}]   ;;  %s1171_s3 = inlined_call_operand.vmem [shape: f32[64,1], index: 3, kind: input, shape index: {}]   ;;  %s1172_s4 = inlined_call_operand.vmem [shape: f32[16,128], index: 4, kind: output, shape index: {0}]   ;;  %s1173_s5 = inlined_call_operand.vmem [shape: f32[16,128], index: 5, kind: output, shape index: {1}]  }
   0x1   :  { %s971_s20 = smov 0  }
   0x2 LB: > { %s754_s21 = sadd.s32 4294967295, %s933_s20   ;;  %s29_s22 = sadd.s32 1, %s929_s19  ;;  %s933_s20 = sphi %s971_s20, %s17_s20   ;;  %s929_s19 = sphi %s969_s19, %s1177_s19   ;;  %s925_s18 = sphi %s967_s18, %s1176_s18  }
   0x3   : > { %p31_p0 = scmp.ge.s32.totalorder %s29_s22, 2  ;;  %p756_p1 = scmp.ge.s32.totalorder %s933_s20, 1 }
   0x4   : > { %p181_p2 = scmp.lt.s32.totalorder %s933_s20, 3  ;;  %p992_p4 = scmp.eq.s32.totalorder %s754_s21, 0 }
   0x5   : > { %s1179_s22 = smov (%p31_p0, %s29_s22), 0  ;;  %s194_s27 = sshll.u32 %s1168_s0, 4  ;;  %s195_s27 = int_to_ptr.vmem [resolvable:$true] %s194_s27 }
   0x6   : > { %p988_p3 = pnand %p756_p1, %p181_p2  ;;  %s892_s28 = scalar_lea.vmem %s195_s27, 16 }
   0x7   : > { %p893_p7 = scmp.ne.s32.totalorder %s195_s27, %s892_s28  ;;  %p900_p11 = scmp.lt.s32.totalorder %s195_s27, %s195_s27 }
   0x8   : > { %p854_p5 = pneg %p988_p3  ;;  %p901_p12 = scmp.lt.s32.totalorder %s892_s28, %s892_s28 }
   0xa   : > { %p855_p6 = pnand %p992_p4, %p854_p5  ;;  %p902_p13 = por %p901_p12, %p900_p11 }
   0xc   : > { %p894_p8 = pneg %p855_p6 }
   0xe   : > { %p895_p9 = pnand %p894_p8, %p893_p7 }
  0x10   : > { %p896_p10 = pneg %p895_p9 }
  0x12   : > { %p903_p0 = pnand %p902_p13, %p896_p10 }
  0x14   : > { %906 = shalt.err (!%p903_p0)
}
  0x15   : > { %s935_s29 = smov [#allocation2]   ;;  %228 = sbr.rel (%p988_p3) target bundleno = 566 (0x236), region = 36 }
  0x16   : > { %857 = dma.vmem_to_smem (!%p855_p6), %s195_s27, 16, %s935_s29, [#allocation3]  }
  0x1a   : > { %920 = dma.done.wait (%p992_p4), [#allocation3], 16  }
  0x1b   : > { %922 = vsyncadd (%p992_p4), [#allocation3], 4294967280 }
  0x1c   : > { %234 = sfence }
  0x1d   : > { %s289_s30 = sld [smem:[#allocation2]]  ;;  %vm364_vm0 = vcmask 130048   ;;  %v300_v0 = vld [vmem:[%s1170_s2] sm:$0xff]  ;;  %v936_v2 = vmov 0   ;;  %v310_v3 = vld [vmem:[%s1171_s3 + $0x10] sm:$0xff]  ;;  %v311_v6 = vld [vmem:[%s1171_s3 + $0x18] sm:$0xff] }
  0x1e   : > { %v304_v1 = vld [vmem:[%s1170_s2 + $0x20] sm:$0xff]  ;;  %s765_s10 = sld [smem:[#allocation2 + $0x1]]  ;;  %816 = vmatprep.mubr.msk.f32.mxu0 %vm364_vm0, %v300_v0  ;;  %889 = vset.pattern.permute.xlu1 %v936_v2  ;;  %v309_v7 = vld [vmem:[%s1171_s3 + $0x8] sm:$0xff]  ;;  %v315_v17 = vld [vmem:[%s1171_s3 + $0x38] sm:$0xff]  ;;  %p264_p2 = scmp.lt.s32.totalorder %s925_s18, 0  ;;  %vm593_vm1 = vcmask 523264  }
  0x1f   : > { %822 = vmatprep.mubr.msk.f32.mxu1 %vm364_vm0, %v304_v1  ;;  %888 = vset.pattern.permute.xlu0 %v936_v2  ;;  %v308_v4 = vld [vmem:[%s1171_s3] sm:$0xff]  ;;  %v313_v12 = vld [vmem:[%s1171_s3 + $0x28] sm:$0xff]  ;;  %v314_v18 = vld [vmem:[%s1171_s3 + $0x30] sm:$0xff]  ;;  %p275_p4 = scmp.lt.s32.totalorder %s925_s18, 1 }
  0x20   : > { %v312_v13 = vld [vmem:[%s1171_s3 + $0x20] sm:$0xff]  ;;  %s265_s8 = scalar_select %p264_p2, %s925_s18, 0 }
  0x21   : > { %s1183_s18 = smov (!%p275_p4, %s925_s18), 1 }
  0x22   : > { %s761_s9 = sshll.u32 %s265_s8, 3 }
  0x23   : > { %v1023_v5 = vstv %s289_s30  ;;  %p267_p3 = scmp.lt.s32.totalorder %s761_s9, 7 }
  0x24   : > { %s1031_s23 = ssub.f32 %s765_s10, %s289_s30  ;;  %v530_v8 = vmul.f32 %v1023_v5, %v310_v3  ;;  %v528_v9 = vmul.f32 %v1023_v5, %v308_v4  ;;  %v531_v10 = vmul.f32 %v1023_v5, %v311_v6  ;;  %v529_v11 = vmul.f32 %v1023_v5, %v309_v7  ;;  %v301_v7 = vld [vmem:[%s1170_s2 + $0x8] sm:$0xff] }
  0x25   : > { %v533_v15 = vmul.f32 %v1023_v5, %v313_v12  ;;  %v532_v16 = vmul.f32 %v1023_v5, %v312_v13  ;;  %v535_v19 = vmul.f32 %v1023_v5, %v315_v17  ;;  %v534_v20 = vmul.f32 %v1023_v5, %v314_v18  ;;  %s1181_s9 = smov (!%p267_p3, %s761_s9), 7  ;;  %v307_v12 = vld [vmem:[%s1170_s2 + $0x38] sm:$0xff] }
  0x26   : > { %p316_p1 = scmp.gt.f32.partialorder %s1031_s23, 0.0  ;;  %548 = vperm.xlu1 %889, %v530_v8   ;;  %538 = vperm.xlu0 %888, %v528_v9   ;;  %s762_s10 = sshll.u32 %s1181_s9, 3  ;;  %v305_v8 = vld [vmem:[%s1170_s2 + $0x28] sm:$0xff]  ;;  %v302_v9 = vld [vmem:[%s1170_s2 + $0x10] sm:$0xff] }
  0x27   : > { %s1060_s13 = scalar_lea.vmem %s1169_s1, %s762_s10  ;;  %s518_s8 = smul.f32 0.003921569, %s1031_s23 }
  0x28   : > { %s317_s28 = scalar_select %p316_p1, %s1031_s23, 1.0  ;;  %v299_v22 = vld [vmem:[%s1060_s13 + $0x38] sm:$0xff]  ;;  %v298_v23 = vld [vmem:[%s1060_s13 + $0x30] sm:$0xff]  ;;  %v297_v24 = vld [vmem:[%s1060_s13 + $0x28] sm:$0xff] }
  0x29   : > { %v330_v25 = vsub.f32 %v299_v22, %v1023_v5  ;;  %v329_v26 = vsub.f32 %v298_v23, %v1023_v5  ;;  %v328_v27 = vsub.f32 %v297_v24, %v1023_v5  ;;  %v296_v28 = vld [vmem:[%s1060_s13 + $0x20] sm:$0xff]  ;;  %v295_v34 = vld [vmem:[%s1060_s13 + $0x18] sm:$0xff]  ;;  %v294_v42 = vld [vmem:[%s1060_s13 + $0x10] sm:$0xff]  ;;  %v519_v17 = vstv %s518_s8  ;;  %s763_s23 = sshll.u32 %s1183_s18, 3 }
  0x2a   : > { %v318_v14 = vstv %s317_s28  ;;  %553 = vperm.xlu1 %889, %v531_v10   ;;  %543 = vperm.xlu0 %888, %v529_v11   ;;  %v327_v33 = vsub.f32 %v296_v28, %v1023_v5  ;;  %v326_v37 = vsub.f32 %v295_v34, %v1023_v5  ;;  %v325_v44 = vsub.f32 %v294_v42, %v1023_v5  ;;  %v293_v49 = vld [vmem:[%s1060_s13 + $0x8] sm:$0xff]  ;;  %v292_v55 = vld [vmem:[%s1060_s13] sm:$0xff]  ;;  %v306_v10 = vld [vmem:[%s1170_s2 + $0x30] sm:$0xff]  ;;  %s278_s12 = scalar_lea.vmem %s1172_s4, %s763_s23  ;;  %s282_s16 = scalar_lea.vmem %s1173_s5, %s763_s23 }
  0x2b   : > { %890 = vrcp.f32 %v318_v14  ;;  %v324_v50 = vsub.f32 %v293_v49, %v1023_v5  ;;  %v323_v56 = vsub.f32 %v292_v55, %v1023_v5  ;;  %v303_v11 = vld [vmem:[%s1170_s2 + $0x18] sm:$0xff] }
  0x2e   : > { %563 = vperm.xlu1 %889, %v533_v15   ;;  %558 = vperm.xlu0 %888, %v532_v16  }
  0x32   : > { %573 = vperm.xlu1 %889, %v535_v19   ;;  %568 = vperm.xlu0 %888, %v534_v20  }
  0x38   : > { %v891_v21 = vpop.eup %890 }
  0x39   : > { %844 = vpush %v891_v21 }
  0x6a   : > { %s845_s14 = spop %844 }
  0x6b   : > { %s321_s15 = smul.f32 255.0, %s845_s14 }
  0x6d   : > { %v331_v29 = vstv %s321_s15 }
  0x6e   : > { %v339_v30 = vmul.f32 %v331_v29, %v330_v25  ;;  %v338_v31 = vmul.f32 %v331_v29, %v329_v26  ;;  %v337_v32 = vmul.f32 %v331_v29, %v328_v27  ;;  %v336_v41 = vmul.f32 %v331_v29, %v327_v33 }
  0x6f   : > { %v335_v48 = vmul.f32 %v331_v29, %v326_v37  ;;  %v334_v54 = vmul.f32 %v331_v29, %v325_v44  ;;  %v333_v60 = vmul.f32 %v331_v29, %v324_v50  ;;  %v332_v0 = vmul.f32 %v331_v29, %v323_v56 }
  0x70   : > { %v347_v35 = vfloor.f32 %v339_v30  ;;  %v346_v36 = vfloor.f32 %v338_v31  ;;  %v345_v40 = vfloor.f32 %v337_v32  ;;  %v344_v47 = vfloor.f32 %v336_v41 }
  0x71   : > { %v343_v53 = vfloor.f32 %v335_v48  ;;  %v342_v59 = vfloor.f32 %v334_v54  ;;  %v341_v63 = vfloor.f32 %v333_v60  ;;  %v340_v3 = vfloor.f32 %v332_v0 }
  0x72   : > { %v355_v38 = vmax.f32 %v347_v35, 0.0  ;;  %v354_v39 = vmax.f32 %v346_v36, 0.0  ;;  %v353_v46 = vmax.f32 %v345_v40, 0.0  ;;  %v352_v52 = vmax.f32 %v344_v47, 0.0 }
  0x73   : > { %v351_v58 = vmax.f32 %v343_v53, 0.0  ;;  %v350_v62 = vmax.f32 %v342_v59, 0.0  ;;  %v349_v2 = vmax.f32 %v341_v63, 0.0  ;;  %v348_v5 = vmax.f32 %v340_v3, 0.0 }
  0x74   : > { %v363_v43 = vmin.f32 %v355_v38, 255.0  ;;  %v362_v45 = vmin.f32 %v354_v39, 255.0  ;;  %v361_v51 = vmin.f32 %v353_v46, 255.0  ;;  %v360_v57 = vmin.f32 %v352_v52, 255.0 }
  0x75   : > { %v359_v61 = vmin.f32 %v351_v58, 255.0  ;;  %v358_v1 = vmin.f32 %v350_v62, 255.0  ;;  %v357_v4 = vmin.f32 %v349_v2, 255.0  ;;  %v356_v6 = vmin.f32 %v348_v5, 255.0 }
  0x76   : > { %800 = vmatprep.subr.msk.mxu0 %vm364_vm0, %v363_v43  ;;  %828 = vmatprep.subr.msk.mxu1 %vm364_vm0, %v363_v43 }
  0x77   : > { %801 = vmatpush3.xpose.msk.msra.mxu0 %vm364_vm0, %v363_v43  ;;  %836 = vmatpush3.xpose.msk.msra.mxu1 %vm364_vm0, %v363_v43 }
  0x78   : > { %802 = vmatprep.subr.msk.mxu0 %vm364_vm0, %v362_v45  ;;  %829 = vmatprep.subr.msk.mxu1 %vm364_vm0, %v362_v45 }
  0x7b   : > { %803 = vmatpush3.xpose.msk.msra.mxu0 %vm364_vm0, %v362_v45  ;;  %837 = vmatpush3.xpose.msk.msra.mxu1 %vm364_vm0, %v362_v45 }
  0x7c   : > { %804 = vmatprep.subr.msk.mxu0 %vm364_vm0, %v361_v51  ;;  %830 = vmatprep.subr.msk.mxu1 %vm364_vm0, %v361_v51 }
  0x7f   : > { %805 = vmatpush3.xpose.msk.msra.mxu0 %vm364_vm0, %v361_v51  ;;  %838 = vmatpush3.xpose.msk.msra.mxu1 %vm364_vm0, %v361_v51 }
  0x80   : > { %806 = vmatprep.subr.msk.mxu0 %vm364_vm0, %v360_v57  ;;  %831 = vmatprep.subr.msk.mxu1 %vm364_vm0, %v360_v57 }
  0x83   : > { %807 = vmatpush3.xpose.msk.msra.mxu0 %vm364_vm0, %v360_v57  ;;  %839 = vmatpush3.xpose.msk.msra.mxu1 %vm364_vm0, %v360_v57 }
  0x84   : > { %808 = vmatprep.subr.msk.mxu0 %vm364_vm0, %v359_v61  ;;  %832 = vmatprep.subr.msk.mxu1 %vm364_vm0, %v359_v61 }
  0x87   : > { %809 = vmatpush3.xpose.msk.msra.mxu0 %vm364_vm0, %v359_v61  ;;  %840 = vmatpush3.xpose.msk.msra.mxu1 %vm364_vm0, %v359_v61 }
  0x88   : > { %810 = vmatprep.subr.msk.mxu0 %vm364_vm0, %v358_v1  ;;  %833 = vmatprep.subr.msk.mxu1 %vm364_vm0, %v358_v1 }
  0x8b   : > { %811 = vmatpush3.xpose.msk.msra.mxu0 %vm364_vm0, %v358_v1  ;;  %841 = vmatpush3.xpose.msk.msra.mxu1 %vm364_vm0, %v358_v1 }
  0x8c   : > { %812 = vmatprep.subr.msk.mxu0 %vm364_vm0, %v357_v4  ;;  %834 = vmatprep.subr.msk.mxu1 %vm364_vm0, %v357_v4 }
  0x8f   : > { %813 = vmatpush3.xpose.msk.msra.mxu0 %vm364_vm0, %v357_v4  ;;  %842 = vmatpush3.xpose.msk.msra.mxu1 %vm364_vm0, %v357_v4 }
  0x90   : > { %814 = vmatprep.subr.msk.mxu0 %vm364_vm0, %v356_v6  ;;  %835 = vmatprep.subr.msk.mxu1 %vm364_vm0, %v356_v6 }
  0x93   : > { %815 = vmatpush3.xpose.msk.msra.mxu0 %vm364_vm0, %v356_v6  ;;  %843 = vmatpush3.xpose.msk.msra.mxu1 %vm364_vm0, %v356_v6 }
  0x96   : > { %817 = vmatmul.mubr.msk.f32.vlgmr.msra.gmra.mxu0 %vm364_vm0, %v301_v7  ;;  %823 = vmatmul.mubr.msk.f32.vlgmr.msra.gmra.mxu1 %vm364_vm0, %v305_v8 }
  0x97   : > { %819 = vmatprep.mubr.msk.f32.mxu0 %vm364_vm0, %v302_v9  ;;  %825 = vmatprep.mubr.msk.f32.mxu1 %vm364_vm0, %v306_v10 }
  0x9a   : > { %820 = vmatmul.mubr.msk.f32.gmra.mxu0 %vm364_vm0, %v303_v11  ;;  %826 = vmatmul.mubr.msk.f32.gmra.mxu1 %vm364_vm0, %v307_v12 }
  0xa1   : > { %v549_v13 = vpop.permute.xlu1 %548  ;;  %v539_v14 = vpop.permute.xlu0 %538 }
  0xa5   : > { %v554_v15 = vpop.permute.xlu1 %553  ;;  %v544_v16 = vpop.permute.xlu0 %543 }
  0xa9   : > { %v564_v20 = vpop.permute.xlu1 %563  ;;  %v559_v25 = vpop.permute.xlu0 %558 }
  0xad   : > { %v574_v40 = vpop.permute.xlu1 %573  ;;  %v569_v47 = vpop.permute.xlu0 %568 }
 0x156   : > { %v818_v18 = vpop.f32.mrf.mxu0  ;;  %v824_v19 = vpop.f32.mrf.mxu1 }
 0x157   : > { %v521_v21 = vmul.f32 %v818_v18, %v519_v17  ;;  %v525_v22 = vmul.f32 %v824_v19, %v519_v17 }
 0x158   : > { %v479_v23 = vpop.f32.mrf.mxu0  ;;  %v499_v24 = vpop.f32.mrf.mxu1 }
 0x159   : > { %v577_v26 = vadd.f32 %v544_v16, %v521_v21  ;;  %v581_v27 = vadd.f32 %v564_v20, %v525_v22  ;;  %v520_v28 = vmul.f32 %v519_v17, %v479_v23  ;;  %v524_v29 = vmul.f32 %v519_v17, %v499_v24 }
 0x15a   : > { %v821_v30 = vpop.f32.mrf.mxu0  ;;  %v827_v31 = vpop.f32.mrf.mxu1 }
 0x15b   : > { %v576_v32 = vadd.f32 %v539_v14, %v520_v28  ;;  %v580_v33 = vadd.f32 %v559_v25, %v524_v29  ;;  %v585_v34 = vmax.f32 %v577_v26, 0.0  ;;  %v589_v35 = vmax.f32 %v581_v27, 0.0 }
 0x15c   : > { %v523_v36 = vmul.f32 %v821_v30, %v519_v17  ;;  %v527_v37 = vmul.f32 %v827_v31, %v519_v17  ;;  %v489_v38 = vpop.f32.mrf.mxu0  ;;  %v509_v39 = vpop.f32.mrf.mxu1 }
 0x15d   : > { %v584_v41 = vmax.f32 %v576_v32, 0.0  ;;  %v588_v42 = vmax.f32 %v580_v33, 0.0  ;;  %v522_v45 = vmul.f32 %v519_v17, %v489_v38  ;;  %v526_v46 = vmul.f32 %v519_v17, %v509_v39 }
 0x15e   : > { %v579_v43 = vadd.f32 %v554_v15, %v523_v36  ;;  %v583_v44 = vadd.f32 %v574_v40, %v527_v37  ;;  %v595_v48 = vsel %vm593_vm1, %v585_v34, inf  ;;  %v623_v49 = vsel %vm593_vm1, %v585_v34, -inf }
 0x15f   : > { %v600_v50 = vsel %vm593_vm1, %v589_v35, inf  ;;  %v628_v51 = vsel %vm593_vm1, %v589_v35, -inf  ;;  %v578_v54 = vadd.f32 %v549_v13, %v522_v45  ;;  %v582_v55 = vadd.f32 %v569_v47, %v526_v46 }
 0x160   : > { %v587_v52 = vmax.f32 %v579_v43, 0.0  ;;  %v591_v53 = vmax.f32 %v583_v44, 0.0  ;;  %v594_v56 = vsel %vm593_vm1, %v584_v41, inf  ;;  %v622_v57 = vsel %vm593_vm1, %v584_v41, -inf }
 0x161   : > { %v598_v58 = vsel %vm593_vm1, %v588_v42, inf  ;;  %v626_v59 = vsel %vm593_vm1, %v588_v42, -inf  ;;  %v586_v0 = vmax.f32 %v578_v54, 0.0  ;;  %v590_v1 = vmax.f32 %v582_v55, 0.0 }
 0x162   : > { %v597_v60 = vsel %vm593_vm1, %v587_v52, inf  ;;  %v625_v61 = vsel %vm593_vm1, %v587_v52, -inf  ;;  %v604_v62 = vsel %vm593_vm1, %v591_v53, inf  ;;  %v632_v63 = vsel %vm593_vm1, %v591_v53, -inf }
 0x163   : > { %v627_v2 = vmax.f32 %v622_v57, %v626_v59  ;;  %v629_v3 = vmax.f32 %v623_v49, %v628_v51  ;;  %v599_v4 = vmin.f32 %v594_v56, %v598_v58  ;;  %v601_v5 = vmin.f32 %v595_v48, %v600_v50 }
 0x164   : > { %v596_v6 = vsel %vm593_vm1, %v586_v0, inf  ;;  %v624_v7 = vsel %vm593_vm1, %v586_v0, -inf  ;;  %v602_v8 = vsel %vm593_vm1, %v590_v1, inf  ;;  %v630_v9 = vsel %vm593_vm1, %v590_v1, -inf }
 0x165   : > { %v631_v10 = vmax.f32 %v624_v7, %v630_v9  ;;  %v633_v11 = vmax.f32 %v625_v61, %v632_v63  ;;  %v603_v12 = vmin.f32 %v596_v6, %v602_v8  ;;  %v605_v13 = vmin.f32 %v597_v60, %v604_v62 }
 0x166   : > { %v634_v14 = vmax.f32 %v627_v2, %v629_v3  ;;  %v606_v16 = vmin.f32 %v599_v4, %v601_v5 }
 0x167   : > { %v635_v15 = vmax.f32 %v631_v10, %v633_v11  ;;  %v607_v17 = vmin.f32 %v603_v12, %v605_v13 }
 0x169   : > { %v636_v18 = vmax.f32 %v634_v14, %v635_v15  ;;  %v608_v19 = vmin.f32 %v606_v16, %v607_v17 }
 0x16b   : > { %637 = vmax.xlane.f32.xlu1 %v636_v18  ;;  %609 = vmin.xlane.f32.xlu0 %v608_v19 }
 0x1f4   : > { %v638_v20 = vpop.xlane.xlu1 %637  ;;  %v610_v21 = vpop.xlane.xlu0 %609 }
 0x1f5   : > { %v639_v22 = vrot.slane %v638_v20, 4  ;;  %v611_v23 = vrot.slane %v610_v21, 4 }
 0x1f7   : > { %v640_v24 = vmax.f32 %v638_v20, %v639_v22  ;;  %v612_v25 = vmin.f32 %v610_v21, %v611_v23 }
 0x1f9   : > { %v641_v26 = vrot.slane %v640_v24, 2  ;;  %v613_v27 = vrot.slane %v612_v25, 2 }
 0x1fb   : > { %v642_v28 = vmax.f32 %v640_v24, %v641_v26  ;;  %v614_v29 = vmin.f32 %v612_v25, %v613_v27 }
 0x1fd   : > { %v615_v30 = vrot.slane %v614_v29, 1  ;;  %v643_v31 = vrot.slane %v642_v28, 1 }
 0x1ff   : > { %v616_v32 = vmin.f32 %v614_v29, %v615_v30  ;;  %v644_v33 = vmax.f32 %v642_v28, %v643_v31 }
 0x201   : > { %846 = vpush %v616_v32 }
 0x202   : > { %848 = vpush %v644_v33 }
 0x232   : > { %s847_s9 = spop %846 }
 0x233   : > { %v618_v34 = vstv %s847_s9  ;;  %s849_s13 = spop %848 }
 0x234   : > { %v646_v35 = vstv %s849_s13  ;;  %620 = vst [vmem:[%s278_s12] sm:$0xff] %v618_v34 }
 0x235   : > { %648 = vst [vmem:[%s282_s16] sm:$0xff] %v646_v35 }
 0x236 PF: > { %s17_s20 = sadd.s32 1, %s933_s20   ;;  %s1176_s18 = smov %s929_s19 }
 0x237   : > { %p14_p5 = scmp.ge.s32.totalorder %s17_s20, 4   ;;  %s1177_s19 = smov %s1179_s22 }
 0x239   :  { %16 = sbr.rel (!%p14_p5) target bundleno = 2 (0x2), region = 87 }
 0x23e   :  { %682 = vsyncpa [#allocation3], 1 }
 0x23f   :  { %684 = vsyncpa [#allocation3 + $0x1], 1 }

// kernel: reservoir_forward.10
= control target key start
LH: loop header
LB: loop body
LE: loop exit
PB: predicated region body
PF: predicated region fallthrough
CT: control target
= control target key end

     0   :  { %11 = vsyncpa [#allocation3], 0  ;;  %s1318_s18 = smov 0   ;;  %s1320_s19 = smov 0   ;;  %s1696_s0 = inlined_call_operand.vmem [shape: f32[2], index: 0, kind: input, shape index: {}]   ;;  %s1697_s1 = inlined_call_operand.vmem [shape: f32[256,40], index: 1, kind: input, shape index: {}]   ;;  %s1698_s2 = inlined_call_operand.vmem [shape: f32[80,40], index: 2, kind: input, shape index: {}]   ;;  %s1699_s3 = inlined_call_operand.vmem [shape: f32[80,1], index: 3, kind: input, shape index: {}]   ;;  %s1700_s4 = inlined_call_operand.vmem [shape: f32[16,128], index: 4, kind: output, shape index: {0}]   ;;  %s1701_s5 = inlined_call_operand.vmem [shape: f32[16,128], index: 5, kind: output, shape index: {1}]  }
   0x1   :  { %s1322_s20 = smov 0  }
   0x2 LB: > { %s1055_s21 = sadd.s32 4294967295, %s1284_s20   ;;  %s29_s22 = sadd.s32 1, %s1280_s19  ;;  %s1284_s20 = sphi %s1322_s20, %s17_s20   ;;  %s1280_s19 = sphi %s1320_s19, %s1705_s19   ;;  %s1276_s18 = sphi %s1318_s18, %s1704_s18  }
   0x3   : > { %p31_p0 = scmp.ge.s32.totalorder %s29_s22, 2  ;;  %p1057_p1 = scmp.ge.s32.totalorder %s1284_s20, 1 }
   0x4   : > { %p181_p2 = scmp.lt.s32.totalorder %s1284_s20, 3  ;;  %p1343_p4 = scmp.eq.s32.totalorder %s1055_s21, 0 }
   0x5   : > { %s1707_s22 = smov (%p31_p0, %s29_s22), 0  ;;  %s194_s27 = sshll.u32 %s1696_s0, 4  ;;  %s195_s27 = int_to_ptr.vmem [resolvable:$true] %s194_s27 }
   0x6   : > { %p1339_p3 = pnand %p1057_p1, %p181_p2  ;;  %s1243_s28 = scalar_lea.vmem %s195_s27, 16 }
   0x7   : > { %p1244_p7 = scmp.ne.s32.totalorder %s195_s27, %s1243_s28  ;;  %p1251_p11 = scmp.lt.s32.totalorder %s195_s27, %s195_s27 }
   0x8   : > { %p1205_p5 = pneg %p1339_p3  ;;  %p1252_p12 = scmp.lt.s32.totalorder %s1243_s28, %s1243_s28 }
   0xa   : > { %p1206_p6 = pnand %p1343_p4, %p1205_p5  ;;  %p1253_p13 = por %p1252_p12, %p1251_p11 }
   0xc   : > { %p1245_p8 = pneg %p1206_p6 }
   0xe   : > { %p1246_p9 = pnand %p1245_p8, %p1244_p7 }
  0x10   : > { %p1247_p10 = pneg %p1246_p9 }
  0x12   : > { %p1254_p0 = pnand %p1253_p13, %p1247_p10 }
  0x14   : > { %1257 = shalt.err (!%p1254_p0)
}
  0x15   : > { %s1286_s29 = smov [#allocation2]   ;;  %228 = sbr.rel (%p1339_p3) target bundleno = 613 (0x265), region = 36 }
  0x16   : > { %1208 = dma.vmem_to_smem (!%p1206_p6), %s195_s27, 16, %s1286_s29, [#allocation3]  }
  0x1a   : > { %1271 = dma.done.wait (%p1343_p4), [#allocation3], 16  }
  0x1b   : > { %1273 = vsyncadd (%p1343_p4), [#allocation3], 4294967280 }
  0x1c   : > { %234 = sfence }
  0x1d   : > { %s289_s30 = sld [smem:[#allocation2]]  ;;  %vm512_vm0 = vcmask 326656   ;;  %v1367_v1 = vld [vmem:[%s1698_s2] sm:$0xff]  ;;  %v1374_v2 = vld [vmem:[%s1698_s2 + $0x28] sm:$0xff]  ;;  %v336_v5 = vld [vmem:[%s1699_s3 + $0x10] sm:$0xff]  ;;  %v1287_v8 = vmov 0  }
  0x1e   : > { %s1066_s6 = sld [smem:[#allocation2 + $0x1]]  ;;  %1143 = vmatprep.mubr.msk.f32.mxu0 %vm512_vm0, %v1367_v1  ;;  %1153 = vmatprep.mubr.msk.f32.mxu1 %vm512_vm0, %v1374_v2  ;;  %v334_v6 = vld [vmem:[%s1699_s3] sm:$0xff]  ;;  %v337_v7 = vld [vmem:[%s1699_s3 + $0x18] sm:$0xff]  ;;  %v335_v11 = vld [vmem:[%s1699_s3 + $0x8] sm:$0xff]  ;;  %p264_p2 = scmp.lt.s32.totalorder %s1276_s18, 0 }
  0x1f   : > { %1240 = vset.pattern.permute.xlu1 %v1287_v8  ;;  %1239 = vset.pattern.permute.xlu0 %v1287_v8  ;;  %v339_v14 = vld [vmem:[%s1699_s3 + $0x28] sm:$0xff]  ;;  %v338_v15 = vld [vmem:[%s1699_s3 + $0x20] sm:$0xff]  ;;  %v341_v18 = vld [vmem:[%s1699_s3 + $0x38] sm:$0xff]  ;;  %p275_p4 = scmp.lt.s32.totalorder %s1276_s18, 1 }
  0x20   : > { %v340_v19 = vld [vmem:[%s1699_s3 + $0x30] sm:$0xff]  ;;  %s265_s9 = scalar_select %p264_p2, %s1276_s18, 0  ;;  %v343_v22 = vld [vmem:[%s1699_s3 + $0x48] sm:$0xff]  ;;  %v342_v23 = vld [vmem:[%s1699_s3 + $0x40] sm:$0xff] }
  0x21   : > { %s1711_s18 = smov (!%p275_p4, %s1276_s18), 1 }
  0x22   : > { %s1062_s14 = sshll.u32 %s265_s9, 5 }
  0x23   : > { %v1378_v4 = vstv %s289_s30  ;;  %p267_p3 = scmp.lt.s32.totalorder %s1062_s14, 31 }
  0x24   : > { %s1360_s7 = ssub.f32 %s1066_s6, %s289_s30  ;;  %v788_v9 = vmul.f32 %v1378_v4, %v336_v5  ;;  %v786_v10 = vmul.f32 %v1378_v4, %v334_v6  ;;  %v789_v12 = vmul.f32 %v1378_v4, %v337_v7  ;;  %v787_v13 = vmul.f32 %v1378_v4, %v335_v11 }
  0x25   : > { %v791_v16 = vmul.f32 %v1378_v4, %v339_v14  ;;  %v790_v17 = vmul.f32 %v1378_v4, %v338_v15  ;;  %v793_v20 = vmul.f32 %v1378_v4, %v341_v18  ;;  %v792_v21 = vmul.f32 %v1378_v4, %v340_v19  ;;  %s1709_s14 = smov (!%p267_p3, %s1062_s14), 31 }
  0x26   : > { %p344_p1 = scmp.gt.f32.partialorder %s1360_s7, 0.0  ;;  %808 = vperm.xlu1 %1240, %v788_v9   ;;  %798 = vperm.xlu0 %1239, %v786_v10   ;;  %v795_v24 = vmul.f32 %v1378_v4, %v343_v22  ;;  %v794_v25 = vmul.f32 %v1378_v4, %v342_v23  ;;  %s1063_s15 = sshll.u32 %s1709_s14, 3 }
  0x27   : > { %s1425_s21 = scalar_lea.vmem %s1697_s1, %s1063_s15  ;;  %s764_s17 = smul.f32 0.003921569, %s1360_s7 }
  0x28   : > { %s345_s8 = scalar_select %p344_p1, %s1360_s7, 1.0  ;;  %v323_v26 = vld [vmem:[%s1425_s21 + $0xf8] sm:$0xff]  ;;  %v322_v28 = vld [vmem:[%s1425_s21 + $0xf0] sm:$0xff]  ;;  %v321_v30 = vld [vmem:[%s1425_s21 + $0xe8] sm:$0xff] }
  0x29   : > { %v307_v27 = vld [vmem:[%s1425_s21 + $0x78] sm:$0xff]  ;;  %v306_v29 = vld [vmem:[%s1425_s21 + $0x70] sm:$0xff]  ;;  %v382_v31 = vsub.f32 %v323_v26, %v1378_v4  ;;  %v381_v33 = vsub.f32 %v322_v28, %v1378_v4  ;;  %v305_v35 = vld [vmem:[%s1425_s21 + $0x68] sm:$0xff]  ;;  %v380_v37 = vsub.f32 %v321_v30, %v1378_v4  ;;  %s1064_s7 = sshll.u32 %s1711_s18, 3 }
  0x2a   : > { %v346_v0 = vstv %s345_s8  ;;  %813 = vperm.xlu1 %1240, %v789_v12   ;;  %803 = vperm.xlu0 %1239, %v787_v13   ;;  %v366_v32 = vsub.f32 %v307_v27, %v1378_v4  ;;  %v365_v34 = vsub.f32 %v306_v29, %v1378_v4  ;;  %v320_v36 = vld [vmem:[%s1425_s21 + $0xe0] sm:$0xff]  ;;  %v364_v39 = vsub.f32 %v305_v35, %v1378_v4  ;;  %v319_v46 = vld [vmem:[%s1425_s21 + $0xd8] sm:$0xff]  ;;  %v318_v61 = vld [vmem:[%s1425_s21 + $0xd0] sm:$0xff]  ;;  %s278_s25 = scalar_lea.vmem %s1700_s4, %s1064_s7  ;;  %s282_s29 = scalar_lea.vmem %s1701_s5, %s1064_s7 }
  0x2b   : > { %1241 = vrcp.f32 %v346_v0  ;;  %v379_v40 = vsub.f32 %v320_v36, %v1378_v4  ;;  %v304_v41 = vld [vmem:[%s1425_s21 + $0x60] sm:$0xff]  ;;  %v378_v55 = vsub.f32 %v319_v46, %v1378_v4  ;;  %v303_v56 = vld [vmem:[%s1425_s21 + $0x58] sm:$0xff]  ;;  %v377_v7 = vsub.f32 %v318_v61, %v1378_v4  ;;  %v302_v8 = vld [vmem:[%s1425_s21 + $0x50] sm:$0xff] }
  0x2c   : > { %v363_v51 = vsub.f32 %v304_v41, %v1378_v4  ;;  %v362_v0 = vsub.f32 %v303_v56, %v1378_v4  ;;  %v317_v9 = vld [vmem:[%s1425_s21 + $0xc8] sm:$0xff]  ;;  %v361_v14 = vsub.f32 %v302_v8, %v1378_v4  ;;  %v314_v46 = vld [vmem:[%s1425_s21 + $0xb0] sm:$0xff] }
  0x2d   : > { %v376_v15 = vsub.f32 %v317_v9, %v1378_v4  ;;  %v297_v8 = vld [vmem:[%s1425_s21 + $0x28] sm:$0xff]  ;;  %v312_v9 = vld [vmem:[%s1425_s21 + $0xa0] sm:$0xff] }
  0x2e   : > { %823 = vperm.xlu1 %1240, %v791_v16   ;;  %818 = vperm.xlu0 %1239, %v790_v17  }
  0x32   : > { %833 = vperm.xlu1 %1240, %v793_v20   ;;  %828 = vperm.xlu0 %1239, %v792_v21   ;;  %v301_v20 = vld [vmem:[%s1425_s21 + $0x48] sm:$0xff]  ;;  %v316_v21 = vld [vmem:[%s1425_s21 + $0xc0] sm:$0xff] }
  0x33   : > { %v360_v26 = vsub.f32 %v301_v20, %v1378_v4  ;;  %v375_v27 = vsub.f32 %v316_v21, %v1378_v4  ;;  %v296_v20 = vld [vmem:[%s1425_s21 + $0x20] sm:$0xff]  ;;  %v311_v21 = vld [vmem:[%s1425_s21 + $0x98] sm:$0xff] }
  0x36   : > { %843 = vperm.xlu1 %1240, %v795_v24   ;;  %838 = vperm.xlu0 %1239, %v794_v25  }
  0x38   : > { %v1242_v3 = vpop.eup %1241 }
  0x39   : > { %1195 = vpush %v1242_v3 }
  0x6a   : > { %s1196_s23 = spop %1195 }
  0x6b   : > { %s349_s24 = smul.f32 255.0, %s1196_s23 }
  0x6d   : > { %v1439_v38 = vstv %s349_s24 }
  0x6e   : > { %v415_v42 = vmul.f32 %v1439_v38, %v382_v31  ;;  %v399_v43 = vmul.f32 %v1439_v38, %v366_v32  ;;  %v414_v44 = vmul.f32 %v1439_v38, %v381_v33  ;;  %v398_v45 = vmul.f32 %v1439_v38, %v365_v34  ;;  %v300_v32 = vld [vmem:[%s1425_s21 + $0x40] sm:$0xff]  ;;  %v315_v33 = vld [vmem:[%s1425_s21 + $0xb8] sm:$0xff] }
  0x6f   : > { %v413_v47 = vmul.f32 %v1439_v38, %v380_v37  ;;  %v397_v53 = vmul.f32 %v1439_v38, %v364_v39  ;;  %v412_v54 = vmul.f32 %v1439_v38, %v379_v40  ;;  %v396_v6 = vmul.f32 %v1439_v38, %v363_v51 }
  0x70   : > { %v447_v48 = vfloor.f32 %v415_v42  ;;  %v431_v49 = vfloor.f32 %v399_v43  ;;  %v446_v50 = vfloor.f32 %v414_v44  ;;  %v430_v52 = vfloor.f32 %v398_v45  ;;  %v299_v45 = vld [vmem:[%s1425_s21 + $0x38] sm:$0xff] }
  0x71   : > { %v445_v60 = vfloor.f32 %v413_v47  ;;  %v429_v5 = vfloor.f32 %v397_v53  ;;  %v444_v12 = vfloor.f32 %v412_v54  ;;  %v411_v13 = vmul.f32 %v1439_v38, %v378_v55 }
  0x72   : > { %v479_v57 = vmax.f32 %v447_v48, 0.0  ;;  %v463_v58 = vmax.f32 %v431_v49, 0.0  ;;  %v478_v59 = vmax.f32 %v446_v50, 0.0  ;;  %v462_v3 = vmax.f32 %v430_v52, 0.0 }
  0x73   : > { %v477_v11 = vmax.f32 %v445_v60, 0.0  ;;  %v461_v17 = vmax.f32 %v429_v5, 0.0  ;;  %v428_v18 = vfloor.f32 %v396_v6  ;;  %v395_v19 = vmul.f32 %v1439_v38, %v362_v0 }
  0x74   : > { %v511_v62 = vmin.f32 %v479_v57, 255.0  ;;  %v495_v63 = vmin.f32 %v463_v58, 255.0  ;;  %v510_v10 = vmin.f32 %v478_v59, 255.0  ;;  %v494_v16 = vmin.f32 %v462_v3, 255.0  ;;  %v298_v57 = vld [vmem:[%s1425_s21 + $0x30] sm:$0xff]  ;;  %v313_v58 = vld [vmem:[%s1425_s21 + $0xa8] sm:$0xff] }
  0x75   : > { %v509_v22 = vmin.f32 %v477_v11, 255.0  ;;  %v476_v23 = vmax.f32 %v444_v12, 0.0  ;;  %v443_v24 = vfloor.f32 %v411_v13  ;;  %v410_v25 = vmul.f32 %v1439_v38, %v377_v7 }
  0x76   : > { %1111 = vmatprep.subr.msk.mxu0 %vm512_vm0, %v511_v62  ;;  %1163 = vmatprep.subr.msk.mxu1 %vm512_vm0, %v511_v62  ;;  %v493_v28 = vmin.f32 %v461_v17, 255.0  ;;  %v460_v29 = vmax.f32 %v428_v18, 0.0  ;;  %v427_v30 = vfloor.f32 %v395_v19  ;;  %v394_v31 = vmul.f32 %v1439_v38, %v361_v14 }
  0x77   : > { %1112 = vmatpush3.xpose.msk.msra.mxu0 %vm512_vm0, %v495_v63  ;;  %1179 = vmatpush3.xpose.msk.msra.mxu1 %vm512_vm0, %v495_v63  ;;  %v508_v34 = vmin.f32 %v476_v23, 255.0  ;;  %v475_v35 = vmax.f32 %v443_v24, 0.0  ;;  %v442_v36 = vfloor.f32 %v410_v25  ;;  %v409_v37 = vmul.f32 %v1439_v38, %v376_v15 }
  0x78   : > { %1113 = vmatprep.subr.msk.mxu0 %vm512_vm0, %v510_v10  ;;  %1164 = vmatprep.subr.msk.mxu1 %vm512_vm0, %v510_v10  ;;  %v359_v39 = vsub.f32 %v300_v32, %v1378_v4  ;;  %v374_v40 = vsub.f32 %v315_v33, %v1378_v4  ;;  %v492_v41 = vmin.f32 %v460_v29, 255.0  ;;  %v459_v42 = vmax.f32 %v427_v30, 0.0  ;;  %v295_v32 = vld [vmem:[%s1425_s21 + $0x18] sm:$0xff]  ;;  %v310_v33 = vld [vmem:[%s1425_s21 + $0x90] sm:$0xff] }
  0x79   : > { %v426_v43 = vfloor.f32 %v394_v31  ;;  %v393_v44 = vmul.f32 %v1439_v38, %v360_v26  ;;  %v507_v47 = vmin.f32 %v475_v35, 255.0  ;;  %v474_v48 = vmax.f32 %v442_v36, 0.0 }
  0x7a   : > { %v441_v49 = vfloor.f32 %v409_v37  ;;  %v408_v50 = vmul.f32 %v1439_v38, %v375_v27  ;;  %v358_v51 = vsub.f32 %v299_v45, %v1378_v4  ;;  %v373_v52 = vsub.f32 %v314_v46, %v1378_v4  ;;  %v294_v45 = vld [vmem:[%s1425_s21 + $0x10] sm:$0xff]  ;;  %v309_v46 = vld [vmem:[%s1425_s21 + $0x88] sm:$0xff] }
  0x7b   : > { %1114 = vmatpush3.xpose.msk.msra.mxu0 %vm512_vm0, %v494_v16  ;;  %1180 = vmatpush3.xpose.msk.msra.mxu1 %vm512_vm0, %v494_v16  ;;  %v491_v53 = vmin.f32 %v459_v42, 255.0  ;;  %v458_v54 = vmax.f32 %v426_v43, 0.0  ;;  %v425_v55 = vfloor.f32 %v393_v44  ;;  %v392_v56 = vmul.f32 %v1439_v38, %v359_v39 }
  0x7c   : > { %1115 = vmatprep.subr.msk.mxu0 %vm512_vm0, %v509_v22  ;;  %1165 = vmatprep.subr.msk.mxu1 %vm512_vm0, %v509_v22  ;;  %v506_v59 = vmin.f32 %v474_v48, 255.0  ;;  %v473_v60 = vmax.f32 %v441_v49, 0.0  ;;  %v440_v61 = vfloor.f32 %v408_v50  ;;  %v407_v62 = vmul.f32 %v1439_v38, %v374_v40 }
  0x7d   : > { %v357_v63 = vsub.f32 %v298_v57, %v1378_v4  ;;  %v372_v0 = vsub.f32 %v313_v58, %v1378_v4  ;;  %v490_v3 = vmin.f32 %v458_v54, 255.0  ;;  %v457_v5 = vmax.f32 %v425_v55, 0.0  ;;  %v293_v57 = vld [vmem:[%s1425_s21 + $0x8] sm:$0xff]  ;;  %v308_v58 = vld [vmem:[%s1425_s21 + $0x80] sm:$0xff] }
  0x7e   : > { %v424_v6 = vfloor.f32 %v392_v56  ;;  %v391_v7 = vmul.f32 %v1439_v38, %v358_v51  ;;  %v505_v10 = vmin.f32 %v473_v60, 255.0  ;;  %v472_v11 = vmax.f32 %v440_v61, 0.0 }
  0x7f   : > { %1116 = vmatpush3.xpose.msk.msra.mxu0 %vm512_vm0, %v493_v28  ;;  %1181 = vmatpush3.xpose.msk.msra.mxu1 %vm512_vm0, %v493_v28  ;;  %v439_v12 = vfloor.f32 %v407_v62  ;;  %v406_v13 = vmul.f32 %v1439_v38, %v373_v52  ;;  %v356_v14 = vsub.f32 %v297_v8, %v1378_v4  ;;  %v371_v15 = vsub.f32 %v312_v9, %v1378_v4  ;;  %v292_v8 = vld [vmem:[%s1425_s21] sm:$0xff] }
  0x80   : > { %1117 = vmatprep.subr.msk.mxu0 %vm512_vm0, %v508_v34  ;;  %1166 = vmatprep.subr.msk.mxu1 %vm512_vm0, %v508_v34  ;;  %v489_v16 = vmin.f32 %v457_v5, 255.0  ;;  %v456_v17 = vmax.f32 %v424_v6, 0.0  ;;  %v423_v18 = vfloor.f32 %v391_v7  ;;  %v390_v19 = vmul.f32 %v1439_v38, %v357_v63 }
  0x81   : > { %v504_v22 = vmin.f32 %v472_v11, 255.0  ;;  %v471_v23 = vmax.f32 %v439_v12, 0.0  ;;  %v438_v24 = vfloor.f32 %v406_v13  ;;  %v405_v25 = vmul.f32 %v1439_v38, %v372_v0 }
  0x82   : > { %v355_v26 = vsub.f32 %v296_v20, %v1378_v4  ;;  %v370_v27 = vsub.f32 %v311_v21, %v1378_v4  ;;  %v488_v28 = vmin.f32 %v456_v17, 255.0  ;;  %v455_v29 = vmax.f32 %v423_v18, 0.0 }
  0x83   : > { %1118 = vmatpush3.xpose.msk.msra.mxu0 %vm512_vm0, %v492_v41  ;;  %1182 = vmatpush3.xpose.msk.msra.mxu1 %vm512_vm0, %v492_v41  ;;  %v422_v30 = vfloor.f32 %v390_v19  ;;  %v389_v31 = vmul.f32 %v1439_v38, %v356_v14  ;;  %v503_v34 = vmin.f32 %v471_v23, 255.0  ;;  %v470_v35 = vmax.f32 %v438_v24, 0.0 }
  0x84   : > { %1119 = vmatprep.subr.msk.mxu0 %vm512_vm0, %v507_v47  ;;  %1167 = vmatprep.subr.msk.mxu1 %vm512_vm0, %v507_v47  ;;  %v437_v36 = vfloor.f32 %v405_v25  ;;  %v404_v37 = vmul.f32 %v1439_v38, %v371_v15  ;;  %v354_v39 = vsub.f32 %v295_v32, %v1378_v4  ;;  %v369_v40 = vsub.f32 %v310_v33, %v1378_v4 }
  0x85   : > { %v487_v41 = vmin.f32 %v455_v29, 255.0  ;;  %v454_v42 = vmax.f32 %v422_v30, 0.0  ;;  %v421_v43 = vfloor.f32 %v389_v31  ;;  %v388_v44 = vmul.f32 %v1439_v38, %v355_v26 }
  0x86   : > { %v502_v47 = vmin.f32 %v470_v35, 255.0  ;;  %v469_v48 = vmax.f32 %v437_v36, 0.0  ;;  %v436_v49 = vfloor.f32 %v404_v37  ;;  %v403_v50 = vmul.f32 %v1439_v38, %v370_v27  ;;  %v325_v36 = vld [vmem:[%s1698_s2 + $0x8] sm:$0xff]  ;;  %v330_v37 = vld [vmem:[%s1698_s2 + $0x30] sm:$0xff] }
  0x87   : > { %1120 = vmatpush3.xpose.msk.msra.mxu0 %vm512_vm0, %v491_v53  ;;  %1183 = vmatpush3.xpose.msk.msra.mxu1 %vm512_vm0, %v491_v53  ;;  %v353_v51 = vsub.f32 %v294_v45, %v1378_v4  ;;  %v368_v52 = vsub.f32 %v309_v46, %v1378_v4  ;;  %v486_v53 = vmin.f32 %v454_v42, 255.0  ;;  %v453_v54 = vmax.f32 %v421_v43, 0.0  ;;  %v333_v42 = vld [vmem:[%s1698_s2 + $0x48] sm:$0xff] }
  0x88   : > { %1121 = vmatprep.subr.msk.mxu0 %vm512_vm0, %v506_v59  ;;  %1168 = vmatprep.subr.msk.mxu1 %vm512_vm0, %v506_v59  ;;  %v420_v55 = vfloor.f32 %v388_v44  ;;  %v387_v56 = vmul.f32 %v1439_v38, %v354_v39  ;;  %v501_v59 = vmin.f32 %v469_v48, 255.0  ;;  %v468_v60 = vmax.f32 %v436_v49, 0.0  ;;  %v326_v39 = vld [vmem:[%s1698_s2 + $0x10] sm:$0xff] }
  0x89   : > { %v435_v61 = vfloor.f32 %v403_v50  ;;  %v402_v62 = vmul.f32 %v1439_v38, %v369_v40  ;;  %v352_v63 = vsub.f32 %v293_v57, %v1378_v4  ;;  %v367_v0 = vsub.f32 %v308_v58, %v1378_v4  ;;  %v331_v40 = vld [vmem:[%s1698_s2 + $0x38] sm:$0xff] }
  0x8a   : > { %v452_v5 = vmax.f32 %v420_v55, 0.0  ;;  %v419_v6 = vfloor.f32 %v387_v56  ;;  %v386_v7 = vmul.f32 %v1439_v38, %v353_v51  ;;  %v500_v9 = vmin.f32 %v468_v60, 255.0 }
  0x8b   : > { %1122 = vmatpush3.xpose.msk.msra.mxu0 %vm512_vm0, %v490_v3  ;;  %1184 = vmatpush3.xpose.msk.msra.mxu1 %vm512_vm0, %v490_v3  ;;  %v485_v3 = vmin.f32 %v453_v54, 255.0  ;;  %v434_v11 = vfloor.f32 %v402_v62  ;;  %v401_v12 = vmul.f32 %v1439_v38, %v368_v52  ;;  %v351_v13 = vsub.f32 %v292_v8, %v1378_v4 }
  0x8c   : > { %1123 = vmatprep.subr.msk.mxu0 %vm512_vm0, %v505_v10  ;;  %1169 = vmatprep.subr.msk.mxu1 %vm512_vm0, %v505_v10  ;;  %v467_v10 = vmax.f32 %v435_v61, 0.0  ;;  %v484_v14 = vmin.f32 %v452_v5, 255.0  ;;  %v451_v15 = vmax.f32 %v419_v6, 0.0  ;;  %v385_v17 = vmul.f32 %v1439_v38, %v352_v63 }
  0x8d   : > { %v466_v19 = vmax.f32 %v434_v11, 0.0  ;;  %v433_v20 = vfloor.f32 %v401_v12  ;;  %v400_v21 = vmul.f32 %v1439_v38, %v367_v0  ;;  %v384_v24 = vmul.f32 %v1439_v38, %v351_v13 }
  0x8e   : > { %v499_v18 = vmin.f32 %v467_v10, 255.0  ;;  %v417_v23 = vfloor.f32 %v385_v17  ;;  %v1634_v46 = vstv %s764_s17 }
  0x8f   : > { %1124 = vmatpush3.xpose.msk.msra.mxu0 %vm512_vm0, %v489_v16  ;;  %1185 = vmatpush3.xpose.msk.msra.mxu1 %vm512_vm0, %v489_v16  ;;  %v418_v16 = vfloor.f32 %v386_v7  ;;  %v498_v25 = vmin.f32 %v466_v19, 255.0  ;;  %v465_v26 = vmax.f32 %v433_v20, 0.0  ;;  %v432_v27 = vfloor.f32 %v400_v21 }
  0x90   : > { %1125 = vmatprep.subr.msk.mxu0 %vm512_vm0, %v504_v22  ;;  %1170 = vmatprep.subr.msk.mxu1 %vm512_vm0, %v504_v22  ;;  %v483_v22 = vmin.f32 %v451_v15, 255.0  ;;  %v449_v29 = vmax.f32 %v417_v23, 0.0  ;;  %v416_v30 = vfloor.f32 %v384_v24 }
  0x91   : > { %v450_v4 = vmax.f32 %v418_v16, 0.0  ;;  %v497_v31 = vmin.f32 %v465_v26, 255.0  ;;  %v464_v32 = vmax.f32 %v432_v27, 0.0 }
  0x92   : > { %v481_v38 = vmin.f32 %v449_v29, 255.0  ;;  %v448_v33 = vmax.f32 %v416_v30, 0.0 }
  0x93   : > { %1126 = vmatpush3.xpose.msk.msra.mxu0 %vm512_vm0, %v488_v28  ;;  %1186 = vmatpush3.xpose.msk.msra.mxu1 %vm512_vm0, %v488_v28  ;;  %v482_v28 = vmin.f32 %v450_v4, 255.0 }
  0x94   : > { %1127 = vmatprep.subr.msk.mxu0 %vm512_vm0, %v503_v34  ;;  %1171 = vmatprep.subr.msk.mxu1 %vm512_vm0, %v503_v34  ;;  %v496_v34 = vmin.f32 %v464_v32, 255.0  ;;  %v480_v35 = vmin.f32 %v448_v33, 255.0 }
  0x97   : > { %1128 = vmatpush3.xpose.msk.msra.mxu0 %vm512_vm0, %v487_v41  ;;  %1187 = vmatpush3.xpose.msk.msra.mxu1 %vm512_vm0, %v487_v41  ;;  %v328_v41 = vld [vmem:[%s1698_s2 + $0x20] sm:$0xff] }
  0x98   : > { %1129 = vmatprep.subr.msk.mxu0 %vm512_vm0, %v502_v47  ;;  %1172 = vmatprep.subr.msk.mxu1 %vm512_vm0, %v502_v47 }
  0x9b   : > { %1130 = vmatpush3.xpose.msk.msra.mxu0 %vm512_vm0, %v486_v53  ;;  %1188 = vmatpush3.xpose.msk.msra.mxu1 %vm512_vm0, %v486_v53 }
  0x9c   : > { %1131 = vmatprep.subr.msk.mxu0 %vm512_vm0, %v501_v59  ;;  %1173 = vmatprep.subr.msk.mxu1 %vm512_vm0, %v501_v59 }
  0x9f   : > { %1132 = vmatpush3.xpose.msk.msra.mxu0 %vm512_vm0, %v485_v3  ;;  %1189 = vmatpush3.xpose.msk.msra.mxu1 %vm512_vm0, %v485_v3 }
  0xa0   : > { %1133 = vmatprep.subr.msk.mxu0 %vm512_vm0, %v500_v9  ;;  %1174 = vmatprep.subr.msk.mxu1 %vm512_vm0, %v500_v9 }
  0xa1   : > { %v799_v43 = vpop.permute.xlu0 %798  ;;  %v809_v44 = vpop.permute.xlu1 %808 }
  0xa3   : > { %1134 = vmatpush3.xpose.msk.msra.mxu0 %vm512_vm0, %v484_v14  ;;  %1190 = vmatpush3.xpose.msk.msra.mxu1 %vm512_vm0, %v484_v14 }
  0xa4   : > { %1135 = vmatprep.subr.msk.mxu0 %vm512_vm0, %v499_v18  ;;  %1175 = vmatprep.subr.msk.mxu1 %vm512_vm0, %v499_v18 }
  0xa5   : > { %v804_v45 = vpop.permute.xlu0 %803  ;;  %v1636_v47 = vpop.permute.xlu1 %813 }
  0xa7   : > { %1136 = vmatpush3.xpose.msk.msra.mxu0 %vm512_vm0, %v483_v22  ;;  %1191 = vmatpush3.xpose.msk.msra.mxu1 %vm512_vm0, %v483_v22 }
  0xa8   : > { %1137 = vmatprep.subr.msk.mxu0 %vm512_vm0, %v498_v25  ;;  %1176 = vmatprep.subr.msk.mxu1 %vm512_vm0, %v498_v25 }
  0xa9   : > { %v1639_v53 = vpop.permute.xlu0 %818  ;;  %v824_v56 = vpop.permute.xlu1 %823 }
  0xab   : > { %1138 = vmatpush3.xpose.msk.msra.mxu0 %vm512_vm0, %v482_v28  ;;  %1192 = vmatpush3.xpose.msk.msra.mxu1 %vm512_vm0, %v482_v28 }
  0xac   : > { %1139 = vmatprep.subr.msk.mxu0 %vm512_vm0, %v497_v31  ;;  %1177 = vmatprep.subr.msk.mxu1 %vm512_vm0, %v497_v31 }
  0xad   : > { %v829_v10 = vpop.permute.xlu0 %828  ;;  %v834_v17 = vpop.permute.xlu1 %833 }
  0xaf   : > { %1140 = vmatpush3.xpose.msk.msra.mxu0 %vm512_vm0, %v481_v38  ;;  %1193 = vmatpush3.xpose.msk.msra.mxu1 %vm512_vm0, %v481_v38 }
  0xb0   : > { %1141 = vmatprep.subr.msk.mxu0 %vm512_vm0, %v496_v34  ;;  %1178 = vmatprep.subr.msk.mxu1 %vm512_vm0, %v496_v34 }
  0xb3   : > { %1142 = vmatpush3.xpose.msk.msra.mxu0 %vm512_vm0, %v480_v35  ;;  %1194 = vmatpush3.xpose.msk.msra.mxu1 %vm512_vm0, %v480_v35 }
  0xb6   : > { %1144 = vmatmul.mubr.msk.f32.vlgmr.msra.gmra.mxu0 %vm512_vm0, %v1367_v1  ;;  %1154 = vmatmul.mubr.msk.f32.vlgmr.msra.gmra.mxu1 %vm512_vm0, %v1374_v2  ;;  %v327_v1 = vld [vmem:[%s1698_s2 + $0x18] sm:$0xff]  ;;  %v332_v2 = vld [vmem:[%s1698_s2 + $0x40] sm:$0xff] }
  0xb7   : > { %1145 = vmatprep.mubr.msk.f32.mxu0 %vm512_vm0, %v325_v36  ;;  %1155 = vmatprep.mubr.msk.f32.mxu1 %vm512_vm0, %v330_v37 }
  0xba   : > { %1146 = vmatmul.mubr.msk.f32.gmra.mxu0 %vm512_vm0, %v325_v36  ;;  %1156 = vmatmul.mubr.msk.f32.gmra.mxu1 %vm512_vm0, %v330_v37 }
  0xbb   : > { %1147 = vmatprep.mubr.msk.f32.mxu0 %vm512_vm0, %v326_v39  ;;  %1157 = vmatprep.mubr.msk.f32.mxu1 %vm512_vm0, %v331_v40 }
  0xbe   : > { %1148 = vmatmul.mubr.msk.f32.gmra.mxu0 %vm512_vm0, %v326_v39  ;;  %1158 = vmatmul.mubr.msk.f32.gmra.mxu1 %vm512_vm0, %v331_v40 }
  0xbf   : > { %1149 = vmatprep.mubr.msk.f32.mxu0 %vm512_vm0, %v327_v1  ;;  %1159 = vmatprep.mubr.msk.f32.mxu1 %vm512_vm0, %v332_v2 }
  0xc2   : > { %1150 = vmatmul.mubr.msk.f32.gmra.mxu0 %vm512_vm0, %v327_v1  ;;  %1160 = vmatmul.mubr.msk.f32.gmra.mxu1 %vm512_vm0, %v332_v2 }
  0xc3   : > { %1151 = vmatprep.mubr.msk.f32.mxu0 %vm512_vm0, %v328_v41  ;;  %1161 = vmatprep.mubr.msk.f32.mxu1 %vm512_vm0, %v333_v42 }
  0xc6   : > { %1152 = vmatmul.mubr.msk.f32.gmra.mxu0 %vm512_vm0, %v328_v41  ;;  %1162 = vmatmul.mubr.msk.f32.gmra.mxu1 %vm512_vm0, %v333_v42 }
 0x176   : > { %v705_v48 = vpop.f32.mrf.mxu0  ;;  %v735_v49 = vpop.f32.mrf.mxu1 }
 0x177   : > { %v766_v50 = vmul.f32 %v1634_v46, %v705_v48  ;;  %v776_v57 = vmul.f32 %v1634_v46, %v735_v49 }
 0x178   : > { %v707_v51 = vpop.f32.mrf.mxu0  ;;  %v737_v52 = vpop.f32.mrf.mxu1 }
 0x179   : > { %v767_v58 = vmul.f32 %v1634_v46, %v707_v51  ;;  %v846_v59 = vadd.f32 %v799_v43, %v766_v50  ;;  %v777_v60 = vmul.f32 %v1634_v46, %v737_v52  ;;  %v1648_v8 = vadd.f32 %v824_v56, %v776_v57 }
 0x17a   : > { %v711_v54 = vpop.f32.mrf.mxu0  ;;  %v741_v55 = vpop.f32.mrf.mxu1 }
 0x17b   : > { %v768_v63 = vmul.f32 %v1634_v46, %v711_v54  ;;  %v778_v0 = vmul.f32 %v1634_v46, %v741_v55  ;;  %v847_v9 = vadd.f32 %v799_v43, %v767_v58  ;;  %v866_v13 = vmax.f32 %v846_v59, 0.0 }
 0x17c   : > { %v713_v61 = vpop.f32.mrf.mxu0  ;;  %v743_v62 = vpop.f32.mrf.mxu1  ;;  %v1652_v14 = vadd.f32 %v824_v56, %v777_v60  ;;  %v876_v27 = vmax.f32 %v1648_v8, 0.0 }
 0x17d   : > { %v769_v3 = vmul.f32 %v1634_v46, %v713_v61  ;;  %v779_v5 = vmul.f32 %v1634_v46, %v743_v62  ;;  %v848_v18 = vadd.f32 %v804_v45, %v768_v63  ;;  %v1654_v19 = vadd.f32 %v829_v10, %v778_v0 }
 0x17e   : > { %v717_v6 = vpop.f32.mrf.mxu0  ;;  %v747_v7 = vpop.f32.mrf.mxu1  ;;  %v867_v28 = vmax.f32 %v847_v9, 0.0  ;;  %v877_v31 = vmax.f32 %v1652_v14, 0.0 }
 0x17f   : > { %v770_v11 = vmul.f32 %v1634_v46, %v717_v6  ;;  %v780_v12 = vmul.f32 %v1634_v46, %v747_v7  ;;  %v849_v20 = vadd.f32 %v804_v45, %v769_v3  ;;  %v1656_v22 = vadd.f32 %v829_v10, %v779_v5  ;;  %v839_v45 = vpop.permute.xlu0 %838  ;;  %v844_v6 = vpop.permute.xlu1 %843 }
 0x180   : > { %v719_v15 = vpop.f32.mrf.mxu0  ;;  %v749_v16 = vpop.f32.mrf.mxu1  ;;  %v868_v36 = vmax.f32 %v848_v18, 0.0  ;;  %v878_v37 = vmax.f32 %v1654_v19, 0.0 }
 0x181   : > { %v850_v21 = vadd.f32 %v809_v44, %v770_v11  ;;  %v1658_v4 = vadd.f32 %v834_v17, %v780_v12  ;;  %v771_v23 = vmul.f32 %v1634_v46, %v719_v15  ;;  %v781_v24 = vmul.f32 %v1634_v46, %v749_v16 }
 0x182   : > { %v723_v25 = vpop.f32.mrf.mxu0  ;;  %v753_v26 = vpop.f32.mrf.mxu1  ;;  %v869_v39 = vmax.f32 %v849_v20, 0.0  ;;  %v879_v1 = vmax.f32 %v1656_v22, 0.0 }
 0x183   : > { %v870_v29 = vmax.f32 %v850_v21, 0.0  ;;  %v772_v30 = vmul.f32 %v1634_v46, %v723_v25  ;;  %v851_v32 = vadd.f32 %v809_v44, %v771_v23  ;;  %v861_v38 = vadd.f32 %v834_v17, %v781_v24 }
 0x184   : > { %v782_v33 = vmul.f32 %v1634_v46, %v753_v26  ;;  %v725_v34 = vpop.f32.mrf.mxu0  ;;  %v755_v35 = vpop.f32.mrf.mxu1  ;;  %v880_v2 = vmax.f32 %v1658_v4, 0.0 }
 0x185   : > { %v852_v40 = vadd.f32 %v1636_v47, %v772_v30  ;;  %v871_v41 = vmax.f32 %v851_v32, 0.0  ;;  %v773_v42 = vmul.f32 %v1634_v46, %v725_v34  ;;  %v887_v48 = vmin.f32 %v866_v13, %v870_v29 }
 0x186   : > { %v729_v43 = vpop.f32.mrf.mxu0  ;;  %v759_v44 = vpop.f32.mrf.mxu1  ;;  %v919_v49 = vmax.f32 %v866_v13, %v870_v29  ;;  %v881_v52 = vmax.f32 %v861_v38, 0.0  ;;  %v862_v54 = vadd.f32 %v839_v45, %v782_v33  ;;  %v783_v56 = vmul.f32 %v1634_v46, %v755_v35 }
 0x187   : > { %v872_v50 = vmax.f32 %v852_v40, 0.0  ;;  %v774_v51 = vmul.f32 %v1634_v46, %v729_v43  ;;  %v853_v55 = vadd.f32 %v1636_v47, %v773_v42  ;;  %v784_v62 = vmul.f32 %v1634_v46, %v759_v44 }
 0x188   : > { %v731_v57 = vpop.f32.mrf.mxu0  ;;  %v761_v58 = vpop.f32.mrf.mxu1  ;;  %v888_v63 = vmin.f32 %v867_v28, %v871_v41  ;;  %v920_v7 = vmax.f32 %v867_v28, %v871_v41  ;;  %v863_v14 = vadd.f32 %v839_v45, %v783_v56  ;;  %v882_v28 = vmax.f32 %v862_v54, 0.0 }
 0x189   : > { %v889_v59 = vmin.f32 %v868_v36, %v872_v50  ;;  %v921_v60 = vmax.f32 %v868_v36, %v872_v50  ;;  %v854_v61 = vadd.f32 %v1639_v53, %v774_v51  ;;  %v873_v0 = vmax.f32 %v853_v55, 0.0 }
 0x18a   : > { %v775_v3 = vmul.f32 %v1634_v46, %v731_v57  ;;  %v785_v5 = vmul.f32 %v1634_v46, %v761_v58  ;;  %v864_v17 = vadd.f32 %v844_v6, %v784_v62  ;;  %v883_v29 = vmax.f32 %v863_v14, 0.0 }
 0x18b   : > { %v893_v8 = vmin.f32 %v889_v59, %v876_v27  ;;  %v925_v47 = vmax.f32 %v921_v60, %v876_v27  ;;  %v874_v9 = vmax.f32 %v854_v61, 0.0  ;;  %v890_v10 = vmin.f32 %v869_v39, %v873_v0 }
 0x18c   : > { %v922_v11 = vmax.f32 %v869_v39, %v873_v0  ;;  %v855_v12 = vadd.f32 %v1639_v53, %v775_v3  ;;  %v865_v13 = vadd.f32 %v844_v6, %v785_v5  ;;  %v884_v53 = vmax.f32 %v864_v17, 0.0 }
 0x18d   : > { %v891_v15 = vmin.f32 %v887_v48, %v874_v9  ;;  %v923_v16 = vmax.f32 %v919_v49, %v874_v9  ;;  %v894_v18 = vmin.f32 %v890_v10, %v877_v31  ;;  %v897_v20 = vmin.f32 %v893_v8, %v880_v2 }
 0x18e   : > { %v926_v19 = vmax.f32 %v922_v11, %v877_v31  ;;  %v875_v21 = vmax.f32 %v855_v12, 0.0  ;;  %v929_v4 = vmax.f32 %v925_v47, %v880_v2  ;;  %v885_v23 = vmax.f32 %v865_v13, 0.0 }
 0x18f   : > { %v895_v22 = vmin.f32 %v891_v15, %v878_v37  ;;  %v927_v46 = vmax.f32 %v923_v16, %v878_v37  ;;  %v898_v26 = vmin.f32 %v894_v18, %v881_v52  ;;  %v901_v34 = vmin.f32 %v897_v20, %v884_v53 }
 0x190   : > { %v892_v24 = vmin.f32 %v888_v63, %v875_v21  ;;  %v924_v25 = vmax.f32 %v920_v7, %v875_v21  ;;  %v930_v27 = vmax.f32 %v926_v19, %v881_v52  ;;  %v933_v35 = vmax.f32 %v929_v4, %v884_v53 }
 0x191   : > { %v902_v38 = vmin.f32 %v898_v26, %v885_v23  ;;  %v931_v31 = vmax.f32 %v927_v46, %v882_v28  ;;  %v899_v39 = vmin.f32 %v895_v22, %v882_v28 }
 0x192   : > { %v896_v30 = vmin.f32 %v892_v24, %v879_v1  ;;  %v928_v32 = vmax.f32 %v924_v25, %v879_v1  ;;  %v934_v33 = vmax.f32 %v930_v27, %v885_v23 }
 0x193   : > { %v904_v42 = vmin.f32 %v901_v34, %v902_v38 }
 0x194   : > { %v932_v36 = vmax.f32 %v928_v32, %v883_v29  ;;  %v900_v40 = vmin.f32 %v896_v30, %v883_v29  ;;  %v936_v2 = vmax.f32 %v933_v35, %v934_v33 }
 0x196   : > { %v935_v37 = vmax.f32 %v931_v31, %v932_v36  ;;  %v903_v41 = vmin.f32 %v899_v39, %v900_v40 }
 0x198   : > { %v937_v43 = vmax.f32 %v935_v37, %v936_v2  ;;  %v905_v44 = vmin.f32 %v903_v41, %v904_v42 }
 0x19a   : > { %938 = vmax.xlane.f32.xlu1 %v937_v43  ;;  %906 = vmin.xlane.f32.xlu0 %v905_v44 }
 0x223   : > { %v939_v45 = vpop.xlane.xlu1 %938  ;;  %v907_v48 = vpop.xlane.xlu0 %906 }
 0x224   : > { %v940_v1 = vrot.slane %v939_v45, 4  ;;  %v908_v49 = vrot.slane %v907_v48, 4 }
 0x226   : > { %v941_v50 = vmax.f32 %v939_v45, %v940_v1  ;;  %v909_v51 = vmin.f32 %v907_v48, %v908_v49 }
 0x228   : > { %v942_v52 = vrot.slane %v941_v50, 2  ;;  %v910_v54 = vrot.slane %v909_v51, 2 }
 0x22a   : > { %v943_v55 = vmax.f32 %v941_v50, %v942_v52  ;;  %v911_v56 = vmin.f32 %v909_v51, %v910_v54 }
 0x22c   : > { %v912_v57 = vrot.slane %v911_v56, 1  ;;  %v944_v58 = vrot.slane %v943_v55, 1 }
 0x22e   : > { %v913_v59 = vmin.f32 %v911_v56, %v912_v57  ;;  %v945_v60 = vmax.f32 %v943_v55, %v944_v58 }
 0x230   : > { %1197 = vpush %v913_v59 }
 0x231   : > { %1199 = vpush %v945_v60 }
 0x261   : > { %s1198_s21 = spop %1197 }
 0x262   : > { %v915_v61 = vstv %s1198_s21  ;;  %s1200_s26 = spop %1199 }
 0x263   : > { %v947_v62 = vstv %s1200_s26  ;;  %917 = vst [vmem:[%s278_s25] sm:$0xff] %v915_v61 }
 0x264   : > { %949 = vst [vmem:[%s282_s29] sm:$0xff] %v947_v62 }
 0x265 PF: > { %s17_s20 = sadd.s32 1, %s1284_s20   ;;  %s1704_s18 = smov %s1280_s19 }
 0x266   : > { %p14_p5 = scmp.ge.s32.totalorder %s17_s20, 4   ;;  %s1705_s19 = smov %s1707_s22 }
 0x268   :  { %16 = sbr.rel (!%p14_p5) target bundleno = 2 (0x2), region = 87 }
 0x26d   :  { %983 = vsyncpa [#allocation3], 1 }
 0x26e   :  { %985 = vsyncpa [#allocation3 + $0x1], 1 }

// kernel: reservoir_forward.11
= control target key start
LH: loop header
LB: loop body
LE: loop exit
PB: predicated region body
PF: predicated region fallthrough
CT: control target
= control target key end

     0   :  { %12 = vsyncpa [#allocation3], 0  ;;  %s1521_s0 = inlined_call_operand.vmem [shape: f32[4], index: 0, kind: input, shape index: {}]   ;;  %s1522_s1 = inlined_call_operand.vmem [shape: f32[256,40], index: 1, kind: input, shape index: {}]   ;;  %s1523_s2 = inlined_call_operand.vmem [shape: f32[1,256], index: 2, kind: input, shape index: {}]   ;;  %s1524_s3 = inlined_call_operand.vmem [shape: f32[80,40], index: 3, kind: input, shape index: {}]   ;;  %s1525_s4 = inlined_call_operand.vmem [shape: f32[80,1], index: 4, kind: input, shape index: {}]   ;;  %s1526_s5 = inlined_call_operand.vmem [shape: f32[16,80], index: 5, kind: input, shape index: {}]   ;;  %s1527_s6 = inlined_call_operand.vmem [shape: f32[16,1], index: 6, kind: input, shape index: {}]   ;;  %s1528_s7 = inlined_call_operand.vmem [shape: f32[8,256], index: 7, kind: output, shape index: {}]  }
   0x1   :  { %s19_s26 = sshll.u32 %s1521_s0, 4  ;;  %s20_s26 = int_to_ptr.vmem [resolvable:$true] %s19_s26 }
   0x2   :  { %s1018_s27 = scalar_lea.vmem %s20_s26, 16  ;;  %p1023_p1 = scmp.lt.s32.totalorder %s20_s26, %s20_s26 }
   0x3   :  { %p1019_p0 = scmp.ne.s32.totalorder %s20_s26, %s1018_s27  ;;  %p1024_p2 = scmp.lt.s32.totalorder %s1018_s27, %s1018_s27 }
   0x5   :  { %p1025_p3 = por %p1024_p2, %p1023_p1 }
   0x7   :  { %p1026_p4 = pnand %p1025_p3, %p1019_p0 }
   0x9   :  { %1029 = shalt.err (!%p1026_p4)
}
   0xa   :  { %s1032_s28 = smov [#allocation2]  }
   0xb   :  { %22 = dma.vmem_to_smem %s20_s26, 16, %s1032_s28, [#allocation3]  }
   0xc   :  { %1030 = dma.done.wait [#allocation3], 16  }
   0xd   :  { %1031 = vsyncadd [#allocation3], 4294967280 }
   0xe   :  { %38 = sfence }
   0xf   :  { %s39_s29 = sld [smem:[#allocation2]]  ;;  %vm265_vm0 = vcmask 326656   ;;  %v1085_v1 = vld [vmem:[%s1524_s3] sm:$0xff]  ;;  %v94_v4 = vld [vmem:[%s1525_s4 + $0x38] sm:$0xff]  ;;  %v96_v5 = vld [vmem:[%s1525_s4 + $0x48] sm:$0xff]  ;;  %v1033_v7 = vmov 0  }
  0x10   :  { %s894_s30 = sld [smem:[#allocation2 + $0x1]]  ;;  %973 = vmatprep.mubr.msk.f32.mxu0 %vm265_vm0, %v1085_v1  ;;  %v93_v6 = vld [vmem:[%s1525_s4 + $0x30] sm:$0xff]  ;;  %1001 = vset.pattern.permute.xlu1 %v1033_v7  ;;  %v95_v10 = vld [vmem:[%s1525_s4 + $0x40] sm:$0xff]  ;;  %v92_v14 = vld [vmem:[%s1525_s4 + $0x28] sm:$0xff]  ;;  %vm751_vm1 = vcmask 654336  }
  0x11   :  { %s1100_s17 = sld [smem:[#allocation2 + $0x2]]  ;;  %1000 = vset.pattern.permute.xlu0 %v1033_v7  ;;  %v91_v13 = vld [vmem:[%s1525_s4 + $0x20] sm:$0xff]  ;;  %v89_v17 = vld [vmem:[%s1525_s4 + $0x10] sm:$0xff]  ;;  %v90_v18 = vld [vmem:[%s1525_s4 + $0x18] sm:$0xff] }
  0x12   :  { %s896_s20 = sld [smem:[#allocation2 + $0x3]]  ;;  %v76_v21 = vld [vmem:[%s1522_s1 + $0xf8] sm:$0xff]  ;;  %v87_v22 = vld [vmem:[%s1525_s4] sm:$0xff]  ;;  %v88_v23 = vld [vmem:[%s1525_s4 + $0x8] sm:$0xff] }
  0x13   :  { %v60_v24 = vld [vmem:[%s1522_s1 + $0x78] sm:$0xff]  ;;  %v75_v25 = vld [vmem:[%s1522_s1 + $0xf0] sm:$0xff]  ;;  %v74_v28 = vld [vmem:[%s1522_s1 + $0xe8] sm:$0xff] }
  0x14   :  { %v59_v26 = vld [vmem:[%s1522_s1 + $0x70] sm:$0xff]  ;;  %v58_v30 = vld [vmem:[%s1522_s1 + $0x68] sm:$0xff]  ;;  %v73_v36 = vld [vmem:[%s1522_s1 + $0xe0] sm:$0xff] }
  0x15   :  { %v1089_v3 = vstv %s39_s29  ;;  %v641_v37 = vld [vmem:[%s1527_s6] sm:$0xff]  ;;  %v642_v39 = vld [vmem:[%s1527_s6 + $0x8] sm:$0xff]  ;;  %v72_v51 = vld [vmem:[%s1522_s1 + $0xd8] sm:$0xff] }
  0x16   :  { %s1078_s8 = ssub.f32 %s894_s30, %s39_s29  ;;  %v546_v8 = vmul.f32 %v1089_v3, %v94_v4  ;;  %v548_v9 = vmul.f32 %v1089_v3, %v96_v5  ;;  %v545_v11 = vmul.f32 %v1089_v3, %v93_v6  ;;  %v547_v12 = vmul.f32 %v1089_v3, %v95_v10  ;;  %v57_v44 = vld [vmem:[%s1522_s1 + $0x60] sm:$0xff]  ;;  %v56_v61 = vld [vmem:[%s1522_s1 + $0x58] sm:$0xff]  ;;  %v71_v4 = vld [vmem:[%s1522_s1 + $0xd0] sm:$0xff] }
  0x17   :  { %v543_v15 = vmul.f32 %v1089_v3, %v91_v13  ;;  %v544_v16 = vmul.f32 %v1089_v3, %v92_v14  ;;  %v541_v19 = vmul.f32 %v1089_v3, %v89_v17  ;;  %v542_v20 = vmul.f32 %v1089_v3, %v90_v18  ;;  %v55_v13 = vld [vmem:[%s1522_s1 + $0x50] sm:$0xff]  ;;  %v70_v14 = vld [vmem:[%s1522_s1 + $0xc8] sm:$0xff] }
  0x18   :  { %p97_p5 = scmp.gt.f32.partialorder %s1078_s8, 0.0  ;;  %586 = vperm.xlu1 %1001, %v546_v8   ;;  %596 = vperm.xlu0 %1000, %v548_v9   ;;  %s1118_s25 = ssub.f32 %s896_s20, %s1100_s17  ;;  %v135_v29 = vsub.f32 %v76_v21, %v1089_v3  ;;  %v539_v31 = vmul.f32 %v1089_v3, %v87_v22  ;;  %v540_v32 = vmul.f32 %v1089_v3, %v88_v23  ;;  %v1167_v38 = vstv %s1100_s17 }
  0x19   :  { %v119_v33 = vsub.f32 %v60_v24, %v1089_v3  ;;  %v134_v34 = vsub.f32 %v75_v25, %v1089_v3  ;;  %v118_v35 = vsub.f32 %v59_v26, %v1089_v3  ;;  %v133_v40 = vsub.f32 %v74_v28, %v1089_v3  ;;  %v54_v25 = vld [vmem:[%s1522_s1 + $0x48] sm:$0xff]  ;;  %v69_v26 = vld [vmem:[%s1522_s1 + $0xc0] sm:$0xff] }
  0x1a   :  { %s98_s0 = scalar_select %p97_p5, %s1078_s8, 1.0  ;;  %v117_v41 = vsub.f32 %v58_v30, %v1089_v3  ;;  %v132_v43 = vsub.f32 %v73_v36, %v1089_v3  ;;  %v841_v45 = vmul.f32 %v1167_v38, %v641_v37  ;;  %v842_v46 = vmul.f32 %v1167_v38, %v642_v39  ;;  %v53_v37 = vld [vmem:[%s1522_s1 + $0x40] sm:$0xff]  ;;  %v68_v39 = vld [vmem:[%s1522_s1 + $0xb8] sm:$0xff] }
  0x1b   :  { %p643_p6 = scmp.gt.f32.partialorder %s1118_s25, 0.0  ;;  %v116_v56 = vsub.f32 %v57_v44, %v1089_v3  ;;  %v131_v60 = vsub.f32 %v72_v51, %v1089_v3  ;;  %v115_v7 = vsub.f32 %v56_v61, %v1089_v3  ;;  %v52_v51 = vld [vmem:[%s1522_s1 + $0x38] sm:$0xff]  ;;  %s835_s10 = smul.f32 0.003921569, %s1118_s25 }
  0x1c   :  { %v99_v0 = vstv %s98_s0  ;;  %581 = vperm.xlu1 %1001, %v545_v11   ;;  %591 = vperm.xlu0 %1000, %v547_v12   ;;  %v130_v12 = vsub.f32 %v71_v4, %v1089_v3 }
  0x1d   :  { %1002 = vrcp.f32 %v99_v0  ;;  %s644_s30 = scalar_select %p643_p6, %s1118_s25, 1.0 }
  0x1f   :  { %v645_v27 = vstv %s644_s30 }
  0x20   :  { %571 = vperm.xlu1 %1001, %v543_v15   ;;  %576 = vperm.xlu0 %1000, %v544_v16   ;;  %1004 = vrcp.f32 %v645_v27 }
  0x24   :  { %561 = vperm.xlu1 %1001, %v541_v19   ;;  %566 = vperm.xlu0 %1000, %v542_v20   ;;  %v114_v19 = vsub.f32 %v55_v13, %v1089_v3  ;;  %v129_v20 = vsub.f32 %v70_v14, %v1089_v3  ;;  %v50_v13 = vld [vmem:[%s1522_s1 + $0x28] sm:$0xff]  ;;  %v65_v14 = vld [vmem:[%s1522_s1 + $0xa0] sm:$0xff] }
  0x28   :  { %551 = vperm.xlu1 %1001, %v539_v31   ;;  %556 = vperm.xlu0 %1000, %v540_v32   ;;  %v113_v31 = vsub.f32 %v54_v25, %v1089_v3  ;;  %v128_v32 = vsub.f32 %v69_v26, %v1089_v3  ;;  %v49_v25 = vld [vmem:[%s1522_s1 + $0x20] sm:$0xff]  ;;  %v64_v26 = vld [vmem:[%s1522_s1 + $0x98] sm:$0xff] }
  0x2a   :  { %v1003_v2 = vpop.eup %1002 }
  0x2b   :  { %993 = vpush %v1003_v2 }
  0x2c   :  { %845 = vperm.xlu0 %1000, %v841_v45   ;;  %850 = vperm.xlu1 %1001, %v842_v46   ;;  %v112_v45 = vsub.f32 %v53_v37, %v1089_v3  ;;  %v127_v46 = vsub.f32 %v68_v39, %v1089_v3  ;;  %v48_v37 = vld [vmem:[%s1522_s1 + $0x18] sm:$0xff]  ;;  %v63_v39 = vld [vmem:[%s1522_s1 + $0x90] sm:$0xff] }
  0x2d   :  { %v1005_v8 = vpop.eup %1004 }
  0x2e   :  { %995 = vpush %v1005_v8 }
  0x5c   :  { %s994_s24 = spop %993 }
  0x5d   :  { %s102_s9 = smul.f32 255.0, %s994_s24 }
  0x5f   :  { %v1174_v42 = vstv %s102_s9 }
  0x60   :  { %v168_v47 = vmul.f32 %v1174_v42, %v135_v29  ;;  %v152_v48 = vmul.f32 %v1174_v42, %v119_v33  ;;  %v167_v49 = vmul.f32 %v1174_v42, %v134_v34  ;;  %v151_v50 = vmul.f32 %v1174_v42, %v118_v35 }
  0x61   :  { %v166_v52 = vmul.f32 %v1174_v42, %v133_v40  ;;  %v150_v58 = vmul.f32 %v1174_v42, %v117_v41  ;;  %v165_v59 = vmul.f32 %v1174_v42, %v132_v43  ;;  %v149_v11 = vmul.f32 %v1174_v42, %v116_v56 }
  0x62   :  { %v200_v53 = vfloor.f32 %v168_v47  ;;  %v184_v54 = vfloor.f32 %v152_v48  ;;  %v199_v55 = vfloor.f32 %v167_v49  ;;  %v183_v57 = vfloor.f32 %v151_v50 }
  0x63   :  { %v198_v2 = vfloor.f32 %v166_v52  ;;  %v182_v10 = vfloor.f32 %v150_v58  ;;  %v197_v17 = vfloor.f32 %v165_v59  ;;  %v164_v18 = vmul.f32 %v1174_v42, %v131_v60  ;;  %v67_v52 = vld [vmem:[%s1522_s1 + $0xb0] sm:$0xff] }
  0x64   :  { %v232_v62 = vmax.f32 %v200_v53, 0.0  ;;  %v216_v63 = vmax.f32 %v184_v54, 0.0  ;;  %v231_v0 = vmax.f32 %v199_v55, 0.0  ;;  %v215_v9 = vmax.f32 %v183_v57, 0.0 }
  0x65   :  { %v230_v16 = vmax.f32 %v198_v2, 0.0  ;;  %v214_v22 = vmax.f32 %v182_v10, 0.0  ;;  %v181_v23 = vfloor.f32 %v149_v11  ;;  %v148_v24 = vmul.f32 %v1174_v42, %v115_v7 }
  0x66   :  { %v264_v5 = vmin.f32 %v232_v62, 255.0  ;;  %v248_v6 = vmin.f32 %v216_v63, 255.0  ;;  %v263_v15 = vmin.f32 %v231_v0, 255.0  ;;  %v247_v21 = vmin.f32 %v215_v9, 255.0  ;;  %v51_v63 = vld [vmem:[%s1522_s1 + $0x30] sm:$0xff]  ;;  %v66_v0 = vld [vmem:[%s1522_s1 + $0xa8] sm:$0xff] }
  0x67   :  { %v262_v27 = vmin.f32 %v230_v16, 255.0  ;;  %v229_v28 = vmax.f32 %v197_v17, 0.0  ;;  %v196_v29 = vfloor.f32 %v164_v18  ;;  %v163_v30 = vmul.f32 %v1174_v42, %v130_v12 }
  0x68   :  { %941 = vmatprep.subr.msk.mxu0 %vm265_vm0, %v264_v5  ;;  %v246_v33 = vmin.f32 %v214_v22, 255.0  ;;  %v213_v34 = vmax.f32 %v181_v23, 0.0  ;;  %v180_v35 = vfloor.f32 %v148_v24  ;;  %v147_v36 = vmul.f32 %v1174_v42, %v114_v19 }
  0x69   :  { %942 = vmatpush3.xpose.msk.msra.mxu0 %vm265_vm0, %v248_v6  ;;  %v261_v40 = vmin.f32 %v229_v28, 255.0  ;;  %v228_v41 = vmax.f32 %v196_v29, 0.0  ;;  %v195_v43 = vfloor.f32 %v163_v30  ;;  %v162_v44 = vmul.f32 %v1174_v42, %v129_v20 }
  0x6a   :  { %943 = vmatprep.subr.msk.mxu0 %vm265_vm0, %v263_v15  ;;  %v245_v47 = vmin.f32 %v213_v34, 255.0  ;;  %v212_v48 = vmax.f32 %v180_v35, 0.0  ;;  %v179_v49 = vfloor.f32 %v147_v36  ;;  %v146_v50 = vmul.f32 %v1174_v42, %v113_v31 }
  0x6b   :  { %v260_v53 = vmin.f32 %v228_v41, 255.0  ;;  %v227_v54 = vmax.f32 %v195_v43, 0.0  ;;  %v194_v55 = vfloor.f32 %v162_v44  ;;  %v161_v56 = vmul.f32 %v1174_v42, %v128_v32 }
  0x6c   :  { %v111_v57 = vsub.f32 %v52_v51, %v1089_v3  ;;  %v126_v58 = vsub.f32 %v67_v52, %v1089_v3  ;;  %v244_v59 = vmin.f32 %v212_v48, 255.0  ;;  %v211_v60 = vmax.f32 %v179_v49, 0.0  ;;  %v47_v51 = vld [vmem:[%s1522_s1 + $0x10] sm:$0xff]  ;;  %v62_v52 = vld [vmem:[%s1522_s1 + $0x88] sm:$0xff] }
  0x6d   :  { %944 = vmatpush3.xpose.msk.msra.mxu0 %vm265_vm0, %v247_v21  ;;  %v178_v61 = vfloor.f32 %v146_v50  ;;  %v145_v62 = vmul.f32 %v1174_v42, %v112_v45  ;;  %v259_v2 = vmin.f32 %v227_v54, 255.0  ;;  %v226_v4 = vmax.f32 %v194_v55, 0.0 }
  0x6e   :  { %945 = vmatprep.subr.msk.mxu0 %vm265_vm0, %v262_v27  ;;  %v193_v5 = vfloor.f32 %v161_v56  ;;  %v160_v6 = vmul.f32 %v1174_v42, %v127_v46  ;;  %v110_v7 = vsub.f32 %v51_v63, %v1089_v3  ;;  %v125_v8 = vsub.f32 %v66_v0, %v1089_v3  ;;  %v46_v63 = vld [vmem:[%s1522_s1 + $0x8] sm:$0xff]  ;;  %v61_v0 = vld [vmem:[%s1522_s1 + $0x80] sm:$0xff] }
  0x6f   :  { %v243_v9 = vmin.f32 %v211_v60, 255.0  ;;  %v210_v10 = vmax.f32 %v178_v61, 0.0  ;;  %v177_v11 = vfloor.f32 %v145_v62  ;;  %v144_v12 = vmul.f32 %v1174_v42, %v111_v57 }
  0x70   :  { %v258_v15 = vmin.f32 %v226_v4, 255.0  ;;  %v225_v16 = vmax.f32 %v193_v5, 0.0  ;;  %v192_v17 = vfloor.f32 %v160_v6  ;;  %v159_v18 = vmul.f32 %v1174_v42, %v126_v58 }
  0x71   :  { %946 = vmatpush3.xpose.msk.msra.mxu0 %vm265_vm0, %v246_v33  ;;  %v109_v19 = vsub.f32 %v50_v13, %v1089_v3  ;;  %v124_v20 = vsub.f32 %v65_v14, %v1089_v3  ;;  %v242_v21 = vmin.f32 %v210_v10, 255.0  ;;  %v209_v22 = vmax.f32 %v177_v11, 0.0  ;;  %v45_v13 = vld [vmem:[%s1522_s1] sm:$0xff] }
  0x72   :  { %947 = vmatprep.subr.msk.mxu0 %vm265_vm0, %v261_v40  ;;  %v176_v23 = vfloor.f32 %v144_v12  ;;  %v143_v24 = vmul.f32 %v1174_v42, %v110_v7  ;;  %v257_v27 = vmin.f32 %v225_v16, 255.0  ;;  %v224_v28 = vmax.f32 %v192_v17, 0.0 }
  0x73   :  { %v191_v29 = vfloor.f32 %v159_v18  ;;  %v158_v30 = vmul.f32 %v1174_v42, %v125_v8  ;;  %v108_v31 = vsub.f32 %v49_v25, %v1089_v3  ;;  %v123_v32 = vsub.f32 %v64_v26, %v1089_v3 }
  0x74   :  { %v241_v33 = vmin.f32 %v209_v22, 255.0  ;;  %v208_v34 = vmax.f32 %v176_v23, 0.0  ;;  %v175_v35 = vfloor.f32 %v143_v24  ;;  %v142_v36 = vmul.f32 %v1174_v42, %v109_v19 }
  0x75   :  { %948 = vmatpush3.xpose.msk.msra.mxu0 %vm265_vm0, %v245_v47  ;;  %v256_v40 = vmin.f32 %v224_v28, 255.0  ;;  %v223_v41 = vmax.f32 %v191_v29, 0.0  ;;  %v190_v43 = vfloor.f32 %v158_v30  ;;  %v157_v44 = vmul.f32 %v1174_v42, %v124_v20 }
  0x76   :  { %949 = vmatprep.subr.msk.mxu0 %vm265_vm0, %v260_v53  ;;  %v107_v45 = vsub.f32 %v48_v37, %v1089_v3  ;;  %v122_v46 = vsub.f32 %v63_v39, %v1089_v3  ;;  %v240_v47 = vmin.f32 %v208_v34, 255.0  ;;  %v207_v48 = vmax.f32 %v175_v35, 0.0 }
  0x77   :  { %v174_v49 = vfloor.f32 %v142_v36  ;;  %v141_v50 = vmul.f32 %v1174_v42, %v108_v31  ;;  %v255_v53 = vmin.f32 %v223_v41, 255.0  ;;  %v222_v54 = vmax.f32 %v190_v43, 0.0  ;;  %v78_v43 = vld [vmem:[%s1524_s3 + $0x8] sm:$0xff] }
  0x78   :  { %v189_v55 = vfloor.f32 %v157_v44  ;;  %v156_v56 = vmul.f32 %v1174_v42, %v123_v32  ;;  %v106_v57 = vsub.f32 %v47_v51, %v1089_v3  ;;  %v121_v58 = vsub.f32 %v62_v52, %v1089_v3  ;;  %v79_v44 = vld [vmem:[%s1524_s3 + $0x10] sm:$0xff] }
  0x79   :  { %950 = vmatpush3.xpose.msk.msra.mxu0 %vm265_vm0, %v244_v59  ;;  %v239_v59 = vmin.f32 %v207_v48, 255.0  ;;  %v206_v60 = vmax.f32 %v174_v49, 0.0  ;;  %v173_v61 = vfloor.f32 %v141_v50  ;;  %v140_v62 = vmul.f32 %v1174_v42, %v107_v45  ;;  %v80_v45 = vld [vmem:[%s1524_s3 + $0x18] sm:$0xff]  ;;  %v85_v49 = vld [vmem:[%s1524_s3 + $0x40] sm:$0xff]  ;;  %v86_v50 = vld [vmem:[%s1524_s3 + $0x48] sm:$0xff] }
  0x7a   :  { %951 = vmatprep.subr.msk.mxu0 %vm265_vm0, %v259_v2  ;;  %v254_v2 = vmin.f32 %v222_v54, 255.0  ;;  %v221_v4 = vmax.f32 %v189_v55, 0.0  ;;  %v188_v5 = vfloor.f32 %v156_v56  ;;  %v155_v6 = vmul.f32 %v1174_v42, %v122_v46  ;;  %v82_v46 = vld [vmem:[%s1524_s3 + $0x28] sm:$0xff]  ;;  %v84_v48 = vld [vmem:[%s1524_s3 + $0x38] sm:$0xff] }
  0x7b   :  { %v105_v7 = vsub.f32 %v46_v63, %v1089_v3  ;;  %v120_v8 = vsub.f32 %v61_v0, %v1089_v3  ;;  %v205_v10 = vmax.f32 %v173_v61, 0.0  ;;  %v172_v11 = vfloor.f32 %v140_v62 }
  0x7c   :  { %v139_v12 = vmul.f32 %v1174_v42, %v106_v57  ;;  %v253_v14 = vmin.f32 %v221_v4, 255.0  ;;  %v187_v16 = vfloor.f32 %v155_v6  ;;  %v154_v17 = vmul.f32 %v1174_v42, %v121_v58 }
  0x7d   :  { %952 = vmatpush3.xpose.msk.msra.mxu0 %vm265_vm0, %v243_v9  ;;  %v238_v9 = vmin.f32 %v206_v60, 255.0  ;;  %v104_v18 = vsub.f32 %v45_v13, %v1089_v3  ;;  %v237_v19 = vmin.f32 %v205_v10, 255.0  ;;  %v204_v20 = vmax.f32 %v172_v11, 0.0 }
  0x7e   :  { %953 = vmatprep.subr.msk.mxu0 %vm265_vm0, %v258_v15  ;;  %v220_v15 = vmax.f32 %v188_v5, 0.0  ;;  %v138_v22 = vmul.f32 %v1174_v42, %v105_v7  ;;  %v219_v24 = vmax.f32 %v187_v16, 0.0  ;;  %v186_v25 = vfloor.f32 %v154_v17 }
  0x7f   :  { %v153_v26 = vmul.f32 %v1174_v42, %v120_v8  ;;  %v137_v30 = vmul.f32 %v1174_v42, %v104_v18  ;;  %v1034_v51 = vmov 0.0  }
  0x80   :  { %v252_v23 = vmin.f32 %v220_v15, 255.0  ;;  %v170_v29 = vfloor.f32 %v138_v22  ;;  %v251_v3 = vmin.f32 %v219_v24, 255.0  ;;  %v218_v31 = vmax.f32 %v186_v25, 0.0  ;;  %822 = vmatprep.mubr.f32.mxu1 %v1034_v51 }
  0x81   :  { %954 = vmatpush3.xpose.msk.msra.mxu0 %vm265_vm0, %v242_v21  ;;  %v171_v21 = vfloor.f32 %v139_v12  ;;  %v185_v32 = vfloor.f32 %v153_v26  ;;  %v169_v35 = vfloor.f32 %v137_v30 }
  0x82   :  { %955 = vmatprep.subr.msk.mxu0 %vm265_vm0, %v257_v27  ;;  %v236_v27 = vmin.f32 %v204_v20, 255.0  ;;  %v202_v34 = vmax.f32 %v170_v29, 0.0  ;;  %v250_v36 = vmin.f32 %v218_v31, 255.0 }
  0x83   :  { %v203_v28 = vmax.f32 %v171_v21, 0.0  ;;  %v217_v37 = vmax.f32 %v185_v32, 0.0 }
  0x84   :  { %v234_v39 = vmin.f32 %v202_v34, 255.0 }
  0x85   :  { %956 = vmatpush3.xpose.msk.msra.mxu0 %vm265_vm0, %v241_v33  ;;  %v235_v33 = vmin.f32 %v203_v28, 255.0  ;;  %v249_v41 = vmin.f32 %v217_v37, 255.0 }
  0x86   :  { %957 = vmatprep.subr.msk.mxu0 %vm265_vm0, %v256_v40  ;;  %v201_v40 = vmax.f32 %v169_v35, 0.0 }
  0x88   :  { %v233_v42 = vmin.f32 %v201_v40, 255.0 }
  0x89   :  { %958 = vmatpush3.xpose.msk.msra.mxu0 %vm265_vm0, %v240_v47  ;;  %v83_v47 = vld [vmem:[%s1524_s3 + $0x30] sm:$0xff] }
  0x8a   :  { %959 = vmatprep.subr.msk.mxu0 %vm265_vm0, %v255_v53 }
  0x8d   :  { %960 = vmatpush3.xpose.msk.msra.mxu0 %vm265_vm0, %v239_v59 }
  0x8e   :  { %961 = vmatprep.subr.msk.mxu0 %vm265_vm0, %v254_v2 }
  0x91   :  { %962 = vmatpush3.xpose.msk.msra.mxu0 %vm265_vm0, %v238_v9 }
  0x92   :  { %963 = vmatprep.subr.msk.mxu0 %vm265_vm0, %v253_v14 }
  0x93   :  { %v1391_v52 = vpop.permute.xlu1 %586  ;;  %v1393_v53 = vpop.permute.xlu0 %596 }
  0x95   :  { %964 = vmatpush3.xpose.msk.msra.mxu0 %vm265_vm0, %v237_v19 }
  0x96   :  { %965 = vmatprep.subr.msk.mxu0 %vm265_vm0, %v252_v23 }
  0x97   :  { %v1395_v55 = vpop.permute.xlu1 %581  ;;  %v1397_v57 = vpop.permute.xlu0 %591 }
  0x99   :  { %966 = vmatpush3.xpose.msk.msra.mxu0 %vm265_vm0, %v236_v27 }
  0x9a   :  { %967 = vmatprep.subr.msk.mxu0 %vm265_vm0, %v251_v3 }
  0x9b   :  { %v1399_v60 = vpop.permute.xlu1 %571  ;;  %v1401_v62 = vpop.permute.xlu0 %576 }
  0x9d   :  { %968 = vmatpush3.xpose.msk.msra.mxu0 %vm265_vm0, %v235_v33 }
  0x9e   :  { %969 = vmatprep.subr.msk.mxu0 %vm265_vm0, %v250_v36 }
  0x9f   :  { %v562_v2 = vpop.permute.xlu1 %561  ;;  %v1404_v5 = vpop.permute.xlu0 %566 }
  0xa1   :  { %970 = vmatpush3.xpose.msk.msra.mxu0 %vm265_vm0, %v234_v39 }
  0xa2   :  { %971 = vmatprep.subr.msk.mxu0 %vm265_vm0, %v249_v41 }
  0xa3   :  { %v552_v11 = vpop.permute.xlu1 %551  ;;  %v557_v14 = vpop.permute.xlu0 %556 }
  0xa5   :  { %972 = vmatpush3.xpose.msk.msra.mxu0 %vm265_vm0, %v233_v42 }
  0xa8   :  { %974 = vmatmul.mubr.msk.f32.vlgmr.msra.gmra.mxu0 %vm265_vm0, %v1085_v1  ;;  %v81_v1 = vld [vmem:[%s1524_s3 + $0x20] sm:$0xff]  ;;  %s517_s3 = smul.f32 0.003921569, %s1078_s8  ;;  %s996_s8 = spop %995 }
  0xa9   :  { %975 = vmatprep.mubr.msk.f32.mxu0 %vm265_vm0, %v78_v43  ;;  %s648_s28 = smul.f32 255.0, %s996_s8 }
  0xaa   :  { %v1406_v6 = vstv %s517_s3 }
  0xab   :  { %v1416_v3 = vstv %s648_s28 }
  0xac   :  { %976 = vmatmul.mubr.msk.f32.gmra.mxu0 %vm265_vm0, %v78_v43 }
  0xad   :  { %977 = vmatprep.mubr.msk.f32.mxu0 %vm265_vm0, %v79_v44 }
  0xb0   :  { %978 = vmatmul.mubr.msk.f32.gmra.mxu0 %vm265_vm0, %v79_v44 }
  0xb1   :  { %979 = vmatprep.mubr.msk.f32.mxu0 %vm265_vm0, %v80_v45 }
  0xb4   :  { %980 = vmatmul.mubr.msk.f32.gmra.mxu0 %vm265_vm0, %v80_v45 }
  0xb5   :  { %981 = vmatprep.mubr.msk.f32.mxu0 %vm265_vm0, %v81_v1 }
  0xb8   :  { %982 = vmatmul.mubr.msk.f32.gmra.mxu0 %vm265_vm0, %v81_v1 }
  0xb9   :  { %983 = vmatprep.mubr.msk.f32.mxu0 %vm265_vm0, %v82_v46 }
  0xbc   :  { %984 = vmatmul.mubr.msk.f32.gmra.mxu0 %vm265_vm0, %v82_v46 }
  0xbd   :  { %985 = vmatprep.mubr.msk.f32.mxu0 %vm265_vm0, %v83_v47 }
  0xc0   :  { %986 = vmatmul.mubr.msk.f32.gmra.mxu0 %vm265_vm0, %v83_v47 }
  0xc1   :  { %987 = vmatprep.mubr.msk.f32.mxu0 %vm265_vm0, %v84_v48 }
  0xc4   :  { %988 = vmatmul.mubr.msk.f32.gmra.mxu0 %vm265_vm0, %v84_v48 }
  0xc5   :  { %989 = vmatprep.mubr.msk.f32.mxu0 %vm265_vm0, %v85_v49 }
  0xc8   :  { %990 = vmatmul.mubr.msk.f32.gmra.mxu0 %vm265_vm0, %v85_v49 }
  0xc9   :  { %991 = vmatprep.mubr.msk.f32.mxu0 %vm265_vm0, %v86_v50 }
  0xcc   :  { %992 = vmatmul.mubr.msk.f32.gmra.mxu0 %vm265_vm0, %v86_v50 }
 0x168   :  { %v458_v54 = vpop.f32.mrf.mxu0 }
 0x169   :  { %v519_v9 = vmul.f32 %v1406_v6, %v458_v54 }
 0x16a   :  { %v460_v56 = vpop.f32.mrf.mxu0 }
 0x16b   :  { %v520_v10 = vmul.f32 %v1406_v6, %v460_v56  ;;  %v599_v17 = vadd.f32 %v552_v11, %v519_v9 }
 0x16c   :  { %v464_v58 = vpop.f32.mrf.mxu0 }
 0x16d   :  { %v521_v12 = vmul.f32 %v1406_v6, %v464_v58  ;;  %v600_v18 = vadd.f32 %v552_v11, %v520_v10  ;;  %v619_v24 = vmax.f32 %v599_v17, 0.0 }
 0x16e   :  { %v466_v59 = vpop.f32.mrf.mxu0 }
 0x16f   :  { %v522_v15 = vmul.f32 %v1406_v6, %v466_v59  ;;  %v601_v19 = vadd.f32 %v557_v14, %v521_v12  ;;  %v620_v25 = vmax.f32 %v600_v18, 0.0  ;;  %v1420_v33 = vsub.f32 %v619_v24, %v1167_v38 }
 0x170   :  { %v470_v61 = vpop.f32.mrf.mxu0 }
 0x171   :  { %v602_v21 = vadd.f32 %v557_v14, %v522_v15  ;;  %v523_v22 = vmul.f32 %v1406_v6, %v470_v61  ;;  %v621_v26 = vmax.f32 %v601_v19, 0.0  ;;  %v1423_v34 = vsub.f32 %v620_v25, %v1167_v38 }
 0x172   :  { %v472_v63 = vpop.f32.mrf.mxu0 }
 0x173   :  { %v524_v27 = vmul.f32 %v1406_v6, %v472_v63  ;;  %v622_v29 = vmax.f32 %v602_v21, 0.0  ;;  %v1414_v30 = vadd.f32 %v562_v2, %v523_v22  ;;  %v1428_v37 = vsub.f32 %v621_v26, %v1167_v38 }
 0x174   :  { %v476_v0 = vpop.f32.mrf.mxu0 }
 0x175   :  { %v1430_v39 = vadd.f32 %v562_v2, %v524_v27  ;;  %v1435_v43 = vsub.f32 %v622_v29, %v1167_v38  ;;  %v623_v44 = vmax.f32 %v1414_v30, 0.0  ;;  %v525_v54 = vmul.f32 %v1406_v6, %v476_v0 }
 0x176   :  { %v478_v4 = vpop.f32.mrf.mxu0 }
 0x177   :  { %v526_v46 = vmul.f32 %v1406_v6, %v478_v4  ;;  %v624_v61 = vmax.f32 %v1430_v39, 0.0  ;;  %v605_v24 = vadd.f32 %v1404_v5, %v525_v54 }
 0x178   :  { %v482_v7 = vpop.f32.mrf.mxu0 }
 0x179   :  { %v527_v63 = vmul.f32 %v1406_v6, %v482_v7  ;;  %v606_v11 = vadd.f32 %v1404_v5, %v526_v46 }
 0x17a   :  { %v484_v8 = vpop.f32.mrf.mxu0 }
 0x17b   :  { %v528_v47 = vmul.f32 %v1406_v6, %v484_v8  ;;  %v607_v18 = vadd.f32 %v1399_v60, %v527_v63 }
 0x17c   :  { %v488_v13 = vpop.f32.mrf.mxu0 }
 0x17d   :  { %v529_v48 = vmul.f32 %v1406_v6, %v488_v13  ;;  %v608_v12 = vadd.f32 %v1399_v60, %v528_v47 }
 0x17e   :  { %v490_v16 = vpop.f32.mrf.mxu0 }
 0x17f   :  { %v530_v40 = vmul.f32 %v1406_v6, %v490_v16  ;;  %v609_v13 = vadd.f32 %v1401_v62, %v529_v48  ;;  %v628_v25 = vmax.f32 %v608_v12, 0.0 }
 0x180   :  { %v494_v20 = vpop.f32.mrf.mxu0 }
 0x181   :  { %v531_v41 = vmul.f32 %v1406_v6, %v494_v20  ;;  %v610_v2 = vadd.f32 %v1401_v62, %v530_v40  ;;  %v629_v26 = vmax.f32 %v609_v13, 0.0  ;;  %v654_v13 = vsub.f32 %v623_v44, %v1167_v38 }
 0x182   :  { %v496_v23 = vpop.f32.mrf.mxu0 }
 0x183   :  { %v532_v35 = vmul.f32 %v1406_v6, %v496_v23  ;;  %v611_v4 = vadd.f32 %v1395_v55, %v531_v41  ;;  %v630_v19 = vmax.f32 %v610_v2, 0.0  ;;  %v625_v41 = vmax.f32 %v605_v24, 0.0 }
 0x184   :  { %v500_v28 = vpop.f32.mrf.mxu0 }
 0x185   :  { %v533_v31 = vmul.f32 %v1406_v6, %v500_v28  ;;  %v612_v56 = vadd.f32 %v1395_v55, %v532_v35 }
 0x186   :  { %v502_v32 = vpop.f32.mrf.mxu0 }
 0x187   :  { %v534_v36 = vmul.f32 %v1406_v6, %v502_v32  ;;  %v613_v49 = vadd.f32 %v1391_v52, %v533_v31  ;;  %v632_v7 = vmax.f32 %v612_v56, 0.0  ;;  %v626_v31 = vmax.f32 %v606_v11, 0.0 }
 0x188   :  { %v506_v42 = vpop.f32.mrf.mxu0  ;;  %v627_v32 = vmax.f32 %v607_v18, 0.0 }
 0x189   :  { %v614_v45 = vadd.f32 %v1391_v52, %v534_v36  ;;  %v535_v1 = vmul.f32 %v1406_v6, %v506_v42  ;;  %v633_v14 = vmax.f32 %v613_v49, 0.0  ;;  %v659_v42 = vsub.f32 %v628_v25, %v1167_v38 }
 0x18a   :  { %v508_v50 = vpop.f32.mrf.mxu0  ;;  %v658_v54 = vsub.f32 %v627_v32, %v1167_v38  ;;  %v675_v25 = vmul.f32 %v1416_v3, %v654_v13  ;;  %v673_v32 = vmul.f32 %v1416_v3, %v1428_v37 }
 0x18b   :  { %v615_v58 = vadd.f32 %v1397_v57, %v535_v1  ;;  %v536_v59 = vmul.f32 %v1406_v6, %v508_v50  ;;  %v634_v9 = vmax.f32 %v614_v45, 0.0  ;;  %v664_v27 = vsub.f32 %v633_v14, %v1167_v38 }
 0x18c   :  { %v512_v8 = vpop.f32.mrf.mxu0  ;;  %v660_v45 = vsub.f32 %v629_v26, %v1167_v38  ;;  %v655_v50 = vsub.f32 %v624_v61, %v1167_v38  ;;  %v680_v12 = vmul.f32 %v1416_v3, %v659_v42 }
 0x18d   :  { %v635_v52 = vmax.f32 %v615_v58, 0.0  ;;  %v616_v10 = vadd.f32 %v1397_v57, %v536_v59  ;;  %v537_v0 = vmul.f32 %v1406_v6, %v512_v8  ;;  %v631_v57 = vmax.f32 %v611_v4, 0.0 }
 0x18e   :  { %v514_v15 = vpop.f32.mrf.mxu0  ;;  %v665_v21 = vsub.f32 %v634_v9, %v1167_v38  ;;  %v685_v1 = vmul.f32 %v1416_v3, %v664_v27  ;;  %v657_v59 = vsub.f32 %v626_v31, %v1167_v38  ;;  %v656_v8 = vsub.f32 %v625_v41, %v1167_v38 }
 0x18f   :  { %v636_v16 = vmax.f32 %v616_v10, 0.0  ;;  %v617_v17 = vadd.f32 %v1393_v53, %v537_v0  ;;  %v538_v55 = vmul.f32 %v1406_v6, %v514_v15  ;;  %v666_v20 = vsub.f32 %v635_v52, %v1167_v38 }
 0x190   :  { %v663_v6 = vsub.f32 %v632_v7, %v1167_v38  ;;  %v662_v35 = vsub.f32 %v631_v57, %v1167_v38  ;;  %v686_v40 = vmul.f32 %v1416_v3, %v665_v21  ;;  %v705_v52 = vfloor.f32 %v685_v1 }
 0x191   :  { %v667_v22 = vsub.f32 %v636_v16, %v1167_v38  ;;  %v637_v23 = vmax.f32 %v617_v17, 0.0  ;;  %v618_v62 = vadd.f32 %v1393_v53, %v538_v55  ;;  %v687_v36 = vmul.f32 %v1416_v3, %v666_v20 }
 0x192   :  { %v661_v53 = vsub.f32 %v630_v19, %v1167_v38  ;;  %v684_v49 = vmul.f32 %v1416_v3, %v663_v6  ;;  %v683_v58 = vmul.f32 %v1416_v3, %v662_v35  ;;  %v706_v2 = vfloor.f32 %v686_v40 }
 0x193   :  { %v638_v60 = vmax.f32 %v618_v62, 0.0  ;;  %v668_v28 = vsub.f32 %v637_v23, %v1167_v38  ;;  %v688_v29 = vmul.f32 %v1416_v3, %v667_v22  ;;  %v707_v56 = vfloor.f32 %v687_v36 }
 0x194   :  { %v682_v4 = vmul.f32 %v1416_v3, %v661_v53  ;;  %v681_v10 = vmul.f32 %v1416_v3, %v660_v45  ;;  %v704_v61 = vfloor.f32 %v684_v49  ;;  %v703_v15 = vfloor.f32 %v683_v58 }
 0x195   :  { %v669_v5 = vsub.f32 %v638_v60, %v1167_v38  ;;  %v689_v39 = vmul.f32 %v1416_v3, %v668_v28  ;;  %v708_v48 = vfloor.f32 %v688_v29  ;;  %v727_v14 = vmax.f32 %v707_v56, 0.0 }
 0x196   :  { %v679_v7 = vmul.f32 %v1416_v3, %v658_v54  ;;  %v726_v17 = vmax.f32 %v706_v2, 0.0  ;;  %v702_v55 = vfloor.f32 %v682_v4  ;;  %v678_v18 = vmul.f32 %v1416_v3, %v657_v59 }
 0x197   :  { %v690_v46 = vmul.f32 %v1416_v3, %v669_v5  ;;  %v709_v47 = vfloor.f32 %v689_v39  ;;  %v728_v11 = vmax.f32 %v708_v48, 0.0  ;;  %v725_v57 = vmax.f32 %v705_v52, 0.0 }
 0x198   :  { %v701_v20 = vfloor.f32 %v681_v10  ;;  %v677_v21 = vmul.f32 %v1416_v3, %v656_v8  ;;  %v724_v23 = vmax.f32 %v704_v61, 0.0  ;;  %v700_v62 = vfloor.f32 %v680_v12  ;;  %v640_v61 = vld [vmem:[%s1526_s5 + $0x8] sm:$0xff] }
 0x199   :  { %v710_v63 = vfloor.f32 %v690_v46  ;;  %v729_v9 = vmax.f32 %v709_v47, 0.0  ;;  %v748_v22 = vmin.f32 %v728_v11, 255.0  ;;  %v676_v38 = vmul.f32 %v1416_v3, %v655_v50  ;;  %v639_v11 = vld [vmem:[%s1526_s5] sm:$0xff] }
 0x19a   :  { %v747_v30 = vmin.f32 %v727_v14, 255.0  ;;  %v723_v44 = vmax.f32 %v703_v15, 0.0  ;;  %v699_v24 = vfloor.f32 %v679_v7  ;;  %v746_v26 = vmin.f32 %v726_v17, 255.0  ;;  %v846_v15 = vpop.permute.xlu0 %845 }
 0x19b   :  { %v730_v0 = vmax.f32 %v710_v63, 0.0  ;;  %v749_v19 = vmin.f32 %v729_v9, 255.0  ;;  %v722_v27 = vmax.f32 %v702_v55, 0.0  ;;  %v698_v6 = vfloor.f32 %v678_v18 }
 0x19c   :  { %v674_v60 = vmul.f32 %v1416_v3, %v1435_v43  ;;  %v745_v28 = vmin.f32 %v725_v57, 255.0  ;;  %v721_v29 = vmax.f32 %v701_v20, 0.0  ;;  %v697_v31 = vfloor.f32 %v677_v21 }
 0x19d   :  { %v750_v16 = vmin.f32 %v730_v0, 255.0  ;;  %v744_v35 = vmin.f32 %v724_v23, 255.0  ;;  %v720_v36 = vmax.f32 %v700_v62, 0.0  ;;  %v696_v53 = vfloor.f32 %v676_v38  ;;  %v851_v62 = vpop.permute.xlu1 %850 }
 0x19e   :  { %v672_v5 = vmul.f32 %v1416_v3, %v1423_v34  ;;  %v743_v39 = vmin.f32 %v723_v44, 255.0  ;;  %v719_v40 = vmax.f32 %v699_v24, 0.0  ;;  %v695_v41 = vfloor.f32 %v675_v25 }
 0x19f   :  { %770 = vmatprep.subr.mxu1 %v750_v16  ;;  %v671_v43 = vmul.f32 %v1416_v3, %v1420_v33  ;;  %v742_v42 = vmin.f32 %v722_v27, 255.0  ;;  %v718_v45 = vmax.f32 %v698_v6, 0.0  ;;  %v694_v1 = vfloor.f32 %v674_v60 }
 0x1a0   :  { %771 = vmatpush1.msra.mxu1 %v749_v19  ;;  %v741_v37 = vmin.f32 %v721_v29, 255.0  ;;  %v717_v46 = vmax.f32 %v697_v31, 0.0  ;;  %v693_v47 = vfloor.f32 %v673_v32  ;;  %v740_v48 = vmin.f32 %v720_v36, 255.0 }
 0x1a1   :  { %772 = vmatprep.subr.mxu1 %v748_v22  ;;  %v716_v49 = vmax.f32 %v696_v53, 0.0  ;;  %v692_v50 = vfloor.f32 %v672_v5  ;;  %v739_v34 = vmin.f32 %v719_v40, 255.0  ;;  %v715_v54 = vmax.f32 %v695_v41, 0.0 }
 0x1a2   :  { %773 = vmatpush1.msra.mxu1 %v747_v30  ;;  %v691_v56 = vfloor.f32 %v671_v43  ;;  %v738_v58 = vmin.f32 %v718_v45, 255.0  ;;  %v714_v59 = vmax.f32 %v694_v1, 0.0  ;;  %v737_v3 = vmin.f32 %v717_v46, 255.0 }
 0x1a3   :  { %774 = vmatprep.subr.mxu1 %v746_v26  ;;  %v713_v33 = vmax.f32 %v693_v47, 0.0  ;;  %v736_v63 = vmin.f32 %v716_v49, 255.0  ;;  %v712_v2 = vmax.f32 %v692_v50, 0.0  ;;  %v735_v4 = vmin.f32 %v715_v54, 255.0 }
 0x1a4   :  { %775 = vmatpush1.msra.mxu1 %v745_v28  ;;  %v711_v8 = vmax.f32 %v691_v56, 0.0  ;;  %v734_v9 = vmin.f32 %v714_v59, 255.0  ;;  %v836_v12 = vstv %s835_s10  ;;  %v875_v27 = vlaneseq  ;;  %v873_v28 = vld [vmem:[%s1523_s2] sm:$0x3] }
 0x1a5   :  { %776 = vmatprep.subr.mxu1 %v744_v35  ;;  %v733_v52 = vmin.f32 %v713_v33, 255.0  ;;  %v732_v10 = vmin.f32 %v712_v2, 255.0 }
 0x1a6   :  { %777 = vmatpush1.msra.mxu1 %v743_v39  ;;  %v731_v0 = vmin.f32 %v711_v8, 255.0  ;;  %v876_v6 = vshrl.u32 %v875_v27, 7 }
 0x1a7   :  { %778 = vmatprep.subr.mxu1 %v742_v42 }
 0x1a8   :  { %779 = vmatpush1.msra.mxu1 %v741_v37  ;;  %v877_v60 = vsub.s32 0, %v876_v6  ;;  %v881_v29 = vsub.s32 1, %v876_v6 }
 0x1a9   :  { %780 = vmatprep.subr.mxu1 %v740_v48 }
 0x1aa   :  { %781 = vmatpush1.msra.mxu1 %v739_v34  ;;  %v878_v32 = vrot.slane %v873_v28, %v877_v60  ;;  %v882_v5 = vrot.slane %v873_v28, %v881_v29 }
 0x1ab   :  { %782 = vmatprep.subr.mxu1 %v738_v58 }
 0x1ac   :  { %783 = vmatpush1.msra.mxu1 %v737_v3 }
 0x1ad   :  { %784 = vmatprep.subr.mxu1 %v736_v63 }
 0x1ae   :  { %785 = vmatpush1.msra.mxu1 %v735_v4 }
 0x1af   :  { %786 = vmatprep.subr.mxu1 %v734_v9 }
 0x1b0   :  { %787 = vmatpush1.msra.mxu1 %v733_v52 }
 0x1b1   :  { %788 = vmatprep.subr.mxu1 %v732_v10 }
 0x1b2   :  { %789 = vmatpush1.msra.mxu1 %v731_v0 }
 0x1b3   :  { %939 = vmatmul.mubr.msk.f32.vlgmr.msra.gmra.mxu1 %vm751_vm1, %v639_v11 }
 0x1b4   :  { %828 = vmatprep.mubr.f32.mxu1 %v1034_v51 }
 0x1b7   :  { %940 = vmatmul.mubr.msk.f32.gmra.mxu1 %vm751_vm1, %v640_v61 }
 0x273   :  { %v824_v13 = vpop.f32.mrf.mxu1 }
 0x274   :  { %v837_v14 = vmul.f32 %v836_v12, %v824_v13 }
 0x275   :  { %v826_v7 = vpop.f32.mrf.mxu1 }
 0x276   :  { %v853_v16 = vadd.f32 %v846_v15, %v837_v14  ;;  %v838_v17 = vmul.f32 %v836_v12, %v826_v7 }
 0x277   :  { %v830_v51 = vpop.f32.mrf.mxu1 }
 0x278   :  { %v857_v55 = vsub.f32 0.0, %v853_v16  ;;  %v854_v18 = vadd.f32 %v846_v15, %v838_v17  ;;  %v839_v22 = vmul.f32 %v836_v12, %v830_v51 }
 0x279   :  { %v832_v21 = vpop.f32.mrf.mxu1 }
 0x27a   :  { %v859_v19 = vmul.f32 1.442695, %v857_v55  ;;  %v858_v57 = vsub.f32 0.0, %v854_v18  ;;  %v840_v23 = vmul.f32 %v836_v12, %v832_v21  ;;  %v855_v38 = vadd.f32 %v851_v62, %v839_v22 }
 0x27c   :  { %1006 = vpow2.f32 %v859_v19  ;;  %v861_v20 = vmul.f32 1.442695, %v858_v57  ;;  %v856_v44 = vadd.f32 %v851_v62, %v840_v23 }
 0x27e   :  { %1008 = vpow2.f32 %v861_v20 }
 0x27f   :  { %1010 = vtanh.f32 %v855_v38 }
 0x289   :  { %v1007_v30 = vpop.eup %1006 }
 0x28a   :  { %v863_v24 = vadd.f32 1.0, %v1007_v30 }
 0x28b   :  { %v1009_v25 = vpop.eup %1008 }
 0x28c   :  { %1012 = vrcp.f32 %v863_v24  ;;  %v864_v26 = vadd.f32 1.0, %v1009_v25  ;;  %v1011_v31 = vpop.eup %1010 }
 0x28d   :  { %1014 = vtanh.f32 %v856_v44 }
 0x28e   :  { %1016 = vrcp.f32 %v864_v26 }
 0x299   :  { %v1013_v35 = vpop.eup %1012 }
 0x29a   :  { %v1015_v36 = vpop.eup %1014  ;;  %v871_v53 = vmul.f32 %v1013_v35, %v1011_v31 }
 0x29b   :  { %v1017_v39 = vpop.eup %1016 }
 0x29c   :  { %v885_v40 = vmul.f32 %v878_v32, %v871_v53  ;;  %v872_v41 = vmul.f32 %v1017_v39, %v1015_v36 }
 0x29e   :  { %887 = vst [vmem:[%s1528_s7] sm:$0xff] %v885_v40  ;;  %v886_v43 = vmul.f32 %v882_v5, %v872_v41 }
 0x2a0   :  { %888 = vst [vmem:[%s1528_s7 + $0x8] sm:$0xff] %v886_v43 }
 0x2a1   :  { %893 = vsyncpa [#allocation3], 1 }

// kernel: reservoir_forward.9
= control target key start
LH: loop header
LB: loop body
LE: loop exit
PB: predicated region body
PF: predicated region fallthrough
CT: control target
= control target key end

     0   :  { %11 = vsyncpa [#allocation3], 0  ;;  %s832_s0 = inlined_call_operand.vmem [shape: f32[4], index: 0, kind: input, shape index: {}]   ;;  %s833_s1 = inlined_call_operand.vmem [shape: f32[64,16], index: 1, kind: input, shape index: {}]   ;;  %s834_s2 = inlined_call_operand.vmem [shape: f32[64,16], index: 2, kind: input, shape index: {}]   ;;  %s835_s3 = inlined_call_operand.vmem [shape: f32[64,1], index: 3, kind: input, shape index: {}]   ;;  %s836_s4 = inlined_call_operand.vmem [shape: f32[16,64], index: 4, kind: input, shape index: {}]   ;;  %s837_s5 = inlined_call_operand.vmem [shape: f32[16,1], index: 5, kind: input, shape index: {}]   ;;  %s838_s6 = inlined_call_operand.vmem [shape: f32[8,64], index: 6, kind: output, shape index: {}]  }
   0x1   :  { %s18_s23 = sshll.u32 %s832_s0, 4  ;;  %s19_s23 = int_to_ptr.vmem [resolvable:$true] %s18_s23 }
   0x2   :  { %s620_s24 = scalar_lea.vmem %s19_s23, 16  ;;  %p625_p1 = scmp.lt.s32.totalorder %s19_s23, %s19_s23 }
   0x3   :  { %p621_p0 = scmp.ne.s32.totalorder %s19_s23, %s620_s24  ;;  %p626_p2 = scmp.lt.s32.totalorder %s620_s24, %s620_s24 }
   0x5   :  { %p627_p3 = por %p626_p2, %p625_p1 }
   0x7   :  { %p628_p4 = pnand %p627_p3, %p621_p0 }
   0x9   :  { %631 = shalt.err (!%p628_p4)
}
   0xa   :  { %s634_s25 = smov [#allocation2]  }
   0xb   :  { %21 = dma.vmem_to_smem %s19_s23, 16, %s634_s25, [#allocation3]  }
   0xc   :  { %632 = dma.done.wait [#allocation3], 16  }
   0xd   :  { %633 = vsyncadd [#allocation3], 4294967280 }
   0xe   :  { %35 = sfence }
   0xf   :  { %s36_s26 = sld [smem:[#allocation2]]  ;;  %vm114_vm0 = vcmask 130048   ;;  %v50_v0 = vld [vmem:[%s834_s2] sm:$0xff]  ;;  %v635_v1 = vmov 0   ;;  %v65_v2 = vld [vmem:[%s835_s3 + $0x38] sm:$0xff]  ;;  %v63_v3 = vld [vmem:[%s835_s3 + $0x28] sm:$0xff] }
  0x10   :  { %s508_s27 = sld [smem:[#allocation2 + $0x1]]  ;;  %571 = vmatprep.mubr.msk.f32.mxu0 %vm114_vm0, %v50_v0  ;;  %608 = vset.pattern.permute.xlu0 %v635_v1  ;;  %v64_v5 = vld [vmem:[%s835_s3 + $0x30] sm:$0xff]  ;;  %v62_v6 = vld [vmem:[%s835_s3 + $0x20] sm:$0xff]  ;;  %v61_v11 = vld [vmem:[%s835_s3 + $0x18] sm:$0xff]  ;;  %vm394_vm1 = vcmask 523264  }
  0x11   :  { %s678_s0 = sld [smem:[#allocation2 + $0x2]]  ;;  %609 = vset.pattern.permute.xlu1 %v635_v1  ;;  %v60_v12 = vld [vmem:[%s835_s3 + $0x10] sm:$0xff]  ;;  %v59_v16 = vld [vmem:[%s835_s3 + $0x8] sm:$0xff]  ;;  %v58_v17 = vld [vmem:[%s835_s3] sm:$0xff] }
  0x12   :  { %s510_s10 = sld [smem:[#allocation2 + $0x3]]  ;;  %v344_v21 = vld [vmem:[%s837_s5] sm:$0xff]  ;;  %v345_v23 = vld [vmem:[%s837_s5 + $0x8] sm:$0xff]  ;;  %v49_v28 = vld [vmem:[%s833_s1 + $0x38] sm:$0xff] }
  0x13   :  { %v48_v29 = vld [vmem:[%s833_s1 + $0x30] sm:$0xff]  ;;  %v47_v30 = vld [vmem:[%s833_s1 + $0x28] sm:$0xff]  ;;  %v46_v34 = vld [vmem:[%s833_s1 + $0x20] sm:$0xff] }
  0x14   :  { %v45_v40 = vld [vmem:[%s833_s1 + $0x18] sm:$0xff]  ;;  %v44_v48 = vld [vmem:[%s833_s1 + $0x10] sm:$0xff]  ;;  %v43_v55 = vld [vmem:[%s833_s1 + $0x8] sm:$0xff] }
  0x15   :  { %v688_v4 = vstv %s36_s26  ;;  %v42_v61 = vld [vmem:[%s833_s1] sm:$0xff] }
  0x16   :  { %s686_s11 = ssub.f32 %s508_s27, %s36_s26  ;;  %v285_v7 = vmul.f32 %v688_v4, %v65_v2  ;;  %v283_v8 = vmul.f32 %v688_v4, %v63_v3  ;;  %v284_v9 = vmul.f32 %v688_v4, %v64_v5  ;;  %v282_v10 = vmul.f32 %v688_v4, %v62_v6 }
  0x17   :  { %v281_v14 = vmul.f32 %v688_v4, %v61_v11  ;;  %v280_v15 = vmul.f32 %v688_v4, %v60_v12  ;;  %v279_v19 = vmul.f32 %v688_v4, %v59_v16  ;;  %v278_v20 = vmul.f32 %v688_v4, %v58_v17  ;;  %v54_v16 = vld [vmem:[%s834_s2 + $0x20] sm:$0xff]  ;;  %v55_v17 = vld [vmem:[%s834_s2 + $0x28] sm:$0xff] }
  0x18   :  { %p66_p5 = scmp.gt.f32.partialorder %s686_s11, 0.0  ;;  %323 = vperm.xlu0 %608, %v285_v7   ;;  %313 = vperm.xlu1 %609, %v283_v8   ;;  %s709_s21 = ssub.f32 %s510_s10, %s678_s0  ;;  %v727_v22 = vstv %s678_s0  ;;  %v80_v31 = vsub.f32 %v49_v28, %v688_v4  ;;  %v79_v32 = vsub.f32 %v48_v29, %v688_v4  ;;  %v78_v33 = vsub.f32 %v47_v30, %v688_v4 }
  0x19   :  { %v480_v24 = vmul.f32 %v727_v22, %v344_v21  ;;  %v481_v25 = vmul.f32 %v727_v22, %v345_v23  ;;  %v77_v39 = vsub.f32 %v46_v34, %v688_v4  ;;  %v76_v43 = vsub.f32 %v45_v40, %v688_v4  ;;  %s268_s13 = smul.f32 0.003921569, %s686_s11 }
  0x1a   :  { %s67_s16 = scalar_select %p66_p5, %s686_s11, 1.0  ;;  %v75_v50 = vsub.f32 %v44_v48, %v688_v4  ;;  %v74_v56 = vsub.f32 %v43_v55, %v688_v4  ;;  %v73_v62 = vsub.f32 %v42_v61, %v688_v4 }
  0x1b   :  { %p346_p6 = scmp.gt.f32.partialorder %s709_s21, 0.0  ;;  %v269_v29 = vstv %s268_s13 }
  0x1c   :  { %v68_v13 = vstv %s67_s16  ;;  %318 = vperm.xlu0 %608, %v284_v9   ;;  %308 = vperm.xlu1 %609, %v282_v10   ;;  %s476_s16 = smul.f32 0.003921569, %s709_s21 }
  0x1d   :  { %610 = vrcp.f32 %v68_v13  ;;  %s347_s26 = scalar_select %p346_p6, %s709_s21, 1.0  ;;  %v51_v13 = vld [vmem:[%s834_s2 + $0x8] sm:$0xff] }
  0x1f   :  { %v348_v18 = vstv %s347_s26 }
  0x20   :  { %303 = vperm.xlu0 %608, %v281_v14   ;;  %298 = vperm.xlu1 %609, %v280_v15   ;;  %612 = vrcp.f32 %v348_v18  ;;  %v52_v14 = vld [vmem:[%s834_s2 + $0x10] sm:$0xff]  ;;  %v53_v15 = vld [vmem:[%s834_s2 + $0x18] sm:$0xff] }
  0x21   :  { %v56_v18 = vld [vmem:[%s834_s2 + $0x30] sm:$0xff] }
  0x24   :  { %293 = vperm.xlu0 %608, %v279_v19   ;;  %288 = vperm.xlu1 %609, %v278_v20   ;;  %v57_v19 = vld [vmem:[%s834_s2 + $0x38] sm:$0xff]  ;;  %v342_v20 = vld [vmem:[%s836_s4] sm:$0xff] }
  0x25   :  { %599 = vmatprep.mubr.msk.f32.mxu1 %vm394_vm1, %v342_v20 }
  0x28   :  { %484 = vperm.xlu0 %608, %v480_v24   ;;  %489 = vperm.xlu1 %609, %v481_v25  }
  0x2a   :  { %v611_v26 = vpop.eup %610 }
  0x2b   :  { %602 = vpush %v611_v26 }
  0x2d   :  { %v613_v27 = vpop.eup %612 }
  0x2e   :  { %604 = vpush %v613_v27 }
  0x5c   :  { %s603_s10 = spop %602 }
  0x5d   :  { %s71_s12 = smul.f32 255.0, %s603_s10 }
  0x5f   :  { %v81_v35 = vstv %s71_s12  ;;  %s605_s2 = spop %604 }
  0x60   :  { %v89_v36 = vmul.f32 %v81_v35, %v80_v31  ;;  %v88_v37 = vmul.f32 %v81_v35, %v79_v32  ;;  %v87_v38 = vmul.f32 %v81_v35, %v78_v33  ;;  %v86_v47 = vmul.f32 %v81_v35, %v77_v39  ;;  %s351_s11 = smul.f32 255.0, %s605_s2 }
  0x61   :  { %v85_v54 = vmul.f32 %v81_v35, %v76_v43  ;;  %v84_v60 = vmul.f32 %v81_v35, %v75_v50  ;;  %v83_v2 = vmul.f32 %v81_v35, %v74_v56  ;;  %v82_v7 = vmul.f32 %v81_v35, %v73_v62 }
  0x62   :  { %v97_v41 = vfloor.f32 %v89_v36  ;;  %v96_v42 = vfloor.f32 %v88_v37  ;;  %v95_v46 = vfloor.f32 %v87_v38  ;;  %v94_v53 = vfloor.f32 %v86_v47 }
  0x63   :  { %v93_v59 = vfloor.f32 %v85_v54  ;;  %v92_v1 = vfloor.f32 %v84_v60  ;;  %v91_v6 = vfloor.f32 %v83_v2  ;;  %v90_v10 = vfloor.f32 %v82_v7 }
  0x64   :  { %v105_v44 = vmax.f32 %v97_v41, 0.0  ;;  %v104_v45 = vmax.f32 %v96_v42, 0.0  ;;  %v103_v52 = vmax.f32 %v95_v46, 0.0  ;;  %v102_v58 = vmax.f32 %v94_v53, 0.0 }
  0x65   :  { %v101_v0 = vmax.f32 %v93_v59, 0.0  ;;  %v100_v5 = vmax.f32 %v92_v1, 0.0  ;;  %v99_v9 = vmax.f32 %v91_v6, 0.0  ;;  %v98_v11 = vmax.f32 %v90_v10, 0.0 }
  0x66   :  { %v113_v49 = vmin.f32 %v105_v44, 255.0  ;;  %v112_v51 = vmin.f32 %v104_v45, 255.0  ;;  %v111_v57 = vmin.f32 %v103_v52, 255.0  ;;  %v110_v63 = vmin.f32 %v102_v58, 255.0 }
  0x67   :  { %v109_v3 = vmin.f32 %v101_v0, 255.0  ;;  %v108_v8 = vmin.f32 %v100_v5, 255.0  ;;  %v107_v4 = vmin.f32 %v99_v9, 255.0  ;;  %v106_v12 = vmin.f32 %v98_v11, 255.0 }
  0x68   :  { %555 = vmatprep.subr.msk.mxu0 %vm114_vm0, %v113_v49 }
  0x69   :  { %556 = vmatpush3.xpose.msk.msra.mxu0 %vm114_vm0, %v113_v49 }
  0x6a   :  { %557 = vmatprep.subr.msk.mxu0 %vm114_vm0, %v112_v51 }
  0x6d   :  { %558 = vmatpush3.xpose.msk.msra.mxu0 %vm114_vm0, %v112_v51 }
  0x6e   :  { %559 = vmatprep.subr.msk.mxu0 %vm114_vm0, %v111_v57 }
  0x71   :  { %560 = vmatpush3.xpose.msk.msra.mxu0 %vm114_vm0, %v111_v57 }
  0x72   :  { %561 = vmatprep.subr.msk.mxu0 %vm114_vm0, %v110_v63 }
  0x75   :  { %562 = vmatpush3.xpose.msk.msra.mxu0 %vm114_vm0, %v110_v63  ;;  %v361_v63 = vstv %s351_s11 }
  0x76   :  { %563 = vmatprep.subr.msk.mxu0 %vm114_vm0, %v109_v3 }
  0x79   :  { %564 = vmatpush3.xpose.msk.msra.mxu0 %vm114_vm0, %v109_v3 }
  0x7a   :  { %565 = vmatprep.subr.msk.mxu0 %vm114_vm0, %v108_v8 }
  0x7d   :  { %566 = vmatpush3.xpose.msk.msra.mxu0 %vm114_vm0, %v108_v8 }
  0x7e   :  { %567 = vmatprep.subr.msk.mxu0 %vm114_vm0, %v107_v4 }
  0x81   :  { %568 = vmatpush3.xpose.msk.msra.mxu0 %vm114_vm0, %v107_v4 }
  0x82   :  { %569 = vmatprep.subr.msk.mxu0 %vm114_vm0, %v106_v12 }
  0x85   :  { %570 = vmatpush3.xpose.msk.msra.mxu0 %vm114_vm0, %v106_v12 }
  0x88   :  { %572 = vmatmul.mubr.msk.f32.vlgmr.msra.gmra.mxu0 %vm114_vm0, %v51_v13 }
  0x89   :  { %574 = vmatprep.mubr.msk.f32.mxu0 %vm114_vm0, %v52_v14 }
  0x8c   :  { %575 = vmatmul.mubr.msk.f32.gmra.mxu0 %vm114_vm0, %v53_v15 }
  0x8d   :  { %577 = vmatprep.mubr.msk.f32.mxu0 %vm114_vm0, %v54_v16 }
  0x90   :  { %578 = vmatmul.mubr.msk.f32.gmra.mxu0 %vm114_vm0, %v55_v17 }
  0x91   :  { %580 = vmatprep.mubr.msk.f32.mxu0 %vm114_vm0, %v56_v18 }
  0x93   :  { %v324_v21 = vpop.permute.xlu0 %323  ;;  %v314_v23 = vpop.permute.xlu1 %313 }
  0x94   :  { %581 = vmatmul.mubr.msk.f32.gmra.mxu0 %vm114_vm0, %v57_v19 }
  0x97   :  { %v319_v24 = vpop.permute.xlu0 %318  ;;  %v309_v26 = vpop.permute.xlu1 %308 }
  0x9b   :  { %v304_v30 = vpop.permute.xlu0 %303  ;;  %v299_v33 = vpop.permute.xlu1 %298 }
  0x9f   :  { %v294_v40 = vpop.permute.xlu0 %293  ;;  %v289_v45 = vpop.permute.xlu1 %288 }
 0x148   :  { %v573_v25 = vpop.f32.mrf.mxu0 }
 0x149   :  { %v271_v37 = vmul.f32 %v573_v25, %v269_v29 }
 0x14a   :  { %v229_v27 = vpop.f32.mrf.mxu0 }
 0x14b   :  { %v270_v43 = vmul.f32 %v269_v29, %v229_v27  ;;  %v327_v50 = vadd.f32 %v294_v40, %v271_v37  ;;  %v343_v40 = vld [vmem:[%s836_s4 + $0x8] sm:$0xff] }
 0x14c   :  { %v576_v28 = vpop.f32.mrf.mxu0 }
 0x14d   :  { %v273_v31 = vmul.f32 %v576_v28, %v269_v29  ;;  %v326_v57 = vadd.f32 %v289_v45, %v270_v43  ;;  %v335_v62 = vmax.f32 %v327_v50, 0.0  ;;  %v485_v45 = vpop.permute.xlu0 %484  ;;  %v490_v50 = vpop.permute.xlu1 %489 }
 0x14e   :  { %v239_v32 = vpop.f32.mrf.mxu0 }
 0x14f   :  { %v272_v35 = vmul.f32 %v269_v29, %v239_v32  ;;  %v329_v38 = vadd.f32 %v304_v30, %v273_v31  ;;  %v334_v5 = vmax.f32 %v326_v57, 0.0  ;;  %v354_v10 = vsub.f32 %v335_v62, %v727_v22 }
 0x150   :  { %v579_v34 = vpop.f32.mrf.mxu0 }
 0x151   :  { %v275_v36 = vmul.f32 %v579_v34, %v269_v29  ;;  %v328_v46 = vadd.f32 %v299_v33, %v272_v35  ;;  %v337_v51 = vmax.f32 %v329_v38, 0.0  ;;  %v353_v14 = vsub.f32 %v334_v5, %v727_v22 }
 0x152   :  { %v249_v39 = vpop.f32.mrf.mxu0  ;;  %v363_v19 = vmul.f32 %v361_v63, %v354_v10 }
 0x153   :  { %v331_v41 = vadd.f32 %v314_v23, %v275_v36  ;;  %v274_v42 = vmul.f32 %v269_v29, %v249_v39  ;;  %v336_v58 = vmax.f32 %v328_v46, 0.0  ;;  %v356_v0 = vsub.f32 %v337_v51, %v727_v22 }
 0x154   :  { %v582_v44 = vpop.f32.mrf.mxu0  ;;  %v362_v28 = vmul.f32 %v361_v63, %v353_v14  ;;  %v371_v31 = vfloor.f32 %v363_v19 }
 0x155   :  { %v339_v47 = vmax.f32 %v331_v41, 0.0  ;;  %v330_v48 = vadd.f32 %v309_v26, %v274_v42  ;;  %v277_v49 = vmul.f32 %v582_v44, %v269_v29  ;;  %v355_v6 = vsub.f32 %v336_v58, %v727_v22 }
 0x156   :  { %v259_v52 = vpop.f32.mrf.mxu0  ;;  %v365_v13 = vmul.f32 %v361_v63, %v356_v0  ;;  %v370_v33 = vfloor.f32 %v362_v28  ;;  %v379_v35 = vmax.f32 %v371_v31, 0.0  ;;  %v477_v42 = vstv %s476_s16 }
 0x157   :  { %v358_v53 = vsub.f32 %v339_v47, %v727_v22  ;;  %v338_v54 = vmax.f32 %v330_v48, 0.0  ;;  %v333_v55 = vadd.f32 %v324_v21, %v277_v49  ;;  %v276_v56 = vmul.f32 %v269_v29, %v259_v52 }
 0x158   :  { %v364_v18 = vmul.f32 %v361_v63, %v355_v6  ;;  %v378_v37 = vmax.f32 %v370_v33, 0.0  ;;  %v387_v38 = vmin.f32 %v379_v35, 255.0 }
 0x159   :  { %v357_v59 = vsub.f32 %v338_v54, %v727_v22  ;;  %v341_v60 = vmax.f32 %v333_v55, 0.0  ;;  %v332_v61 = vadd.f32 %v319_v24, %v276_v56  ;;  %v367_v3 = vmul.f32 %v361_v63, %v358_v53 }
 0x15a   :  { %v373_v24 = vfloor.f32 %v365_v13  ;;  %v372_v27 = vfloor.f32 %v364_v18  ;;  %v386_v39 = vmin.f32 %v378_v37, 255.0 }
 0x15b   :  { %v340_v1 = vmax.f32 %v332_v61, 0.0  ;;  %v360_v2 = vsub.f32 %v341_v60, %v727_v22  ;;  %v366_v9 = vmul.f32 %v361_v63, %v357_v59  ;;  %v375_v12 = vfloor.f32 %v367_v3 }
 0x15c   :  { %v381_v30 = vmax.f32 %v373_v24, 0.0  ;;  %v380_v32 = vmax.f32 %v372_v27, 0.0 }
 0x15d   :  { %v359_v7 = vsub.f32 %v340_v1, %v727_v22  ;;  %v369_v8 = vmul.f32 %v361_v63, %v360_v2  ;;  %v374_v17 = vfloor.f32 %v366_v9  ;;  %v383_v23 = vmax.f32 %v375_v12, 0.0 }
 0x15e   :  { %v389_v34 = vmin.f32 %v381_v30, 255.0  ;;  %v388_v36 = vmin.f32 %v380_v32, 255.0 }
 0x15f   :  { %v377_v4 = vfloor.f32 %v369_v8  ;;  %v368_v11 = vmul.f32 %v361_v63, %v359_v7  ;;  %v382_v26 = vmax.f32 %v374_v17, 0.0  ;;  %v391_v29 = vmin.f32 %v383_v23, 255.0 }
 0x161   :  { %v385_v15 = vmax.f32 %v377_v4, 0.0  ;;  %v376_v16 = vfloor.f32 %v368_v11  ;;  %v390_v22 = vmin.f32 %v382_v26, 255.0 }
 0x163   :  { %v393_v20 = vmin.f32 %v385_v15, 255.0  ;;  %v384_v21 = vmax.f32 %v376_v16, 0.0 }
 0x165   :  { %583 = vmatprep.subr.mxu1 %v393_v20  ;;  %v392_v25 = vmin.f32 %v384_v21, 255.0 }
 0x166   :  { %584 = vmatpush3.msra.mxu1 %v393_v20 }
 0x167   :  { %585 = vmatprep.subr.mxu1 %v392_v25 }
 0x168   :  { %586 = vmatpush3.msra.mxu1 %v392_v25 }
 0x169   :  { %587 = vmatprep.subr.mxu1 %v391_v29 }
 0x16a   :  { %588 = vmatpush3.msra.mxu1 %v391_v29 }
 0x16b   :  { %589 = vmatprep.subr.mxu1 %v390_v22 }
 0x16c   :  { %590 = vmatpush3.msra.mxu1 %v390_v22 }
 0x16d   :  { %591 = vmatprep.subr.mxu1 %v389_v34 }
 0x16e   :  { %592 = vmatpush3.msra.mxu1 %v389_v34 }
 0x16f   :  { %593 = vmatprep.subr.mxu1 %v388_v36 }
 0x170   :  { %594 = vmatpush3.msra.mxu1 %v388_v36 }
 0x171   :  { %595 = vmatprep.subr.mxu1 %v387_v38 }
 0x172   :  { %596 = vmatpush3.msra.mxu1 %v387_v38 }
 0x173   :  { %597 = vmatprep.subr.mxu1 %v386_v39 }
 0x174   :  { %598 = vmatpush3.msra.mxu1 %v386_v39 }
 0x175   :  { %600 = vmatmul.mubr.msk.f32.vlgmr.msra.gmra.mxu1 %vm394_vm1, %v343_v40 }
 0x235   :  { %v601_v41 = vpop.f32.mrf.mxu1 }
 0x236   :  { %v479_v49 = vmul.f32 %v601_v41, %v477_v42 }
 0x237   :  { %v467_v43 = vpop.f32.mrf.mxu1 }
 0x238   :  { %v478_v44 = vmul.f32 %v477_v42, %v467_v43  ;;  %v493_v51 = vadd.f32 %v490_v50, %v479_v49 }
 0x23a   :  { %v492_v46 = vadd.f32 %v485_v45, %v478_v44 }
 0x23c   :  { %v494_v47 = vsub.f32 0.0, %v492_v46 }
 0x23e   :  { %v495_v48 = vmul.f32 1.442695, %v494_v47 }
 0x240   :  { %614 = vpow2.f32 %v495_v48 }
 0x241   :  { %616 = vtanh.f32 %v493_v51 }
 0x24d   :  { %v615_v52 = vpop.eup %614 }
 0x24e   :  { %v497_v53 = vadd.f32 1.0, %v615_v52  ;;  %v617_v54 = vpop.eup %616 }
 0x250   :  { %618 = vrcp.f32 %v497_v53 }
 0x25d   :  { %v619_v55 = vpop.eup %618 }
 0x25e   :  { %v501_v56 = vmul.f32 %v619_v55, %v617_v54 }
 0x260   :  { %502 = vst.msk [vmem:[%s838_s6] sm:$0xff] %vm394_vm1, %v501_v56 }
 0x261   :  { %507 = vsyncpa [#allocation3], 1 }

</bundles_post_ra>
